<compile_context>
chip_gen: v6e
topology: v6e:2x2x1
jax: 0.10.0
libtpu: 0.0.40
codegen_flags: <defaults>
</compile_context>

<pallas_src>
import functools

import jax
import jax.numpy as jnp
from jax import lax
from jax.experimental import pallas as pl
from jax.experimental.pallas import tpu as pltpu


def _round_up(x, m):
    return ((x + m - 1) // m) * m


# ----------------------------- Pallas kernel --------------------------------

def _gemm_bias_act_kernel(w_ref, a_ref, b_ref, o_ref, *, act):
    """o = act(W @ A + bias).  W:(tco,Kp) bf16, A:(Kp,tm) bf16, bias:(tco,1) f32."""
    acc = jnp.dot(w_ref[...], a_ref[...], preferred_element_type=jnp.float32)
    acc = acc + b_ref[...]                     # (tco,1) broadcast along lanes
    if act == "relu":
        acc = jnp.maximum(acc, 0.0)
    elif act == "sigmoid":
        acc = jax.nn.sigmoid(acc)
    o_ref[...] = acc.astype(o_ref.dtype)


def _pick_tm(mp):
    """Lane-tile over M: prefer large tiles but keep >=2 grid steps when possible."""
    for cand in (512, 256):
        if mp % cand == 0 and mp // cand >= 2:
            return cand
    return 128 if (mp % 128 == 0 and mp > 128) else mp


def gemm_bias_act(wm, at, bias, act, out_dtype):
    """Lane-dense fused GEMM: act(W @ A + b).

    W:(Co,K)  A:(K,M)  bias:(Co,)  ->  (Co,M) in out_dtype.
    M (= batch*spatial) is the lane dimension of the output.
    """
    co, k = wm.shape
    k2, m = at.shape
    assert k == k2
    kp = _round_up(k, 128)      # align contraction dim (= weight lane dim)
    cop = _round_up(co, 8)
    mp = _round_up(m, 128)

    wm_p = jnp.pad(wm, ((0, cop - co), (0, kp - k))).astype(jnp.bfloat16)
    at_p = jnp.pad(at, ((0, kp - k), (0, mp - m))).astype(jnp.bfloat16)
    b_p = jnp.pad(bias.astype(jnp.float32), (0, cop - co)).reshape(cop, 1)

    tm = _pick_tm(mp)
    if cop >= 64 and (cop // 2) % 8 == 0:
        tco = cop // 2          # split Cout so small-M layers still get 2 grid steps
    else:
        tco = cop
    grid = (cop // tco, mp // tm)

    out = pl.pallas_call(
        functools.partial(_gemm_bias_act_kernel, act=act),
        out_shape=jax.ShapeDtypeStruct((cop, mp), out_dtype),
        grid_spec=pltpu.PrefetchScalarGridSpec(
            num_scalar_prefetch=0,
            grid=grid,
            in_specs=[
                pl.BlockSpec((tco, kp), lambda i, j: (i, 0)),   # weights
                pl.BlockSpec((kp, tm), lambda i, j: (0, j)),    # im2col columns
                pl.BlockSpec((tco, 1), lambda i, j: (i, 0)),    # bias column
            ],
            out_specs=pl.BlockSpec((tco, tm), lambda i, j: (i, j)),
        ),
        compiler_params=pltpu.CompilerParams(
            dimension_semantics=("parallel", "parallel")),
    )(wm_p, at_p, b_p)
    return out[:co, :m]


# --------------------------- conv layers (glue) ------------------------------
# Activations are carried in CNHW layout (channels first, then batch, H, W) so the
# patch matrix (K, M) and the kernel output (Cout, M) are plain reshapes.

def conv2d_cnhw(x_cnhw, w, b, stride, pad, act, out_dtype):
    """x: (Cin,N,H,W), w: (Cout,Cin,KH,KW) (PyTorch Conv2d layout)."""
    cin, n, h, wdt = x_cnhw.shape
    cout, cin2, kh, kw = w.shape
    assert cin == cin2
    ho = (h + 2 * pad - kh) // stride + 1
    wo = (wdt + 2 * pad - kw) // stride + 1
    # Single-gather im2col; output feature index = ci*KH*KW + ki*KW + kj
    patches = lax.conv_general_dilated_patches(
        x_cnhw, (kh, kw), (stride, stride), ((pad, pad), (pad, pad)),
        dimension_numbers=("CNHW", "OIHW", "CNHW"))          # (Cin*KH*KW, N, Ho, Wo)
    k = cin * kh * kw
    at = patches.reshape(k, n * ho * wo)                      # A^T: (K, M)
    wm = w.reshape(cout, k)                                   # (Cout, K) — same order
    out = gemm_bias_act(wm, at, b, act, out_dtype)            # (Cout, M)
    return out.reshape(cout, n, ho, wo)


def conv_transpose2d_cnhw(x_cnhw, w, b, act, out_dtype):
    """ConvTranspose2d(stride=2, kernel=6, padding=2) via polyphase decomposition.

    x: (Cin,N,H,W), w: (Cin,Cout,6,6) (PyTorch ConvTranspose2d layout).
    out[:, :, 2o+ph, 2q+pw] = stride-1 3x3 conv of x with sub-kernel
        w_sub[ph,pw][co,ci,a,b] = w[ci,co, ph+4-2a, pw+4-2b]
    All 4 phases share one im2col and one GEMM with 4*Cout output rows.
    """
    cin, n, h, wdt = x_cnhw.shape
    cin2, cout, kh, kw = w.shape
    assert cin == cin2 and kh == 6 and kw == 6
    patches = lax.conv_general_dilated_patches(
        x_cnhw, (3, 3), (1, 1), ((1, 1), (1, 1)),
        dimension_numbers=("CNHW", "OIHW", "CNHW"))           # (Cin*9, N, H, W)
    k = cin * 9
    at = patches.reshape(k, n * h * wdt)

    subs = []
    for ph in range(2):
        for pw in range(2):
            ws = jnp.flip(w[:, :, ph::2, pw::2], axis=(2, 3))        # (Cin,Cout,3,3)
            subs.append(ws.transpose(1, 0, 2, 3).reshape(cout, k))   # (Cout, Cin*9)
    wm = jnp.concatenate(subs, axis=0)                                # (4*Cout, K)
    bias4 = jnp.tile(b, 4)

    out = gemm_bias_act(wm, at, bias4, act, out_dtype)        # (4*Cout, N*H*W)
    out = out.reshape(2, 2, cout, n, h, wdt)                  # (ph, pw, Co, N, H, W)
    out = out.transpose(2, 3, 4, 0, 5, 1).reshape(cout, n, 2 * h, 2 * wdt)
    return out


# ----------------------------- model ----------------------------------------

def init_params(key):
    specs = [
        ("conv",   3,  32, 7),
        ("conv",  32,  64, 7),
        ("conv",  64, 128, 7),
        ("deconv", 128, 64, 6),
        ("deconv",  64, 32, 6),
        ("deconv",  32,  3, 6),
    ]
    params = []
    for i, (kind, cin, cout, k) in enumerate(specs):
        wk, bk = jax.random.split(jax.random.fold_in(key, i))
        fan_in = cin * k * k
        bound = 1.0 / jnp.sqrt(jnp.float32(fan_in))
        shape = (cout, cin, k, k) if kind == "conv" else (cin, cout, k, k)
        w = jax.random.uniform(wk, shape, jnp.float32, -bound, bound)
        bias = jax.random.uniform(bk, (cout,), jnp.float32, -bound, bound)
        params.append((w, bias))
    return params


def forward(params, x):
    (w1, b1), (w2, b2), (w3, b3), (w4, b4), (w5, b5), (w6, b6) = params
    h = x.transpose(1, 0, 2, 3).astype(jnp.bfloat16)          # NCHW -> CNHW, bf16
    h = conv2d_cnhw(h, w1, b1, 2, 3, "relu", jnp.bfloat16)
    h = conv2d_cnhw(h, w2, b2, 2, 3, "relu", jnp.bfloat16)
    h = conv2d_cnhw(h, w3, b3, 2, 3, "relu", jnp.bfloat16)
    h = conv_transpose2d_cnhw(h, w4, b4, "relu", jnp.bfloat16)
    h = conv_transpose2d_cnhw(h, w5, b5, "relu", jnp.bfloat16)
    h = conv_transpose2d_cnhw(h, w6, b6, "sigmoid", jnp.float32)
    return h.transpose(1, 0, 2, 3)                            # CNHW -> NCHW, f32


if __name__ == "__main__":
    key = jax.random.PRNGKey(0)
    params = init_params(key)
    x = jax.random.normal(jax.random.fold_in(key, 100), (2, 3, 32, 32), jnp.float32)

    out = jax.jit(forward)(params, x)
    out = jax.block_until_ready(out)

    assert out.shape == (2, 3, 32, 32), out.shape
    assert out.dtype == jnp.float32
    assert bool(jnp.all(jnp.isfinite(out)))
    assert bool(jnp.all((out >= 0.0) & (out <= 1.0)))  # sigmoid output range
    print("KERNEL_OK")
</pallas_src>

<mosaic_0001>
module attributes {stable_mosaic.version = 11 : i64} {
  func.func @_gemm_bias_act_kernel(%arg0: i32, %arg1: i32, %arg2: memref<32x256xbf16, #tpu.memory_space<vmem>>, %arg3: memref<256x256xbf16, #tpu.memory_space<vmem>>, %arg4: memref<32x1xf32, #tpu.memory_space<vmem>>, %arg5: memref<32x256xbf16, #tpu.memory_space<vmem>>) attributes {dimension_semantics = [#tpu.dimension_semantics<parallel>, #tpu.dimension_semantics<parallel>], iteration_bounds = array<i64: 1, 2>, scalar_prefetch = 0 : i64, scratch_operands = 0 : i64, tpu.core_type = #tpu.core_type<tc>, window_params = [{transform_indices = @transform_0, window_bounds = array<i64: 32, 256>}, {transform_indices = @transform_1, window_bounds = array<i64: 256, 256>}, {transform_indices = @transform_2, window_bounds = array<i64: 32, 1>}, {transform_indices = @transform_3, window_bounds = array<i64: 32, 256>}]} {
    %c0 = arith.constant 0 : index
    %c0_0 = arith.constant 0 : index
    %0 = vector.load %arg2[%c0, %c0_0] : memref<32x256xbf16, #tpu.memory_space<vmem>>, vector<32x256xbf16>
    %c0_1 = arith.constant 0 : index
    %c0_2 = arith.constant 0 : index
    %1 = vector.load %arg3[%c0_1, %c0_2] : memref<256x256xbf16, #tpu.memory_space<vmem>>, vector<256x256xbf16>
    %cst = arith.constant dense<0.000000e+00> : vector<32x256xf32>
    %2 = tpu.matmul %0, %1, %cst {dimension_numbers = #tpu.dot_dimension_numbers<[1], [0], [0], [1], [0, 0, 1, 1], [], []>} : vector<32x256xbf16>, vector<256x256xbf16>, vector<32x256xf32> -> vector<32x256xf32>
    %c0_3 = arith.constant 0 : index
    %c0_4 = arith.constant 0 : index
    %3 = vector.load %arg4[%c0_3, %c0_4] : memref<32x1xf32, #tpu.memory_space<vmem>>, vector<32x1xf32>
    %4 = vector.broadcast %3 : vector<32x1xf32> to vector<32x256xf32>
    %5 = arith.addf %2, %4 : vector<32x256xf32>
    %cst_5 = arith.constant 0.000000e+00 : f32
    %6 = vector.broadcast %cst_5 : f32 to vector<32x256xf32>
    %7 = arith.maximumf %5, %6 : vector<32x256xf32>
    %8 = arith.truncf %7 : vector<32x256xf32> to vector<32x256xbf16>
    %c0_6 = arith.constant 0 : index
    %c0_7 = arith.constant 0 : index
    %9 = vector.load %arg5[%c0_6, %c0_7] : memref<32x256xbf16, #tpu.memory_space<vmem>>, vector<32x256xbf16>
    tpu.vector_store %arg5[%c0_6, %c0_7], %8 {strides = array<i32>} : memref<32x256xbf16, #tpu.memory_space<vmem>>, vector<32x256xbf16>,
    return
  }
  func.func @transform_0(%arg0: i32, %arg1: i32) -> (i32, i32) {
    %c0_i32 = arith.constant 0 : i32
    %c0_i32_0 = arith.constant 0 : i32
    return %arg0, %c0_i32 : i32, i32
  }
  func.func @transform_1(%arg0: i32, %arg1: i32) -> (i32, i32) {
    %c0_i32 = arith.constant 0 : i32
    %c0_i32_0 = arith.constant 0 : i32
    return %c0_i32, %arg1 : i32, i32
  }
  func.func @transform_2(%arg0: i32, %arg1: i32) -> (i32, i32) {
    %c0_i32 = arith.constant 0 : i32
    %c0_i32_0 = arith.constant 0 : i32
    return %arg0, %c0_i32 : i32, i32
  }
  func.func @transform_3(%arg0: i32, %arg1: i32) -> (i32, i32) {
    %c0_i32 = arith.constant 0 : i32
    return %arg0, %arg1 : i32, i32
  }
}

module attributes {stable_mosaic.version = 11 : i64} {
  func.func @_gemm_bias_act_kernel(%arg0: i32, %arg1: i32, %arg2: memref<32x1664xbf16, #tpu.memory_space<vmem>>, %arg3: memref<1664x128xbf16, #tpu.memory_space<vmem>>, %arg4: memref<32x1xf32, #tpu.memory_space<vmem>>, %arg5: memref<32x128xbf16, #tpu.memory_space<vmem>>) attributes {dimension_semantics = [#tpu.dimension_semantics<parallel>, #tpu.dimension_semantics<parallel>], iteration_bounds = array<i64: 2, 1>, scalar_prefetch = 0 : i64, scratch_operands = 0 : i64, tpu.core_type = #tpu.core_type<tc>, window_params = [{transform_indices = @transform_0, window_bounds = array<i64: 32, 1664>}, {transform_indices = @transform_1, window_bounds = array<i64: 1664, 128>}, {transform_indices = @transform_2, window_bounds = array<i64: 32, 1>}, {transform_indices = @transform_3, window_bounds = array<i64: 32, 128>}]} {
    %c0 = arith.constant 0 : index
    %c0_0 = arith.constant 0 : index
    %0 = vector.load %arg2[%c0, %c0_0] : memref<32x1664xbf16, #tpu.memory_space<vmem>>, vector<32x1664xbf16>
    %c0_1 = arith.constant 0 : index
    %c0_2 = arith.constant 0 : index
    %1 = vector.load %arg3[%c0_1, %c0_2] : memref<1664x128xbf16, #tpu.memory_space<vmem>>, vector<1664x128xbf16>
    %cst = arith.constant dense<0.000000e+00> : vector<32x128xf32>
    %2 = tpu.matmul %0, %1, %cst {dimension_numbers = #tpu.dot_dimension_numbers<[1], [0], [0], [1], [0, 0, 1, 1], [], []>} : vector<32x1664xbf16>, vector<1664x128xbf16>, vector<32x128xf32> -> vector<32x128xf32>
    %c0_3 = arith.constant 0 : index
    %c0_4 = arith.constant 0 : index
    %3 = vector.load %arg4[%c0_3, %c0_4] : memref<32x1xf32, #tpu.memory_space<vmem>>, vector<32x1xf32>
    %4 = vector.broadcast %3 : vector<32x1xf32> to vector<32x128xf32>
    %5 = arith.addf %2, %4 : vector<32x128xf32>
    %cst_5 = arith.constant 0.000000e+00 : f32
    %6 = vector.broadcast %cst_5 : f32 to vector<32x128xf32>
    %7 = arith.maximumf %5, %6 : vector<32x128xf32>
    %8 = arith.truncf %7 : vector<32x128xf32> to vector<32x128xbf16>
    %c0_6 = arith.constant 0 : index
    %c0_7 = arith.constant 0 : index
    %9 = vector.load %arg5[%c0_6, %c0_7] : memref<32x128xbf16, #tpu.memory_space<vmem>>, vector<32x128xbf16>
    tpu.vector_store %arg5[%c0_6, %c0_7], %8 {strides = array<i32>} : memref<32x128xbf16, #tpu.memory_space<vmem>>, vector<32x128xbf16>,
    return
  }
  func.func @transform_0(%arg0: i32, %arg1: i32) -> (i32, i32) {
    %c0_i32 = arith.constant 0 : i32
    %c0_i32_0 = arith.constant 0 : i32
    return %arg0, %c0_i32 : i32, i32
  }
  func.func @transform_1(%arg0: i32, %arg1: i32) -> (i32, i32) {
    %c0_i32 = arith.constant 0 : i32
    %c0_i32_0 = arith.constant 0 : i32
    return %c0_i32, %arg1 : i32, i32
  }
  func.func @transform_2(%arg0: i32, %arg1: i32) -> (i32, i32) {
    %c0_i32 = arith.constant 0 : i32
    %c0_i32_0 = arith.constant 0 : i32
    return %arg0, %c0_i32 : i32, i32
  }
  func.func @transform_3(%arg0: i32, %arg1: i32) -> (i32, i32) {
    %c0_i32 = arith.constant 0 : i32
    return %arg0, %arg1 : i32, i32
  }
}

module attributes {stable_mosaic.version = 11 : i64} {
  func.func @_gemm_bias_act_kernel(%arg0: i32, %arg1: i32, %arg2: memref<64x3200xbf16, #tpu.memory_space<vmem>>, %arg3: memref<3200x128xbf16, #tpu.memory_space<vmem>>, %arg4: memref<64x1xf32, #tpu.memory_space<vmem>>, %arg5: memref<64x128xbf16, #tpu.memory_space<vmem>>) attributes {dimension_semantics = [#tpu.dimension_semantics<parallel>, #tpu.dimension_semantics<parallel>], iteration_bounds = array<i64: 2, 1>, scalar_prefetch = 0 : i64, scratch_operands = 0 : i64, tpu.core_type = #tpu.core_type<tc>, window_params = [{transform_indices = @transform_0, window_bounds = array<i64: 64, 3200>}, {transform_indices = @transform_1, window_bounds = array<i64: 3200, 128>}, {transform_indices = @transform_2, window_bounds = array<i64: 64, 1>}, {transform_indices = @transform_3, window_bounds = array<i64: 64, 128>}]} {
    %c0 = arith.constant 0 : index
    %c0_0 = arith.constant 0 : index
    %0 = vector.load %arg2[%c0, %c0_0] : memref<64x3200xbf16, #tpu.memory_space<vmem>>, vector<64x3200xbf16>
    %c0_1 = arith.constant 0 : index
    %c0_2 = arith.constant 0 : index
    %1 = vector.load %arg3[%c0_1, %c0_2] : memref<3200x128xbf16, #tpu.memory_space<vmem>>, vector<3200x128xbf16>
    %cst = arith.constant dense<0.000000e+00> : vector<64x128xf32>
    %2 = tpu.matmul %0, %1, %cst {dimension_numbers = #tpu.dot_dimension_numbers<[1], [0], [0], [1], [0, 0, 1, 1], [], []>} : vector<64x3200xbf16>, vector<3200x128xbf16>, vector<64x128xf32> -> vector<64x128xf32>
    %c0_3 = arith.constant 0 : index
    %c0_4 = arith.constant 0 : index
    %3 = vector.load %arg4[%c0_3, %c0_4] : memref<64x1xf32, #tpu.memory_space<vmem>>, vector<64x1xf32>
    %4 = vector.broadcast %3 : vector<64x1xf32> to vector<64x128xf32>
    %5 = arith.addf %2, %4 : vector<64x128xf32>
    %cst_5 = arith.constant 0.000000e+00 : f32
    %6 = vector.broadcast %cst_5 : f32 to vector<64x128xf32>
    %7 = arith.maximumf %5, %6 : vector<64x128xf32>
    %8 = arith.truncf %7 : vector<64x128xf32> to vector<64x128xbf16>
    %c0_6 = arith.constant 0 : index
    %c0_7 = arith.constant 0 : index
    %9 = vector.load %arg5[%c0_6, %c0_7] : memref<64x128xbf16, #tpu.memory_space<vmem>>, vector<64x128xbf16>
    tpu.vector_store %arg5[%c0_6, %c0_7], %8 {strides = array<i32>} : memref<64x128xbf16, #tpu.memory_space<vmem>>, vector<64x128xbf16>,
    return
  }
  func.func @transform_0(%arg0: i32, %arg1: i32) -> (i32, i32) {
    %c0_i32 = arith.constant 0 : i32
    %c0_i32_0 = arith.constant 0 : i32
    return %arg0, %c0_i32 : i32, i32
  }
  func.func @transform_1(%arg0: i32, %arg1: i32) -> (i32, i32) {
    %c0_i32 = arith.constant 0 : i32
    %c0_i32_0 = arith.constant 0 : i32
    return %c0_i32, %arg1 : i32, i32
  }
  func.func @transform_2(%arg0: i32, %arg1: i32) -> (i32, i32) {
    %c0_i32 = arith.constant 0 : i32
    %c0_i32_0 = arith.constant 0 : i32
    return %arg0, %c0_i32 : i32, i32
  }
  func.func @transform_3(%arg0: i32, %arg1: i32) -> (i32, i32) {
    %c0_i32 = arith.constant 0 : i32
    return %arg0, %arg1 : i32, i32
  }
}

module attributes {stable_mosaic.version = 11 : i64} {
  func.func @_gemm_bias_act_kernel(%arg0: i32, %arg1: i32, %arg2: memref<128x1152xbf16, #tpu.memory_space<vmem>>, %arg3: memref<1152x128xbf16, #tpu.memory_space<vmem>>, %arg4: memref<128x1xf32, #tpu.memory_space<vmem>>, %arg5: memref<128x128xbf16, #tpu.memory_space<vmem>>) attributes {dimension_semantics = [#tpu.dimension_semantics<parallel>, #tpu.dimension_semantics<parallel>], iteration_bounds = array<i64: 2, 1>, scalar_prefetch = 0 : i64, scratch_operands = 0 : i64, tpu.core_type = #tpu.core_type<tc>, window_params = [{transform_indices = @transform_0, window_bounds = array<i64: 128, 1152>}, {transform_indices = @transform_1, window_bounds = array<i64: 1152, 128>}, {transform_indices = @transform_2, window_bounds = array<i64: 128, 1>}, {transform_indices = @transform_3, window_bounds = array<i64: 128, 128>}]} {
    %c0 = arith.constant 0 : index
    %c0_0 = arith.constant 0 : index
    %0 = vector.load %arg2[%c0, %c0_0] : memref<128x1152xbf16, #tpu.memory_space<vmem>>, vector<128x1152xbf16>
    %c0_1 = arith.constant 0 : index
    %c0_2 = arith.constant 0 : index
    %1 = vector.load %arg3[%c0_1, %c0_2] : memref<1152x128xbf16, #tpu.memory_space<vmem>>, vector<1152x128xbf16>
    %cst = arith.constant dense<0.000000e+00> : vector<128x128xf32>
    %2 = tpu.matmul %0, %1, %cst {dimension_numbers = #tpu.dot_dimension_numbers<[1], [0], [0], [1], [0, 0, 1, 1], [], []>} : vector<128x1152xbf16>, vector<1152x128xbf16>, vector<128x128xf32> -> vector<128x128xf32>
    %c0_3 = arith.constant 0 : index
    %c0_4 = arith.constant 0 : index
    %3 = vector.load %arg4[%c0_3, %c0_4] : memref<128x1xf32, #tpu.memory_space<vmem>>, vector<128x1xf32>
    %4 = vector.broadcast %3 : vector<128x1xf32> to vector<128x128xf32>
    %5 = arith.addf %2, %4 : vector<128x128xf32>
    %cst_5 = arith.constant 0.000000e+00 : f32
    %6 = vector.broadcast %cst_5 : f32 to vector<128x128xf32>
    %7 = arith.maximumf %5, %6 : vector<128x128xf32>
    %8 = arith.truncf %7 : vector<128x128xf32> to vector<128x128xbf16>
    %c0_6 = arith.constant 0 : index
    %c0_7 = arith.constant 0 : index
    %9 = vector.load %arg5[%c0_6, %c0_7] : memref<128x128xbf16, #tpu.memory_space<vmem>>, vector<128x128xbf16>
    tpu.vector_store %arg5[%c0_6, %c0_7], %8 {strides = array<i32>} : memref<128x128xbf16, #tpu.memory_space<vmem>>, vector<128x128xbf16>,
    return
  }
  func.func @transform_0(%arg0: i32, %arg1: i32) -> (i32, i32) {
    %c0_i32 = arith.constant 0 : i32
    %c0_i32_0 = arith.constant 0 : i32
    return %arg0, %c0_i32 : i32, i32
  }
  func.func @transform_1(%arg0: i32, %arg1: i32) -> (i32, i32) {
    %c0_i32 = arith.constant 0 : i32
    %c0_i32_0 = arith.constant 0 : i32
    return %c0_i32, %arg1 : i32, i32
  }
  func.func @transform_2(%arg0: i32, %arg1: i32) -> (i32, i32) {
    %c0_i32 = arith.constant 0 : i32
    %c0_i32_0 = arith.constant 0 : i32
    return %arg0, %c0_i32 : i32, i32
  }
  func.func @transform_3(%arg0: i32, %arg1: i32) -> (i32, i32) {
    %c0_i32 = arith.constant 0 : i32
    return %arg0, %arg1 : i32, i32
  }
}

module attributes {stable_mosaic.version = 11 : i64} {
  func.func @_gemm_bias_act_kernel(%arg0: i32, %arg1: i32, %arg2: memref<64x640xbf16, #tpu.memory_space<vmem>>, %arg3: memref<640x128xbf16, #tpu.memory_space<vmem>>, %arg4: memref<64x1xf32, #tpu.memory_space<vmem>>, %arg5: memref<64x128xbf16, #tpu.memory_space<vmem>>) attributes {dimension_semantics = [#tpu.dimension_semantics<parallel>, #tpu.dimension_semantics<parallel>], iteration_bounds = array<i64: 2, 1>, scalar_prefetch = 0 : i64, scratch_operands = 0 : i64, tpu.core_type = #tpu.core_type<tc>, window_params = [{transform_indices = @transform_0, window_bounds = array<i64: 64, 640>}, {transform_indices = @transform_1, window_bounds = array<i64: 640, 128>}, {transform_indices = @transform_2, window_bounds = array<i64: 64, 1>}, {transform_indices = @transform_3, window_bounds = array<i64: 64, 128>}]} {
    %c0 = arith.constant 0 : index
    %c0_0 = arith.constant 0 : index
    %0 = vector.load %arg2[%c0, %c0_0] : memref<64x640xbf16, #tpu.memory_space<vmem>>, vector<64x640xbf16>
    %c0_1 = arith.constant 0 : index
    %c0_2 = arith.constant 0 : index
    %1 = vector.load %arg3[%c0_1, %c0_2] : memref<640x128xbf16, #tpu.memory_space<vmem>>, vector<640x128xbf16>
    %cst = arith.constant dense<0.000000e+00> : vector<64x128xf32>
    %2 = tpu.matmul %0, %1, %cst {dimension_numbers = #tpu.dot_dimension_numbers<[1], [0], [0], [1], [0, 0, 1, 1], [], []>} : vector<64x640xbf16>, vector<640x128xbf16>, vector<64x128xf32> -> vector<64x128xf32>
    %c0_3 = arith.constant 0 : index
    %c0_4 = arith.constant 0 : index
    %3 = vector.load %arg4[%c0_3, %c0_4] : memref<64x1xf32, #tpu.memory_space<vmem>>, vector<64x1xf32>
    %4 = vector.broadcast %3 : vector<64x1xf32> to vector<64x128xf32>
    %5 = arith.addf %2, %4 : vector<64x128xf32>
    %cst_5 = arith.constant 0.000000e+00 : f32
    %6 = vector.broadcast %cst_5 : f32 to vector<64x128xf32>
    %7 = arith.maximumf %5, %6 : vector<64x128xf32>
    %8 = arith.truncf %7 : vector<64x128xf32> to vector<64x128xbf16>
    %c0_6 = arith.constant 0 : index
    %c0_7 = arith.constant 0 : index
    %9 = vector.load %arg5[%c0_6, %c0_7] : memref<64x128xbf16, #tpu.memory_space<vmem>>, vector<64x128xbf16>
    tpu.vector_store %arg5[%c0_6, %c0_7], %8 {strides = array<i32>} : memref<64x128xbf16, #tpu.memory_space<vmem>>, vector<64x128xbf16>,
    return
  }
  func.func @transform_0(%arg0: i32, %arg1: i32) -> (i32, i32) {
    %c0_i32 = arith.constant 0 : i32
    %c0_i32_0 = arith.constant 0 : i32
    return %arg0, %c0_i32 : i32, i32
  }
  func.func @transform_1(%arg0: i32, %arg1: i32) -> (i32, i32) {
    %c0_i32 = arith.constant 0 : i32
    %c0_i32_0 = arith.constant 0 : i32
    return %c0_i32, %arg1 : i32, i32
  }
  func.func @transform_2(%arg0: i32, %arg1: i32) -> (i32, i32) {
    %c0_i32 = arith.constant 0 : i32
    %c0_i32_0 = arith.constant 0 : i32
    return %arg0, %c0_i32 : i32, i32
  }
  func.func @transform_3(%arg0: i32, %arg1: i32) -> (i32, i32) {
    %c0_i32 = arith.constant 0 : i32
    return %arg0, %arg1 : i32, i32
  }
}

module attributes {stable_mosaic.version = 11 : i64} {
  func.func @_gemm_bias_act_kernel(%arg0: i32, %arg1: i32, %arg2: memref<16x384xbf16, #tpu.memory_space<vmem>>, %arg3: memref<384x256xbf16, #tpu.memory_space<vmem>>, %arg4: memref<16x1xf32, #tpu.memory_space<vmem>>, %arg5: memref<16x256xf32, #tpu.memory_space<vmem>>) attributes {dimension_semantics = [#tpu.dimension_semantics<parallel>, #tpu.dimension_semantics<parallel>], iteration_bounds = array<i64: 1, 2>, scalar_prefetch = 0 : i64, scratch_operands = 0 : i64, tpu.core_type = #tpu.core_type<tc>, window_params = [{transform_indices = @transform_0, window_bounds = array<i64: 16, 384>}, {transform_indices = @transform_1, window_bounds = array<i64: 384, 256>}, {transform_indices = @transform_2, window_bounds = array<i64: 16, 1>}, {transform_indices = @transform_3, window_bounds = array<i64: 16, 256>}]} {
    %c0 = arith.constant 0 : index
    %c0_0 = arith.constant 0 : index
    %0 = vector.load %arg2[%c0, %c0_0] : memref<16x384xbf16, #tpu.memory_space<vmem>>, vector<16x384xbf16>
    %c0_1 = arith.constant 0 : index
    %c0_2 = arith.constant 0 : index
    %1 = vector.load %arg3[%c0_1, %c0_2] : memref<384x256xbf16, #tpu.memory_space<vmem>>, vector<384x256xbf16>
    %cst = arith.constant dense<0.000000e+00> : vector<16x256xf32>
    %2 = tpu.matmul %0, %1, %cst {dimension_numbers = #tpu.dot_dimension_numbers<[1], [0], [0], [1], [0, 0, 1, 1], [], []>} : vector<16x384xbf16>, vector<384x256xbf16>, vector<16x256xf32> -> vector<16x256xf32>
    %c0_3 = arith.constant 0 : index
    %c0_4 = arith.constant 0 : index
    %3 = vector.load %arg4[%c0_3, %c0_4] : memref<16x1xf32, #tpu.memory_space<vmem>>, vector<16x1xf32>
    %4 = vector.broadcast %3 : vector<16x1xf32> to vector<16x256xf32>
    %5 = arith.addf %2, %4 : vector<16x256xf32>
    %6 = arith.negf %5 : vector<16x256xf32>
    %7 = math.exp %6 : vector<16x256xf32>
    %cst_5 = arith.constant 1.000000e+00 : f32
    %8 = vector.broadcast %cst_5 : f32 to vector<16x256xf32>
    %9 = arith.addf %8, %7 : vector<16x256xf32>
    %10 = arith.divf %8, %9 : vector<16x256xf32>
    %c0_6 = arith.constant 0 : index
    %c0_7 = arith.constant 0 : index
    %11 = vector.load %arg5[%c0_6, %c0_7] : memref<16x256xf32, #tpu.memory_space<vmem>>, vector<16x256xf32>
    tpu.vector_store %arg5[%c0_6, %c0_7], %10 {strides = array<i32>} : memref<16x256xf32, #tpu.memory_space<vmem>>, vector<16x256xf32>,
    return
  }
  func.func @transform_0(%arg0: i32, %arg1: i32) -> (i32, i32) {
    %c0_i32 = arith.constant 0 : i32
    %c0_i32_0 = arith.constant 0 : i32
    return %arg0, %c0_i32 : i32, i32
  }
  func.func @transform_1(%arg0: i32, %arg1: i32) -> (i32, i32) {
    %c0_i32 = arith.constant 0 : i32
    %c0_i32_0 = arith.constant 0 : i32
    return %c0_i32, %arg1 : i32, i32
  }
  func.func @transform_2(%arg0: i32, %arg1: i32) -> (i32, i32) {
    %c0_i32 = arith.constant 0 : i32
    %c0_i32_0 = arith.constant 0 : i32
    return %arg0, %c0_i32 : i32, i32
  }
  func.func @transform_3(%arg0: i32, %arg1: i32) -> (i32, i32) {
    %c0_i32 = arith.constant 0 : i32
    return %arg0, %arg1 : i32, i32
  }
}

</mosaic_0001>

<bundles_post_ra>
// kernel: forward.6
= control target key start
LH: loop header
LB: loop body
LE: loop exit
PB: predicated region body
PF: predicated region fallthrough
CT: control target
= control target key end

     0   :  { %s1127_s12 = smov 0   ;;  %s1129_s13 = smov 0   ;;  %s1329_s0 = inlined_call_operand.vmem [shape: bf16[32,256], index: 0, kind: input, shape index: {}]   ;;  %s1330_s1 = inlined_call_operand.vmem [shape: bf16[256,512], index: 1, kind: input, shape index: {}]   ;;  %s1331_s2 = inlined_call_operand.vmem [shape: f32[32,1], index: 2, kind: input, shape index: {}]   ;;  %s1332_s3 = inlined_call_operand.vmem [shape: bf16[32,512], index: 3, kind: output, shape index: {}]  }
   0x1   :  { %s1131_s14 = smov 0   ;;  %s1133_s15 = smov 0  }
   0x2   :  { %s1135_s16 = smov 0  }
   0x3 LB: > { %s22_s17 = sadd.s32 1, %s1100_s15  ;;  %s874_s18 = sadd.s32 4294967295, %s1104_s16   ;;  %s1104_s16 = sphi %s1135_s16, %s13_s16   ;;  %s1100_s15 = sphi %s1133_s15, %s1337_s15   ;;  %s1096_s14 = sphi %s1131_s14, %s1336_s14   ;;  %s1092_s13 = sphi %s1129_s13, %s1335_s13   ;;  %s1088_s12 = sphi %s1127_s12, %s1334_s12  }
   0x4   : > { %p23_p0 = scmp.ge.s32.totalorder %s22_s17, 2  ;;  %p65_p1 = scmp.ne.s32.totalorder %s1092_s13, %s1088_s12 }
   0x5   : > { %p66_p2 = scmp.eq.s32.totalorder %s1104_s16, 0  ;;  %p123_p4 = scmp.eq.s32.totalorder %s874_s18, 1 }
   0x6   : > { %s1339_s17 = smov (%p23_p0, %s22_s17), 0  ;;  %s58_s20 = sadd.s32 1, %s1092_s13 }
   0x7   : > { %p67_p3 = por %p66_p2, %p65_p1  ;;  %s55_s19 = ssub.s32 %s1100_s15, %s1339_s17 }
   0x8   : > { %p56_p5 = scmp.eq.s32.totalorder %s55_s19, 0  ;;  %p1162_p6 = por %p123_p4, %p65_p1 }
   0x9   : > { %p879_p7 = scmp.ge.s32.totalorder %s1104_s16, 2 }
   0xa   : > { %s1167_s22 = scalar_select %p56_p5, %s1092_s13, %s58_s20  }
   0xb   : > { %164 = sbr.rel (%p879_p7) target bundleno = 36 (0x24), region = 24 }
  0x10   : > { %167 = sbr.rel (!%p67_p3) target bundleno = 36 (0x24), region = 28  ;;  %s169_s23 = sand.u32 (%p67_p3), 1, %s1092_s13  }
  0x11   : > { %s931_s24 = sshll.u32 (%p67_p3), %s1100_s15, 3  ;;  %s880_s25 = sshll.u32 (%p67_p3), %s169_s23, 8 }
  0x12   : > { %s1175_s28 = scalar_lea.vmem (%p67_p3), %s1330_s1, %s931_s24  ;;  %s1180_s29 = scalar_lea.vmem (%p67_p3), [#allocation2], %s880_s25 }
  0x13   : > { %v265_v0 = vld [vmem:[%s1175_s28] sm:$0xff] (%p67_p3)  ;;  %v267_v1 = vld [vmem:[%s1175_s28 + $0x10] sm:$0xff] (%p67_p3) }
  0x14   : > { %v269_v2 = vld [vmem:[%s1175_s28 + $0x20] sm:$0xff] (%p67_p3)  ;;  %266 = vst [vmem:[%s1180_s29] sm:$0xff] (%p67_p3), %v265_v0  ;;  %268 = vst [vmem:[%s1180_s29 + $0x8] sm:$0xff] (%p67_p3), %v267_v1  ;;  %v271_v3 = vld [vmem:[%s1175_s28 + $0x30] sm:$0xff] (%p67_p3) }
  0x15   : > { %270 = vst [vmem:[%s1180_s29 + $0x10] sm:$0xff] %v269_v2  ;;  %v273_v4 = vld [vmem:[%s1175_s28 + $0x40] sm:$0xff]  ;;  %v275_v5 = vld [vmem:[%s1175_s28 + $0x50] sm:$0xff]  ;;  %272 = vst [vmem:[%s1180_s29 + $0x18] sm:$0xff] %v271_v3 }
  0x16   : > { %274 = vst [vmem:[%s1180_s29 + $0x20] sm:$0xff] %v273_v4  ;;  %276 = vst [vmem:[%s1180_s29 + $0x28] sm:$0xff] %v275_v5  ;;  %v277_v6 = vld [vmem:[%s1175_s28 + $0x60] sm:$0xff]  ;;  %v279_v7 = vld [vmem:[%s1175_s28 + $0x70] sm:$0xff] }
  0x17   : > { %v281_v8 = vld [vmem:[%s1175_s28 + $0x80] sm:$0xff]  ;;  %278 = vst [vmem:[%s1180_s29 + $0x30] sm:$0xff] %v277_v6  ;;  %280 = vst [vmem:[%s1180_s29 + $0x38] sm:$0xff] %v279_v7  ;;  %v283_v9 = vld [vmem:[%s1175_s28 + $0x90] sm:$0xff] }
  0x18   : > { %282 = vst [vmem:[%s1180_s29 + $0x40] sm:$0xff] %v281_v8  ;;  %v285_v10 = vld [vmem:[%s1175_s28 + $0xa0] sm:$0xff]  ;;  %v287_v11 = vld [vmem:[%s1175_s28 + $0xb0] sm:$0xff]  ;;  %284 = vst [vmem:[%s1180_s29 + $0x48] sm:$0xff] %v283_v9 }
  0x19   : > { %286 = vst [vmem:[%s1180_s29 + $0x50] sm:$0xff] %v285_v10  ;;  %288 = vst [vmem:[%s1180_s29 + $0x58] sm:$0xff] %v287_v11  ;;  %v289_v12 = vld [vmem:[%s1175_s28 + $0xc0] sm:$0xff]  ;;  %v291_v13 = vld [vmem:[%s1175_s28 + $0xd0] sm:$0xff] }
  0x1a   : > { %v293_v14 = vld [vmem:[%s1175_s28 + $0xe0] sm:$0xff]  ;;  %290 = vst [vmem:[%s1180_s29 + $0x60] sm:$0xff] %v289_v12  ;;  %292 = vst [vmem:[%s1180_s29 + $0x68] sm:$0xff] %v291_v13  ;;  %v295_v15 = vld [vmem:[%s1175_s28 + $0xf0] sm:$0xff] }
  0x1b   : > { %294 = vst [vmem:[%s1180_s29 + $0x70] sm:$0xff] %v293_v14  ;;  %v297_v16 = vld [vmem:[%s1175_s28 + $0x100] sm:$0xff]  ;;  %v299_v17 = vld [vmem:[%s1175_s28 + $0x110] sm:$0xff]  ;;  %296 = vst [vmem:[%s1180_s29 + $0x78] sm:$0xff] %v295_v15 }
  0x1c   : > { %298 = vst [vmem:[%s1180_s29 + $0x80] sm:$0xff] %v297_v16  ;;  %300 = vst [vmem:[%s1180_s29 + $0x88] sm:$0xff] %v299_v17  ;;  %v301_v18 = vld [vmem:[%s1175_s28 + $0x120] sm:$0xff]  ;;  %v303_v19 = vld [vmem:[%s1175_s28 + $0x130] sm:$0xff] }
  0x1d   : > { %v305_v20 = vld [vmem:[%s1175_s28 + $0x140] sm:$0xff]  ;;  %302 = vst [vmem:[%s1180_s29 + $0x90] sm:$0xff] %v301_v18  ;;  %304 = vst [vmem:[%s1180_s29 + $0x98] sm:$0xff] %v303_v19  ;;  %v307_v21 = vld [vmem:[%s1175_s28 + $0x150] sm:$0xff] }
  0x1e   : > { %306 = vst [vmem:[%s1180_s29 + $0xa0] sm:$0xff] %v305_v20  ;;  %v309_v22 = vld [vmem:[%s1175_s28 + $0x160] sm:$0xff]  ;;  %v311_v23 = vld [vmem:[%s1175_s28 + $0x170] sm:$0xff]  ;;  %308 = vst [vmem:[%s1180_s29 + $0xa8] sm:$0xff] %v307_v21 }
  0x1f   : > { %310 = vst [vmem:[%s1180_s29 + $0xb0] sm:$0xff] %v309_v22  ;;  %312 = vst [vmem:[%s1180_s29 + $0xb8] sm:$0xff] %v311_v23  ;;  %v313_v24 = vld [vmem:[%s1175_s28 + $0x180] sm:$0xff]  ;;  %v315_v25 = vld [vmem:[%s1175_s28 + $0x190] sm:$0xff] }
  0x20   : > { %v317_v26 = vld [vmem:[%s1175_s28 + $0x1a0] sm:$0xff]  ;;  %314 = vst [vmem:[%s1180_s29 + $0xc0] sm:$0xff] %v313_v24  ;;  %316 = vst [vmem:[%s1180_s29 + $0xc8] sm:$0xff] %v315_v25  ;;  %v319_v27 = vld [vmem:[%s1175_s28 + $0x1b0] sm:$0xff] }
  0x21   : > { %318 = vst [vmem:[%s1180_s29 + $0xd0] sm:$0xff] %v317_v26  ;;  %v321_v28 = vld [vmem:[%s1175_s28 + $0x1c0] sm:$0xff]  ;;  %v323_v29 = vld [vmem:[%s1175_s28 + $0x1d0] sm:$0xff]  ;;  %320 = vst [vmem:[%s1180_s29 + $0xd8] sm:$0xff] %v319_v27 }
  0x22   : > { %322 = vst [vmem:[%s1180_s29 + $0xe0] sm:$0xff] %v321_v28  ;;  %324 = vst [vmem:[%s1180_s29 + $0xe8] sm:$0xff] %v323_v29  ;;  %v325_v30 = vld [vmem:[%s1175_s28 + $0x1e0] sm:$0xff]  ;;  %v327_v31 = vld [vmem:[%s1175_s28 + $0x1f0] sm:$0xff] }
  0x23   : > { %326 = vst [vmem:[%s1180_s29 + $0xf0] sm:$0xff] %v325_v30  ;;  %328 = vst [vmem:[%s1180_s29 + $0xf8] sm:$0xff] %v327_v31 }
  0x24 PF: > { %p883_p8 = scmp.ge.s32.totalorder %s1104_s16, 1  ;;  %p333_p9 = scmp.lt.s32.totalorder %s1104_s16, 3 }
  0x26   : > { %p334_p10 = pnand %p883_p8, %p333_p9 }
  0x27   : > { %s340_s30 = sand.u32 (!%p334_p10), 1, %s1088_s12  }
  0x28   : > { %337 = sbr.rel (%p334_p10) target bundleno = 327 (0x147), region = 66  ;;  %s884_s4 = sshll.u32 (!%p334_p10), %s340_s30, 8 }
  0x29   : > { %s1257_s11 = scalar_lea.vmem (!%p334_p10), [#allocation2], %s884_s4  ;;  %s885_s4 = sshll.u32 (!%p334_p10), %s340_s30, 5 }
  0x2a   : > { %s372_s12 = scalar_lea.vmem (!%p334_p10), [#allocation3], %s885_s4 }
  0x2d   : > { %v1062_v32 = vld [vmem:[%s1329_s0 + $0x4] ss:$8 sps:$4 sm:$0xff]   ;;  %v1106_v33 = vmov 0   ;;  %v1065_v34 = vld [vmem:[%s1329_s0 + $0x14] ss:$8 sps:$4 sm:$0xff]   ;;  %s936_s30 = sshll.u32 (%p1162_p6), %s1096_s14, 3 }
  0x2e   : > { %1011 = vset.pattern.permute.xlu1 %v1106_v33  ;;  %1010 = vset.pattern.permute.xlu0 %v1106_v33  ;;  %v427_v35 = vld [vmem:[%s1331_s2 + $0x10] sm:$0xff]  ;;  %v1015_v38 = vld [vmem:[%s1257_s11 + $0x64] ss:$8 sps:$4 sm:$0xff]   ;;  %v1017_v39 = vld [vmem:[%s1257_s11 + $0x60] ss:$8 sps:$4 sm:$0xff]   ;;  %s730_s7 = scalar_lea.vmem (%p1162_p6), %s1332_s3, %s936_s30 }
  0x2f   : > { %v1012_v36 = vld [vmem:[%s1257_s11 + $0x74] ss:$8 sps:$4 sm:$0xff]   ;;  %661 = vmatprep.mubr.bf16.mxu0 %v1062_v32  ;;  %441 = vperm.xlu1 %1011, %v427_v35   ;;  %v1014_v37 = vld [vmem:[%s1257_s11 + $0x70] ss:$8 sps:$4 sm:$0xff]   ;;  %v1021_v42 = vld [vmem:[%s1257_s11 + $0x44] ss:$8 sps:$4 sm:$0xff]  }
  0x30   : > { %671 = vmatprep.mubr.bf16.mxu1 %v1065_v34  ;;  %629 = vmatprep.subr.bf16.mxu0 %v1012_v36  ;;  %v1018_v40 = vld [vmem:[%s1257_s11 + $0x54] ss:$8 sps:$4 sm:$0xff]   ;;  %v1020_v41 = vld [vmem:[%s1257_s11 + $0x50] ss:$8 sps:$4 sm:$0xff]   ;;  %v1023_v43 = vld [vmem:[%s1257_s11 + $0x40] ss:$8 sps:$4 sm:$0xff]  }
  0x31   : > { %937 = vmatprep.subr.bf16.mxu1 %v1012_v36  ;;  %630 = vmatpush1.bf16.msra.mxu0 %v1014_v37  ;;  %v1024_v44 = vld [vmem:[%s1257_s11 + $0x34] ss:$8 sps:$4 sm:$0xff]   ;;  %v1026_v45 = vld [vmem:[%s1257_s11 + $0x30] ss:$8 sps:$4 sm:$0xff]   ;;  %v1027_v46 = vld [vmem:[%s1257_s11 + $0x24] ss:$8 sps:$4 sm:$0xff]  }
  0x32   : > { %953 = vmatpush1.bf16.msra.mxu1 %v1014_v37  ;;  %631 = vmatprep.subr.bf16.mxu0 %v1015_v38  ;;  %v1029_v47 = vld [vmem:[%s1257_s11 + $0x20] ss:$8 sps:$4 sm:$0xff]   ;;  %v1030_v48 = vld [vmem:[%s1257_s11 + $0x14] ss:$8 sps:$4 sm:$0xff]   ;;  %v1032_v51 = vld [vmem:[%s1257_s11 + $0x10] ss:$8 sps:$4 sm:$0xff]  }
  0x33   : > { %938 = vmatprep.subr.bf16.mxu1 %v1015_v38  ;;  %v425_v49 = vld [vmem:[%s1331_s2] sm:$0xff]  ;;  %v428_v50 = vld [vmem:[%s1331_s2 + $0x18] sm:$0xff]  ;;  %v426_v52 = vld [vmem:[%s1331_s2 + $0x8] sm:$0xff] }
  0x34   : > { %431 = vperm.xlu0 %1010, %v425_v49   ;;  %446 = vperm.xlu1 %1011, %v428_v50   ;;  %v1033_v53 = vld [vmem:[%s1257_s11 + $0x4] ss:$8 sps:$4 sm:$0xff]   ;;  %v1035_v54 = vld [vmem:[%s1257_s11] ss:$8 sps:$4 sm:$0xff]   ;;  %v1036_v55 = vld [vmem:[%s1257_s11 + $0xf4] ss:$8 sps:$4 sm:$0xff]  }
  0x35   : > { %632 = vmatpush1.bf16.msra.mxu0 %v1017_v39  ;;  %v1038_v56 = vld [vmem:[%s1257_s11 + $0xf0] ss:$8 sps:$4 sm:$0xff]   ;;  %v1039_v57 = vld [vmem:[%s1257_s11 + $0xe4] ss:$8 sps:$4 sm:$0xff]   ;;  %v1041_v58 = vld [vmem:[%s1257_s11 + $0xe0] ss:$8 sps:$4 sm:$0xff]  }
  0x36   : > { %954 = vmatpush1.bf16.msra.mxu1 %v1017_v39  ;;  %633 = vmatprep.subr.bf16.mxu0 %v1018_v40  ;;  %v1042_v59 = vld [vmem:[%s1257_s11 + $0xd4] ss:$8 sps:$4 sm:$0xff]   ;;  %v1044_v60 = vld [vmem:[%s1257_s11 + $0xd0] ss:$8 sps:$4 sm:$0xff]   ;;  %v1045_v61 = vld [vmem:[%s1257_s11 + $0xc4] ss:$8 sps:$4 sm:$0xff]  }
  0x37   : > { %939 = vmatprep.subr.bf16.mxu1 %v1018_v40  ;;  %v1047_v62 = vld [vmem:[%s1257_s11 + $0xc0] ss:$8 sps:$4 sm:$0xff]   ;;  %v1048_v63 = vld [vmem:[%s1257_s11 + $0xb4] ss:$8 sps:$4 sm:$0xff]   ;;  %v1050_v0 = vld [vmem:[%s1257_s11 + $0xb0] ss:$8 sps:$4 sm:$0xff]  }
  0x38   : > { %436 = vperm.xlu0 %1010, %v426_v52   ;;  %v1051_v1 = vld [vmem:[%s1257_s11 + $0xa4] ss:$8 sps:$4 sm:$0xff]   ;;  %v1053_v2 = vld [vmem:[%s1257_s11 + $0xa0] ss:$8 sps:$4 sm:$0xff]   ;;  %v1054_v3 = vld [vmem:[%s1257_s11 + $0x94] ss:$8 sps:$4 sm:$0xff]  }
  0x39   : > { %634 = vmatpush1.bf16.msra.mxu0 %v1020_v41  ;;  %v1056_v4 = vld [vmem:[%s1257_s11 + $0x90] ss:$8 sps:$4 sm:$0xff]   ;;  %v1057_v5 = vld [vmem:[%s1257_s11 + $0x84] ss:$8 sps:$4 sm:$0xff]   ;;  %v1059_v6 = vld [vmem:[%s1257_s11 + $0x80] ss:$8 sps:$4 sm:$0xff]  }
  0x3a   : > { %955 = vmatpush1.bf16.msra.mxu1 %v1020_v41  ;;  %635 = vmatprep.subr.bf16.mxu0 %v1021_v42  ;;  %v1060_v7 = vld [vmem:[%s1329_s0] ss:$8 sps:$4 sm:$0xff]   ;;  %v1063_v8 = vld [vmem:[%s1329_s0 + $0x10] ss:$8 sps:$4 sm:$0xff]  }
  0x3b   : > { %940 = vmatprep.subr.bf16.mxu1 %v1021_v42 }
  0x3d   : > { %636 = vmatpush1.bf16.msra.mxu0 %v1023_v43 }
  0x3e   : > { %956 = vmatpush1.bf16.msra.mxu1 %v1023_v43  ;;  %637 = vmatprep.subr.bf16.mxu0 %v1024_v44 }
  0x3f   : > { %941 = vmatprep.subr.bf16.mxu1 %v1024_v44 }
  0x41   : > { %638 = vmatpush1.bf16.msra.mxu0 %v1026_v45 }
  0x42   : > { %957 = vmatpush1.bf16.msra.mxu1 %v1026_v45  ;;  %639 = vmatprep.subr.bf16.mxu0 %v1027_v46 }
  0x43   : > { %942 = vmatprep.subr.bf16.mxu1 %v1027_v46 }
  0x45   : > { %640 = vmatpush1.bf16.msra.mxu0 %v1029_v47 }
  0x46   : > { %958 = vmatpush1.bf16.msra.mxu1 %v1029_v47  ;;  %641 = vmatprep.subr.bf16.mxu0 %v1030_v48 }
  0x47   : > { %943 = vmatprep.subr.bf16.mxu1 %v1030_v48 }
  0x49   : > { %642 = vmatpush1.bf16.msra.mxu0 %v1032_v51 }
  0x4a   : > { %959 = vmatpush1.bf16.msra.mxu1 %v1032_v51  ;;  %643 = vmatprep.subr.bf16.mxu0 %v1033_v53 }
  0x4b   : > { %944 = vmatprep.subr.bf16.mxu1 %v1033_v53 }
  0x4d   : > { %644 = vmatpush1.bf16.msra.mxu0 %v1035_v54 }
  0x4e   : > { %960 = vmatpush1.bf16.msra.mxu1 %v1035_v54  ;;  %645 = vmatprep.subr.bf16.mxu0 %v1036_v55 }
  0x4f   : > { %945 = vmatprep.subr.bf16.mxu1 %v1036_v55 }
  0x51   : > { %646 = vmatpush2.bf16.msra.mxu0 %v1038_v56 }
  0x52   : > { %961 = vmatpush2.bf16.msra.mxu1 %v1038_v56  ;;  %647 = vmatprep.subr.bf16.mxu0 %v1039_v57 }
  0x53   : > { %946 = vmatprep.subr.bf16.mxu1 %v1039_v57 }
  0x55   : > { %648 = vmatpush2.bf16.msra.mxu0 %v1041_v58 }
  0x56   : > { %962 = vmatpush2.bf16.msra.mxu1 %v1041_v58  ;;  %649 = vmatprep.subr.bf16.mxu0 %v1042_v59 }
  0x57   : > { %947 = vmatprep.subr.bf16.mxu1 %v1042_v59 }
  0x59   : > { %650 = vmatpush2.bf16.msra.mxu0 %v1044_v60 }
  0x5a   : > { %963 = vmatpush2.bf16.msra.mxu1 %v1044_v60  ;;  %651 = vmatprep.subr.bf16.mxu0 %v1045_v61 }
  0x5b   : > { %948 = vmatprep.subr.bf16.mxu1 %v1045_v61 }
  0x5d   : > { %652 = vmatpush2.bf16.msra.mxu0 %v1047_v62 }
  0x5e   : > { %964 = vmatpush2.bf16.msra.mxu1 %v1047_v62  ;;  %653 = vmatprep.subr.bf16.mxu0 %v1048_v63 }
  0x5f   : > { %949 = vmatprep.subr.bf16.mxu1 %v1048_v63 }
  0x61   : > { %654 = vmatpush2.bf16.msra.mxu0 %v1050_v0 }
  0x62   : > { %965 = vmatpush2.bf16.msra.mxu1 %v1050_v0  ;;  %655 = vmatprep.subr.bf16.mxu0 %v1051_v1 }
  0x63   : > { %950 = vmatprep.subr.bf16.mxu1 %v1051_v1 }
  0x65   : > { %656 = vmatpush2.bf16.msra.mxu0 %v1053_v2 }
  0x66   : > { %966 = vmatpush2.bf16.msra.mxu1 %v1053_v2  ;;  %657 = vmatprep.subr.bf16.mxu0 %v1054_v3 }
  0x67   : > { %951 = vmatprep.subr.bf16.mxu1 %v1054_v3 }
  0x69   : > { %658 = vmatpush2.bf16.msra.mxu0 %v1056_v4 }
  0x6a   : > { %967 = vmatpush2.bf16.msra.mxu1 %v1056_v4  ;;  %659 = vmatprep.subr.bf16.mxu0 %v1057_v5 }
  0x6b   : > { %952 = vmatprep.subr.bf16.mxu1 %v1057_v5 }
  0x6d   : > { %660 = vmatpush2.bf16.msra.mxu0 %v1059_v6 }
  0x6e   : > { %968 = vmatpush2.bf16.msra.mxu1 %v1059_v6 }
  0x70   : > { %662 = vmatmul.mubr.bf16.vlgmr.msra.gmra.mxu0 %v1060_v7 }
  0x71   : > { %672 = vmatmul.mubr.bf16.vlgmr.msra.gmra.mxu1 %v1063_v8 }
  0xaa   : > { %v442_v9 = vpop.permute.xlu1 %441 }
  0xaf   : > { %v432_v10 = vpop.permute.xlu0 %431  ;;  %v447_v23 = vpop.permute.xlu1 %446 }
  0xb3   : > { %v437_v24 = vpop.permute.xlu0 %436 }
 0x130   : > { %v663_v11 = vpop.f32.mrf.mxu0 }
 0x131   : > { %v673_v12 = vpop.f32.mrf.mxu1  ;;  %v664_v13 = vadd.f32 %v663_v11, %v432_v10 }
 0x132   : > { %v674_v14 = vadd.f32 %v673_v12, %v442_v9  ;;  %v665_v15 = vpop.f32.mrf.mxu0 }
 0x133   : > { %v675_v16 = vpop.f32.mrf.mxu1  ;;  %v666_v17 = vadd.f32 %v665_v15, %v432_v10  ;;  %v682_v21 = vmax.f32 %v664_v13, 0.0 }
 0x134   : > { %v676_v18 = vadd.f32 %v675_v16, %v442_v9  ;;  %v667_v19 = vpop.f32.mrf.mxu0  ;;  %v686_v22 = vmax.f32 %v674_v14, 0.0 }
 0x135   : > { %v677_v20 = vpop.f32.mrf.mxu1  ;;  %v683_v25 = vmax.f32 %v666_v17, 0.0  ;;  %v668_v27 = vadd.f32 %v667_v19, %v437_v24 }
 0x136   : > { %v687_v26 = vmax.f32 %v676_v18, 0.0  ;;  %v678_v28 = vadd.f32 %v677_v20, %v447_v23  ;;  %v669_v29 = vpop.f32.mrf.mxu0 }
 0x137   : > { %v679_v30 = vpop.f32.mrf.mxu1  ;;  %v932_v31 = vpack.c.bf16 %v683_v25, %v682_v21  ;;  %v670_v33 = vadd.f32 %v669_v29, %v437_v24  ;;  %v684_v35 = vmax.f32 %v668_v27, 0.0 }
 0x138   : > { %v934_v32 = vpack.c.bf16 %v687_v26, %v686_v22  ;;  %v680_v34 = vadd.f32 %v679_v30, %v447_v23  ;;  %v688_v36 = vmax.f32 %v678_v28, 0.0 }
 0x139   : > { %714 = vst [vmem:[%s372_s12] sm:$0xff] %v932_v31  ;;  %v685_v37 = vmax.f32 %v670_v33, 0.0 }
 0x13a   : > { %716 = vst [vmem:[%s372_s12 + $0x10] sm:$0xff] %v934_v32  ;;  %v689_v38 = vmax.f32 %v680_v34, 0.0  ;;  %724 = sbr.rel (!%p1162_p6) target bundleno = 327 (0x147), region = 74 }
 0x13b   : > { %v933_v39 = vpack.c.bf16 %v685_v37, %v684_v35 }
 0x13c   : > { %v935_v40 = vpack.c.bf16 %v689_v38, %v688_v36 }
 0x13d   : > { %715 = vst [vmem:[%s372_s12 + $0x8] sm:$0xff] %v933_v39 }
 0x13e   : > { %717 = vst [vmem:[%s372_s12 + $0x18] sm:$0xff] %v935_v40 }
 0x140   : > { %v765_v41 = vld [vmem:[%s372_s12] sm:$0xff] }
 0x141   : > { %v769_v43 = vld [vmem:[%s372_s12 + $0x10] sm:$0xff]  ;;  %766 = vst [vmem:[%s730_s7] sm:$0xff] %v765_v41 }
 0x142   : > { %770 = vst [vmem:[%s730_s7 + $0x20] sm:$0xff] %v769_v43 }
 0x144   : > { %v767_v42 = vld [vmem:[%s372_s12 + $0x8] sm:$0xff] }
 0x145   : > { %v771_v44 = vld [vmem:[%s372_s12 + $0x18] sm:$0xff]  ;;  %768 = vst [vmem:[%s730_s7 + $0x10] sm:$0xff] %v767_v42 }
 0x146   : > { %772 = vst [vmem:[%s730_s7 + $0x30] sm:$0xff] %v771_v44 }
 0x147 PF: > { %s13_s16 = sadd.s32 1, %s1104_s16   ;;  %s1334_s12 = smov %s1092_s13 }
 0x148   : > { %p10_p11 = scmp.ge.s32.totalorder %s13_s16, 4   ;;  %s1335_s13 = smov %s1167_s22 }
 0x149   : > { %s1336_s14 = smov %s1100_s15  ;;  %s1337_s15 = smov %s1339_s17 }
 0x14a   :  { %12 = sbr.rel (!%p10_p11) target bundleno = 3 (0x3), region = 149 }

// kernel: forward.7
= control target key start
LH: loop header
LB: loop body
LE: loop exit
PB: predicated region body
PF: predicated region fallthrough
CT: control target
= control target key end

     0   :  { %s2298_s12 = smov 0   ;;  %s2300_s13 = smov 0   ;;  %s2682_s0 = inlined_call_operand.vmem [shape: bf16[64,1664], index: 0, kind: input, shape index: {}]   ;;  %s2683_s1 = inlined_call_operand.vmem [shape: bf16[1664,128], index: 1, kind: input, shape index: {}]   ;;  %s2684_s2 = inlined_call_operand.vmem [shape: f32[64,1], index: 2, kind: input, shape index: {}]   ;;  %s2685_s3 = inlined_call_operand.vmem [shape: bf16[64,128], index: 3, kind: output, shape index: {}]  }
   0x1   :  { %s2302_s14 = smov 0  }
   0x2 LB: > { %s25_s15 = sadd.s32 1, %s2271_s13  ;;  %p1727_p0 = scmp.ge.s32.totalorder %s2275_s14, 1  ;;  %s2275_s14 = sphi %s2302_s14, %s13_s14   ;;  %s2271_s13 = sphi %s2300_s13, %s2687_s13   ;;  %s2267_s12 = sphi %s2298_s12, %s2686_s12  }
   0x3   : > { %p27_p1 = scmp.ge.s32.totalorder %s25_s15, 2  ;;  %p173_p2 = scmp.lt.s32.totalorder %s2275_s14, 3 }
   0x5   : > { %s2689_s15 = smov (%p27_p1, %s25_s15), 0  ;;  %p174_p3 = pnand %p1727_p0, %p173_p2 }
   0x6   : > { %s1728_s21 = sshll.u32 (!%p174_p3), %s2267_s12, 2 }
   0x7   : > { %177 = sbr.rel (%p174_p3) target bundleno = 347 (0x15b), region = 32  ;;  %p211_p4 = scmp.lt.s32.totalorder (!%p174_p3), %s1728_s21, 7 }
   0xc   : > { %v2111_v0 = vld [vmem:[%s2683_s1 + $0x78] sm:$0xff]   ;;  %v2277_v4 = vmov 0   ;;  %v2115_v5 = vld [vmem:[%s2683_s1 + $0x70] sm:$0xff]   ;;  %v2119_v9 = vld [vmem:[%s2683_s1 + $0x68] sm:$0xff]   ;;  %s2691_s21 = smov (!%p211_p4, %s1728_s21), 7 }
   0xd   : > { %v2112_v1 = vld [vmem:[%s2683_s1 + $0x38] sm:$0xff]   ;;  %1885 = vmatprep.subr.bf16.mxu0 %v2111_v0  ;;  %2109 = vset.pattern.permute.xlu0 %v2277_v4  ;;  %v2116_v6 = vld [vmem:[%s2683_s1 + $0x30] sm:$0xff]   ;;  %v2120_v10 = vld [vmem:[%s2683_s1 + $0x28] sm:$0xff]   ;;  %s2083_s20 = smul.u32 52, %s2691_s21  ;;  %s1731_s7 = sshll.u32 %s2691_s21, 3 }
   0xe   : > { %v2113_v2 = vld [vmem:[%s2683_s1 + $0xf8] sm:$0xff]   ;;  %1886 = vmatpush3.bf16.msra.mxu0 %v2112_v1  ;;  %2110 = vset.pattern.permute.xlu1 %v2277_v4  ;;  %v2117_v7 = vld [vmem:[%s2683_s1 + $0xf0] sm:$0xff]   ;;  %v2121_v11 = vld [vmem:[%s2683_s1 + $0xe8] sm:$0xff]   ;;  %s225_s16 = scalar_lea.vmem %s2684_s2, %s1731_s7 }
   0xf   : > { %v2114_v3 = vld [vmem:[%s2683_s1 + $0xb8] sm:$0xff]   ;;  %1913 = vmatprep.subr.bf16.mxu1 %v2113_v2  ;;  %1887 = vmatprep.subr.bf16.mxu0 %v2115_v5  ;;  %v2118_v8 = vld [vmem:[%s2683_s1 + $0xb0] sm:$0xff]   ;;  %v2122_v12 = vld [vmem:[%s2683_s1 + $0xa8] sm:$0xff]   ;;  %s2412_s4 = scalar_lea.vmem %s2682_s0, %s2083_s20 }
  0x10   : > { %1914 = vmatpush3.bf16.msra.mxu1 %v2114_v3  ;;  %v2123_v13 = vld [vmem:[%s2683_s1 + $0x60] sm:$0xff]   ;;  %v2127_v17 = vld [vmem:[%s2683_s1 + $0x58] sm:$0xff]   ;;  %v2131_v21 = vld [vmem:[%s2683_s1 + $0x50] sm:$0xff]  }
  0x11   : > { %1915 = vmatprep.subr.bf16.mxu1 %v2117_v7  ;;  %v2124_v14 = vld [vmem:[%s2683_s1 + $0x20] sm:$0xff]   ;;  %v2128_v18 = vld [vmem:[%s2683_s1 + $0x18] sm:$0xff]   ;;  %v2132_v22 = vld [vmem:[%s2683_s1 + $0x10] sm:$0xff]  }
  0x12   : > { %1888 = vmatpush3.bf16.msra.mxu0 %v2116_v6  ;;  %v2125_v15 = vld [vmem:[%s2683_s1 + $0xe0] sm:$0xff]   ;;  %v2129_v19 = vld [vmem:[%s2683_s1 + $0xd8] sm:$0xff]   ;;  %v2133_v23 = vld [vmem:[%s2683_s1 + $0xd0] sm:$0xff]  }
  0x13   : > { %1889 = vmatprep.subr.bf16.mxu0 %v2119_v9  ;;  %v2126_v16 = vld [vmem:[%s2683_s1 + $0xa0] sm:$0xff]   ;;  %v2130_v20 = vld [vmem:[%s2683_s1 + $0x98] sm:$0xff]   ;;  %v2134_v24 = vld [vmem:[%s2683_s1 + $0x90] sm:$0xff]  }
  0x14   : > { %1916 = vmatpush3.bf16.msra.mxu1 %v2118_v8  ;;  %v2135_v25 = vld [vmem:[%s2683_s1 + $0x48] sm:$0xff]   ;;  %v2139_v29 = vld [vmem:[%s2683_s1 + $0x40] sm:$0xff]   ;;  %v2146_v35 = vld [vmem:[%s2683_s1 + $0x178] sm:$0xff]  }
  0x15   : > { %1917 = vmatprep.subr.bf16.mxu1 %v2121_v11  ;;  %v2136_v26 = vld [vmem:[%s2683_s1 + $0x8] sm:$0xff]   ;;  %v2140_v30 = vld [vmem:[%s2683_s1] sm:$0xff]   ;;  %v2150_v38 = vld [vmem:[%s2683_s1 + $0x138] sm:$0xff]  }
  0x16   : > { %1890 = vmatpush3.bf16.msra.mxu0 %v2120_v10  ;;  %v2137_v27 = vld [vmem:[%s2683_s1 + $0xc8] sm:$0xff]   ;;  %v2141_v31 = vld [vmem:[%s2683_s1 + $0xc0] sm:$0xff]   ;;  %v2151_v39 = vld [vmem:[%s2683_s1 + $0x1f8] sm:$0xff]  }
  0x17   : > { %1891 = vmatprep.subr.bf16.mxu0 %v2123_v13  ;;  %v2138_v28 = vld [vmem:[%s2683_s1 + $0x88] sm:$0xff]   ;;  %v2142_v32 = vld [vmem:[%s2412_s4] ss:$52 sps:$4 sm:$0xff]   ;;  %v2144_v33 = vld [vmem:[%s2412_s4 + $0x4] ss:$52 sps:$4 sm:$0xff]  }
  0x18   : > { %1918 = vmatpush3.bf16.msra.mxu1 %v2122_v12  ;;  %v2145_v34 = vld [vmem:[%s2683_s1 + $0x80] sm:$0xff]   ;;  %1285 = vmatprep.mubr.bf16.mxu0 %v2144_v33  ;;  %v2147_v36 = vld [vmem:[%s2412_s4 + $0x8] ss:$52 sps:$4 sm:$0xff]   ;;  %v2153_v41 = vld [vmem:[%s2683_s1 + $0x170] sm:$0xff]  }
  0x19   : > { %1919 = vmatprep.subr.bf16.mxu1 %v2125_v15  ;;  %v2149_v37 = vld [vmem:[%s2412_s4 + $0xc] ss:$52 sps:$4 sm:$0xff]   ;;  %v2152_v40 = vld [vmem:[%s2683_s1 + $0x1b8] sm:$0xff]   ;;  %v2154_v42 = vld [vmem:[%s2683_s1 + $0x130] sm:$0xff]  }
  0x1a   : > { %1892 = vmatpush3.bf16.msra.mxu0 %v2124_v14  ;;  %1334 = vmatprep.mubr.bf16.mxu1 %v2149_v37  ;;  %v2155_v43 = vld [vmem:[%s2683_s1 + $0x1f0] sm:$0xff]   ;;  %v2157_v45 = vld [vmem:[%s2683_s1 + $0x168] sm:$0xff]   ;;  %v2161_v49 = vld [vmem:[%s2683_s1 + $0x160] sm:$0xff]  }
  0x1b   : > { %1893 = vmatprep.subr.bf16.mxu0 %v2127_v17  ;;  %v2156_v44 = vld [vmem:[%s2683_s1 + $0x1b0] sm:$0xff]   ;;  %v2158_v46 = vld [vmem:[%s2683_s1 + $0x128] sm:$0xff]   ;;  %v2162_v50 = vld [vmem:[%s2683_s1 + $0x120] sm:$0xff]  }
  0x1c   : > { %1920 = vmatpush3.bf16.msra.mxu1 %v2126_v16  ;;  %v2159_v47 = vld [vmem:[%s2683_s1 + $0x1e8] sm:$0xff]   ;;  %v2163_v51 = vld [vmem:[%s2683_s1 + $0x1e0] sm:$0xff]   ;;  %v2165_v53 = vld [vmem:[%s2683_s1 + $0x158] sm:$0xff]  }
  0x1d   : > { %1921 = vmatprep.subr.bf16.mxu1 %v2129_v19  ;;  %v2160_v48 = vld [vmem:[%s2683_s1 + $0x1a8] sm:$0xff]   ;;  %v2164_v52 = vld [vmem:[%s2683_s1 + $0x1a0] sm:$0xff]   ;;  %v2166_v54 = vld [vmem:[%s2683_s1 + $0x118] sm:$0xff]  }
  0x1e   : > { %1894 = vmatpush3.bf16.msra.mxu0 %v2128_v18  ;;  %v2167_v55 = vld [vmem:[%s2412_s4 + $0x6c] ss:$52 sps:$4 sm:$0xff]   ;;  %v2169_v56 = vld [vmem:[%s2683_s1 + $0x1d8] sm:$0xff]   ;;  %v2172_v59 = vld [vmem:[%s2412_s4 + $0x74] ss:$52 sps:$4 sm:$0xff]  }
  0x1f   : > { %1895 = vmatprep.subr.bf16.mxu0 %v2131_v21  ;;  %v2170_v57 = vld [vmem:[%s2412_s4 + $0x68] ss:$52 sps:$4 sm:$0xff]   ;;  %v2174_v60 = vld [vmem:[%s2683_s1 + $0x150] sm:$0xff]   ;;  %v2183_v5 = vld [vmem:[%s2683_s1 + $0x140] sm:$0xff]  }
  0x20   : > { %1922 = vmatpush3.bf16.msra.mxu1 %v2130_v20  ;;  %v2171_v58 = vld [vmem:[%s2683_s1 + $0x198] sm:$0xff]   ;;  %v2175_v61 = vld [vmem:[%s2412_s4 + $0x70] ss:$52 sps:$4 sm:$0xff]   ;;  %v2179_v1 = vld [vmem:[%s2683_s1 + $0x148] sm:$0xff]  }
  0x21   : > { %1923 = vmatprep.subr.bf16.mxu1 %v2133_v23  ;;  %v2176_v62 = vld [vmem:[%s2683_s1 + $0x110] sm:$0xff]   ;;  %v2180_v2 = vld [vmem:[%s2683_s1 + $0x108] sm:$0xff]   ;;  %v2184_v6 = vld [vmem:[%s2683_s1 + $0x100] sm:$0xff]  }
  0x22   : > { %1896 = vmatpush3.bf16.msra.mxu0 %v2132_v22  ;;  %v2177_v63 = vld [vmem:[%s2683_s1 + $0x1d0] sm:$0xff]   ;;  %v2181_v3 = vld [vmem:[%s2683_s1 + $0x1c8] sm:$0xff]   ;;  %v2185_v7 = vld [vmem:[%s2683_s1 + $0x1c0] sm:$0xff]  }
  0x23   : > { %1897 = vmatprep.subr.bf16.mxu0 %v2135_v25  ;;  %v2178_v0 = vld [vmem:[%s2683_s1 + $0x190] sm:$0xff]   ;;  %v2182_v4 = vld [vmem:[%s2683_s1 + $0x188] sm:$0xff]   ;;  %v2189_v10 = vld [vmem:[%s2683_s1 + $0x180] sm:$0xff]  }
  0x24   : > { %1924 = vmatpush3.bf16.msra.mxu1 %v2134_v24  ;;  %v2186_v8 = vld [vmem:[%s2412_s4 + $0x10] ss:$52 sps:$4 sm:$0xff]   ;;  %v2188_v9 = vld [vmem:[%s2412_s4 + $0x14] ss:$52 sps:$4 sm:$0xff]   ;;  %v2190_v11 = vld [vmem:[%s2683_s1 + $0x278] sm:$0xff]  }
  0x25   : > { %1925 = vmatprep.subr.bf16.mxu1 %v2137_v27  ;;  %v2191_v12 = vld [vmem:[%s2412_s4 + $0x18] ss:$52 sps:$4 sm:$0xff]   ;;  %v2193_v13 = vld [vmem:[%s2412_s4 + $0x1c] ss:$52 sps:$4 sm:$0xff]  }
  0x26   : > { %1898 = vmatpush3.bf16.msra.mxu0 %v2136_v26  ;;  %v2194_v14 = vld [vmem:[%s2683_s1 + $0x238] sm:$0xff]   ;;  %v2197_v17 = vld [vmem:[%s2683_s1 + $0x270] sm:$0xff]   ;;  %v2204_v23 = vld [vmem:[%s2683_s1 + $0x268] sm:$0xff]  }
  0x27   : > { %1899 = vmatprep.subr.bf16.mxu0 %v2139_v29  ;;  %v2195_v15 = vld [vmem:[%s2683_s1 + $0x2f8] sm:$0xff]   ;;  %v2198_v18 = vld [vmem:[%s2683_s1 + $0x230] sm:$0xff]   ;;  %v2207_v25 = vld [vmem:[%s2683_s1 + $0x228] sm:$0xff]  }
  0x28   : > { %1926 = vmatpush3.bf16.msra.mxu1 %v2138_v28  ;;  %v2196_v16 = vld [vmem:[%s2683_s1 + $0x2b8] sm:$0xff]   ;;  %v2199_v19 = vld [vmem:[%s2683_s1 + $0x2f0] sm:$0xff]   ;;  %v2209_v27 = vld [vmem:[%s2683_s1 + $0x2e8] sm:$0xff]  }
  0x29   : > { %1927 = vmatprep.subr.bf16.mxu1 %v2141_v31  ;;  %v2200_v20 = vld [vmem:[%s2412_s4 + $0x7c] ss:$52 sps:$4 sm:$0xff]   ;;  %v2203_v22 = vld [vmem:[%s2412_s4 + $0x78] ss:$52 sps:$4 sm:$0xff]   ;;  %v2208_v26 = vld [vmem:[%s2412_s4 + $0x80] ss:$52 sps:$4 sm:$0xff]  }
  0x2a   : > { %1900 = vmatpush3.bf16.msra.mxu0 %v2140_v30  ;;  %v2202_v21 = vld [vmem:[%s2683_s1 + $0x2b0] sm:$0xff]   ;;  %v2205_v24 = vld [vmem:[%s2412_s4 + $0x84] ss:$52 sps:$4 sm:$0xff]   ;;  %v2210_v28 = vld [vmem:[%s2683_s1 + $0x2a8] sm:$0xff]  }
  0x2b   : > { %1941 = vmatprep.subr.bf16.mxu0 %v2146_v35  ;;  %v2211_v29 = vld [vmem:[%s2683_s1 + $0x260] sm:$0xff]   ;;  %v2215_v33 = vld [vmem:[%s2683_s1 + $0x258] sm:$0xff]   ;;  %v2219_v37 = vld [vmem:[%s2683_s1 + $0x250] sm:$0xff]  }
  0x2c   : > { %1928 = vmatpush3.bf16.msra.mxu1 %v2145_v34  ;;  %v2212_v30 = vld [vmem:[%s2683_s1 + $0x220] sm:$0xff]   ;;  %v2216_v34 = vld [vmem:[%s2683_s1 + $0x218] sm:$0xff]  }
  0x2d   : > { %1286 = vmatmul.mubr.bf16.vlgmr.msra.gmra.mxu0 %v2142_v32  ;;  %1969 = vmatprep.subr.bf16.mxu1 %v2151_v39  ;;  %v2213_v31 = vld [vmem:[%s2683_s1 + $0x2e0] sm:$0xff]   ;;  %v2217_v35 = vld [vmem:[%s2683_s1 + $0x2d8] sm:$0xff]   ;;  %v2221_v39 = vld [vmem:[%s2683_s1 + $0x2d0] sm:$0xff]  }
  0x2e   : > { %1942 = vmatpush3.bf16.msra.mxu0 %v2150_v38  ;;  %1293 = vmatprep.mubr.bf16.mxu0 %v2167_v55  ;;  %v2214_v32 = vld [vmem:[%s2683_s1 + $0x2a0] sm:$0xff]   ;;  %v2220_v38 = vld [vmem:[%s2683_s1 + $0x210] sm:$0xff]  }
  0x2f   : > { %1335 = vmatmul.mubr.bf16.vlgmr.msra.gmra.mxu1 %v2147_v36  ;;  %1943 = vmatprep.subr.bf16.mxu0 %v2153_v41  ;;  %v2218_v36 = vld [vmem:[%s2683_s1 + $0x298] sm:$0xff]   ;;  %v2223_v41 = vld [vmem:[%s2683_s1 + $0x248] sm:$0xff]  }
  0x30   : > { %1970 = vmatpush3.bf16.msra.mxu1 %v2152_v40  ;;  %1342 = vmatprep.mubr.bf16.mxu1 %v2172_v59  ;;  %v2222_v40 = vld [vmem:[%s2683_s1 + $0x290] sm:$0xff]   ;;  %v2239_v55 = vld [vmem:[%s2412_s4 + $0x8c] ss:$52 sps:$4 sm:$0xff]  }
  0x31   : > { %1971 = vmatprep.subr.bf16.mxu1 %v2155_v43  ;;  %v2225_v43 = vld [vmem:[%s2683_s1 + $0x2c8] sm:$0xff]  }
  0x32   : > { %1944 = vmatpush3.bf16.msra.mxu0 %v2154_v42  ;;  %v2224_v42 = vld [vmem:[%s2683_s1 + $0x208] sm:$0xff]  }
  0x33   : > { %1945 = vmatprep.subr.bf16.mxu0 %v2157_v45  ;;  %v2227_v45 = vld [vmem:[%s2683_s1 + $0x240] sm:$0xff]   ;;  %v2243_v59 = vld [vmem:[%s2412_s4 + $0x94] ss:$52 sps:$4 sm:$0xff]  }
  0x34   : > { %1972 = vmatpush3.bf16.msra.mxu1 %v2156_v44  ;;  %v2226_v44 = vld [vmem:[%s2683_s1 + $0x288] sm:$0xff]  }
  0x35   : > { %1973 = vmatprep.subr.bf16.mxu1 %v2159_v47  ;;  %1294 = vmatmul.mubr.bf16.gmra.mxu0 %v2170_v57  ;;  %v2229_v47 = vld [vmem:[%s2683_s1 + $0x2c0] sm:$0xff]   ;;  %v2242_v57 = vld [vmem:[%s2683_s1 + $0x328] sm:$0xff]  }
  0x36   : > { %1946 = vmatpush3.bf16.msra.mxu0 %v2158_v46  ;;  %1383 = vmatprep.mubr.bf16.mxu0 %v2188_v9  ;;  %v2228_v46 = vld [vmem:[%s2683_s1 + $0x200] sm:$0xff]  }
  0x37   : > { %1947 = vmatprep.subr.bf16.mxu0 %v2161_v49  ;;  %1343 = vmatmul.mubr.bf16.gmra.mxu1 %v2175_v61  ;;  %v2232_v49 = vld [vmem:[%s2412_s4 + $0x24] ss:$52 sps:$4 sm:$0xff]   ;;  %v474_v61 = vld [vmem:[%s225_s16 + $0x8] sm:$0xff] }
  0x38   : > { %1974 = vmatpush3.bf16.msra.mxu1 %v2160_v48  ;;  %1432 = vmatprep.mubr.bf16.mxu1 %v2193_v13  ;;  %v2230_v48 = vld [vmem:[%s2412_s4 + $0x20] ss:$52 sps:$4 sm:$0xff]  }
  0x39   : > { %1975 = vmatprep.subr.bf16.mxu1 %v2163_v51  ;;  %v2234_v51 = vld [vmem:[%s2683_s1 + $0x338] sm:$0xff]  }
  0x3a   : > { %1948 = vmatpush3.bf16.msra.mxu0 %v2162_v50  ;;  %v2233_v50 = vld [vmem:[%s2683_s1 + $0x280] sm:$0xff]  }
  0x3b   : > { %1949 = vmatprep.subr.bf16.mxu0 %v2165_v53  ;;  %v2237_v53 = vld [vmem:[%s2412_s4 + $0x2c] ss:$52 sps:$4 sm:$0xff]  }
  0x3c   : > { %1976 = vmatpush3.bf16.msra.mxu1 %v2164_v52  ;;  %v2235_v52 = vld [vmem:[%s2412_s4 + $0x28] ss:$52 sps:$4 sm:$0xff]  }
  0x3d   : > { %1977 = vmatprep.subr.bf16.mxu1 %v2169_v56  ;;  %v2241_v56 = vld [vmem:[%s2412_s4 + $0x88] ss:$52 sps:$4 sm:$0xff]  }
  0x3e   : > { %1950 = vmatpush3.bf16.msra.mxu0 %v2166_v54  ;;  %v2238_v54 = vld [vmem:[%s2683_s1 + $0x330] sm:$0xff]  }
  0x3f   : > { %1951 = vmatprep.subr.bf16.mxu0 %v2174_v60  ;;  %v2246_v60 = vld [vmem:[%s2683_s1 + $0x320] sm:$0xff]  }
  0x40   : > { %1978 = vmatpush3.bf16.msra.mxu1 %v2171_v58  ;;  %v473_v58 = vld [vmem:[%s225_s16] sm:$0xff] }
  0x41   : > { %1979 = vmatprep.subr.bf16.mxu1 %v2177_v63  ;;  %479 = vperm.xlu0 %2109, %v473_v58   ;;  %v475_v63 = vld [vmem:[%s225_s16 + $0x10] sm:$0xff] }
  0x42   : > { %1952 = vmatpush3.bf16.msra.mxu0 %v2176_v62  ;;  %v2245_v62 = vld [vmem:[%s2412_s4 + $0x90] ss:$52 sps:$4 sm:$0xff]   ;;  %489 = vperm.xlu1 %2110, %v475_v63  }
  0x43   : > { %1953 = vmatprep.subr.bf16.mxu0 %v2179_v1  ;;  %v2251_v1 = vld [vmem:[%s2412_s4 + $0x30] ss:$52 sps:$4 sm:$0xff]  }
  0x44   : > { %1980 = vmatpush3.bf16.msra.mxu1 %v2178_v0  ;;  %v2247_v0 = vld [vmem:[%s2683_s1 + $0x318] sm:$0xff]  }
  0x45   : > { %1981 = vmatprep.subr.bf16.mxu1 %v2181_v3  ;;  %484 = vperm.xlu0 %2109, %v474_v61   ;;  %v2248_v3 = vld [vmem:[%s2683_s1 + $0x310] sm:$0xff]  }
  0x46   : > { %1954 = vmatpush3.bf16.msra.mxu0 %v2180_v2  ;;  %v476_v2 = vld [vmem:[%s225_s16 + $0x18] sm:$0xff] }
  0x47   : > { %1955 = vmatprep.subr.bf16.mxu0 %v2183_v5  ;;  %494 = vperm.xlu1 %2110, %v476_v2   ;;  %v2250_v5 = vld [vmem:[%s2683_s1 + $0x300] sm:$0xff]  }
  0x48   : > { %1982 = vmatpush3.bf16.msra.mxu1 %v2182_v4  ;;  %v2249_v4 = vld [vmem:[%s2683_s1 + $0x308] sm:$0xff]  }
  0x49   : > { %1983 = vmatprep.subr.bf16.mxu1 %v2185_v7 }
  0x4a   : > { %1956 = vmatpush3.bf16.msra.mxu0 %v2184_v6  ;;  %v2252_v6 = vld [vmem:[%s2412_s4 + $0x98] ss:$52 sps:$4 sm:$0xff]   ;;  %s1733_s4 = sshll.u32 %s2691_s21, 2 }
  0x4b   : > { %1997 = vmatprep.subr.bf16.mxu0 %v2190_v11  ;;  %s234_s7 = scalar_lea.vmem %s2685_s3, %s1733_s4 }
  0x4c   : > { %1984 = vmatpush3.bf16.msra.mxu1 %v2189_v10 }
  0x4d   : > { %1384 = vmatmul.mubr.bf16.vlgmr.msra.gmra.mxu0 %v2186_v8  ;;  %2025 = vmatprep.subr.bf16.mxu1 %v2195_v15 }
  0x4e   : > { %1998 = vmatpush3.bf16.msra.mxu0 %v2194_v14  ;;  %1391 = vmatprep.mubr.bf16.mxu0 %v2200_v20 }
  0x4f   : > { %1433 = vmatmul.mubr.bf16.vlgmr.msra.gmra.mxu1 %v2191_v12  ;;  %1999 = vmatprep.subr.bf16.mxu0 %v2197_v17 }
  0x50   : > { %2026 = vmatpush3.bf16.msra.mxu1 %v2196_v16  ;;  %1440 = vmatprep.mubr.bf16.mxu1 %v2205_v24 }
  0x51   : > { %2027 = vmatprep.subr.bf16.mxu1 %v2199_v19 }
  0x52   : > { %2000 = vmatpush3.bf16.msra.mxu0 %v2198_v18 }
  0x53   : > { %2001 = vmatprep.subr.bf16.mxu0 %v2204_v23 }
  0x54   : > { %2028 = vmatpush3.bf16.msra.mxu1 %v2202_v21 }
  0x55   : > { %1392 = vmatmul.mubr.bf16.gmra.mxu0 %v2203_v22  ;;  %2029 = vmatprep.subr.bf16.mxu1 %v2209_v27 }
  0x56   : > { %2002 = vmatpush3.bf16.msra.mxu0 %v2207_v25  ;;  %1481 = vmatprep.mubr.bf16.mxu0 %v2232_v49 }
  0x57   : > { %1441 = vmatmul.mubr.bf16.gmra.mxu1 %v2208_v26  ;;  %2003 = vmatprep.subr.bf16.mxu0 %v2211_v29 }
  0x58   : > { %2030 = vmatpush3.bf16.msra.mxu1 %v2210_v28  ;;  %1530 = vmatprep.mubr.bf16.mxu1 %v2237_v53 }
  0x59   : > { %2031 = vmatprep.subr.bf16.mxu1 %v2213_v31 }
  0x5a   : > { %2004 = vmatpush3.bf16.msra.mxu0 %v2212_v30 }
  0x5b   : > { %2005 = vmatprep.subr.bf16.mxu0 %v2215_v33 }
  0x5c   : > { %2032 = vmatpush3.bf16.msra.mxu1 %v2214_v32 }
  0x5d   : > { %2033 = vmatprep.subr.bf16.mxu1 %v2217_v35 }
  0x5e   : > { %2006 = vmatpush3.bf16.msra.mxu0 %v2216_v34 }
  0x5f   : > { %2007 = vmatprep.subr.bf16.mxu0 %v2219_v37 }
  0x60   : > { %2034 = vmatpush3.bf16.msra.mxu1 %v2218_v36 }
  0x61   : > { %2035 = vmatprep.subr.bf16.mxu1 %v2221_v39 }
  0x62   : > { %2008 = vmatpush3.bf16.msra.mxu0 %v2220_v38 }
  0x63   : > { %2009 = vmatprep.subr.bf16.mxu0 %v2223_v41 }
  0x64   : > { %2036 = vmatpush3.bf16.msra.mxu1 %v2222_v40 }
  0x65   : > { %2037 = vmatprep.subr.bf16.mxu1 %v2225_v43 }
  0x66   : > { %2010 = vmatpush3.bf16.msra.mxu0 %v2224_v42 }
  0x67   : > { %2011 = vmatprep.subr.bf16.mxu0 %v2227_v45 }
  0x68   : > { %2038 = vmatpush3.bf16.msra.mxu1 %v2226_v44 }
  0x69   : > { %2039 = vmatprep.subr.bf16.mxu1 %v2229_v47 }
  0x6a   : > { %2012 = vmatpush3.bf16.msra.mxu0 %v2228_v46 }
  0x6b   : > { %2063 = vmatprep.subr.bf16.mxu0 %v2234_v51 }
  0x6c   : > { %2040 = vmatpush3.bf16.msra.mxu1 %v2233_v50 }
  0x6d   : > { %1482 = vmatmul.mubr.bf16.vlgmr.msra.gmra.mxu0 %v2230_v48 }
  0x6e   : > { %2064 = vmatpush3.bf16.msra.mxu0 %v2234_v51  ;;  %1489 = vmatprep.mubr.bf16.mxu0 %v2239_v55 }
  0x6f   : > { %1531 = vmatmul.mubr.bf16.vlgmr.msra.gmra.mxu1 %v2235_v52  ;;  %2065 = vmatprep.subr.bf16.mxu0 %v2238_v54 }
  0x70   : > { %1538 = vmatprep.mubr.bf16.mxu1 %v2243_v59 }
  0x72   : > { %2066 = vmatpush3.bf16.msra.mxu0 %v2238_v54 }
  0x73   : > { %2067 = vmatprep.subr.bf16.mxu0 %v2242_v57 }
  0x75   : > { %1490 = vmatmul.mubr.bf16.gmra.mxu0 %v2241_v56 }
  0x76   : > { %2068 = vmatpush3.bf16.msra.mxu0 %v2242_v57  ;;  %2079 = vmatprep.mubr.bf16.mxu0 %v2251_v1 }
  0x77   : > { %2069 = vmatprep.subr.bf16.mxu0 %v2246_v60  ;;  %1539 = vmatmul.mubr.bf16.gmra.mxu1 %v2245_v62 }
  0x7a   : > { %2070 = vmatpush3.bf16.msra.mxu0 %v2246_v60 }
  0x7b   : > { %2071 = vmatprep.subr.bf16.mxu0 %v2247_v0 }
  0x7e   : > { %2072 = vmatpush3.bf16.msra.mxu0 %v2247_v0 }
  0x7f   : > { %2073 = vmatprep.subr.bf16.mxu0 %v2248_v3 }
  0x82   : > { %2074 = vmatpush3.bf16.msra.mxu0 %v2248_v3 }
  0x83   : > { %2075 = vmatprep.subr.bf16.mxu0 %v2249_v4 }
  0x86   : > { %2076 = vmatpush3.bf16.msra.mxu0 %v2249_v4 }
  0x87   : > { %2077 = vmatprep.subr.bf16.mxu0 %v2250_v5 }
  0x8a   : > { %2078 = vmatpush3.bf16.msra.mxu0 %v2250_v5 }
  0x8d   : > { %2080 = vmatmul.mubr.bf16.vlgmr.msra.gmra.mxu0 %v2252_v6 }
  0xbc   : > { %v480_v47 = vpop.permute.xlu0 %479 }
  0xbd   : > { %v490_v46 = vpop.permute.xlu1 %489 }
  0xc0   : > { %v485_v57 = vpop.permute.xlu0 %484 }
  0xc2   : > { %v495_v52 = vpop.permute.xlu1 %494 }
  0xed   : > { %v1901_v7 = vpop.f32.mrf.mxu0 }
  0xef   : > { %v1902_v8 = vpop.f32.mrf.mxu0  ;;  %v1929_v9 = vpop.f32.mrf.mxu1 }
  0xf0   : > { %v1903_v50 = vadd.f32 %v1902_v8, %v1901_v7 }
  0xf1   : > { %v1904_v10 = vpop.f32.mrf.mxu0  ;;  %v1930_v11 = vpop.f32.mrf.mxu1 }
  0xf2   : > { %v1288_v58 = vadd.f32 %v1903_v50, %v480_v47  ;;  %v1931_v59 = vadd.f32 %v1930_v11, %v1929_v9 }
  0xf3   : > { %v1905_v12 = vpop.f32.mrf.mxu0  ;;  %v1932_v13 = vpop.f32.mrf.mxu1 }
  0xf4   : > { %v1906_v53 = vadd.f32 %v1905_v12, %v1904_v10  ;;  %v1337_v8 = vadd.f32 %v1931_v59, %v1288_v58 }
  0xf5   : > { %v1907_v14 = vpop.f32.mrf.mxu0  ;;  %v1933_v15 = vpop.f32.mrf.mxu1 }
  0xf6   : > { %v1291_v62 = vadd.f32 %v1906_v53, %v485_v57  ;;  %v1934_v63 = vadd.f32 %v1933_v15, %v1932_v13 }
  0xf7   : > { %v1908_v16 = vpop.f32.mrf.mxu0  ;;  %v1935_v17 = vpop.f32.mrf.mxu1 }
  0xf8   : > { %v1909_v54 = vadd.f32 %v1908_v16, %v1907_v14  ;;  %v1340_v12 = vadd.f32 %v1934_v63, %v1291_v62 }
  0xf9   : > { %v1910_v18 = vpop.f32.mrf.mxu0  ;;  %v1936_v19 = vpop.f32.mrf.mxu1 }
  0xfa   : > { %v1296_v0 = vadd.f32 %v1909_v54, %v490_v46  ;;  %v1937_v1 = vadd.f32 %v1936_v19, %v1935_v17 }
  0xfb   : > { %v1911_v20 = vpop.f32.mrf.mxu0  ;;  %v1938_v21 = vpop.f32.mrf.mxu1 }
  0xfc   : > { %v1912_v51 = vadd.f32 %v1911_v20, %v1910_v18  ;;  %v1345_v14 = vadd.f32 %v1937_v1, %v1296_v0 }
  0xfd   : > { %v1939_v23 = vpop.f32.mrf.mxu1 }
  0xfe   : > { %v1299_v60 = vadd.f32 %v1912_v51, %v495_v52  ;;  %v1940_v61 = vadd.f32 %v1939_v23, %v1938_v21 }
 0x100   : > { %v1348_v10 = vadd.f32 %v1940_v61, %v1299_v60 }
 0x10d   : > { %v1957_v22 = vpop.f32.mrf.mxu0 }
 0x10f   : > { %v1958_v24 = vpop.f32.mrf.mxu0  ;;  %v1985_v25 = vpop.f32.mrf.mxu1 }
 0x110   : > { %v1959_v4 = vadd.f32 %v1958_v24, %v1957_v22 }
 0x111   : > { %v1960_v26 = vpop.f32.mrf.mxu0  ;;  %v1986_v27 = vpop.f32.mrf.mxu1 }
 0x112   : > { %v1386_v20 = vadd.f32 %v1959_v4, %v1337_v8  ;;  %v1987_v9 = vadd.f32 %v1986_v27, %v1985_v25 }
 0x113   : > { %v1961_v28 = vpop.f32.mrf.mxu0  ;;  %v1988_v29 = vpop.f32.mrf.mxu1 }
 0x114   : > { %v1962_v6 = vadd.f32 %v1961_v28, %v1960_v26  ;;  %v1435_v26 = vadd.f32 %v1987_v9, %v1386_v20 }
 0x115   : > { %v1963_v30 = vpop.f32.mrf.mxu0  ;;  %v1989_v31 = vpop.f32.mrf.mxu1 }
 0x116   : > { %v1389_v23 = vadd.f32 %v1962_v6, %v1340_v12  ;;  %v1990_v13 = vadd.f32 %v1989_v31, %v1988_v29 }
 0x117   : > { %v1964_v32 = vpop.f32.mrf.mxu0  ;;  %v1991_v33 = vpop.f32.mrf.mxu1 }
 0x118   : > { %v1965_v7 = vadd.f32 %v1964_v32, %v1963_v30  ;;  %v1438_v32 = vadd.f32 %v1990_v13, %v1389_v23 }
 0x119   : > { %v1966_v34 = vpop.f32.mrf.mxu0  ;;  %v1992_v35 = vpop.f32.mrf.mxu1 }
 0x11a   : > { %v1394_v15 = vadd.f32 %v1965_v7, %v1345_v14  ;;  %v1993_v17 = vadd.f32 %v1992_v35, %v1991_v33 }
 0x11b   : > { %v1967_v36 = vpop.f32.mrf.mxu0  ;;  %v1994_v37 = vpop.f32.mrf.mxu1 }
 0x11c   : > { %v1968_v5 = vadd.f32 %v1967_v36, %v1966_v34  ;;  %v1443_v34 = vadd.f32 %v1993_v17, %v1394_v15 }
 0x11d   : > { %v1995_v39 = vpop.f32.mrf.mxu1 }
 0x11e   : > { %v1397_v11 = vadd.f32 %v1968_v5, %v1348_v10  ;;  %v1996_v21 = vadd.f32 %v1995_v39, %v1994_v37 }
 0x120   : > { %v1446_v28 = vadd.f32 %v1996_v21, %v1397_v11 }
 0x12d   : > { %v2013_v38 = vpop.f32.mrf.mxu0 }
 0x12f   : > { %v2014_v40 = vpop.f32.mrf.mxu0  ;;  %v2041_v41 = vpop.f32.mrf.mxu1 }
 0x130   : > { %v2015_v19 = vadd.f32 %v2014_v40, %v2013_v38 }
 0x131   : > { %v2016_v42 = vpop.f32.mrf.mxu0  ;;  %v2042_v43 = vpop.f32.mrf.mxu1 }
 0x132   : > { %v1484_v36 = vadd.f32 %v2015_v19, %v1435_v26  ;;  %v2043_v47 = vadd.f32 %v2042_v43, %v2041_v41 }
 0x133   : > { %v2017_v44 = vpop.f32.mrf.mxu0  ;;  %v2044_v45 = vpop.f32.mrf.mxu1 }
 0x134   : > { %v2018_v30 = vadd.f32 %v2017_v44, %v2016_v42  ;;  %v1533_v35 = vadd.f32 %v2043_v47, %v1484_v36 }
 0x135   : > { %v2019_v48 = vpop.f32.mrf.mxu0  ;;  %v2045_v49 = vpop.f32.mrf.mxu1 }
 0x136   : > { %v1487_v29 = vadd.f32 %v2018_v30, %v1438_v32  ;;  %v2046_v31 = vadd.f32 %v2045_v49, %v2044_v45 }
 0x137   : > { %v2020_v55 = vpop.f32.mrf.mxu0  ;;  %v2047_v56 = vpop.f32.mrf.mxu1 }
 0x138   : > { %v2021_v22 = vadd.f32 %v2020_v55, %v2019_v48  ;;  %v1536_v42 = vadd.f32 %v2046_v31, %v1487_v29 }
 0x139   : > { %v2022_v2 = vpop.f32.mrf.mxu0  ;;  %v2048_v3 = vpop.f32.mrf.mxu1 }
 0x13a   : > { %v1492_v25 = vadd.f32 %v2021_v22, %v1443_v34  ;;  %v2049_v27 = vadd.f32 %v2048_v3, %v2047_v56 }
 0x13b   : > { %v2023_v16 = vpop.f32.mrf.mxu0  ;;  %v2050_v18 = vpop.f32.mrf.mxu1 }
 0x13c   : > { %v2024_v46 = vadd.f32 %v2023_v16, %v2022_v2  ;;  %v1541_v39 = vadd.f32 %v2049_v27, %v1492_v25 }
 0x13d   : > { %v2051_v24 = vpop.f32.mrf.mxu1 }
 0x13e   : > { %v1495_v50 = vadd.f32 %v2024_v46, %v1446_v28  ;;  %v2052_v51 = vadd.f32 %v2051_v24, %v2050_v18 }
 0x140   : > { %v1544_v38 = vadd.f32 %v2052_v51, %v1495_v50 }
 0x14d   : > { %v2081_v37 = vpop.f32.mrf.mxu0 }
 0x14e   : > { %v1590_v44 = vadd.f32 %v2081_v37, %v1541_v39 }
 0x14f   : > { %v1581_v33 = vpop.f32.mrf.mxu0 }
 0x150   : > { %v1582_v48 = vadd.f32 %v1581_v33, %v1533_v35  ;;  %v1598_v57 = vmax.f32 %v1590_v44, 0.0 }
 0x151   : > { %v2082_v40 = vpop.f32.mrf.mxu0 }
 0x152   : > { %v1593_v52 = vadd.f32 %v2082_v40, %v1544_v38  ;;  %v1596_v54 = vmax.f32 %v1582_v48, 0.0 }
 0x153   : > { %v1584_v53 = vpop.f32.mrf.mxu0 }
 0x154   : > { %v1585_v41 = vadd.f32 %v1584_v53, %v1536_v42  ;;  %v1599_v43 = vmax.f32 %v1593_v52, 0.0 }
 0x156   : > { %v1597_v55 = vmax.f32 %v1585_v41, 0.0  ;;  %v1882_v49 = vpack.c.bf16 %v1599_v43, %v1598_v57 }
 0x158   : > { %v1877_v45 = vpack.c.bf16 %v1597_v55, %v1596_v54  ;;  %1884 = vst [vmem:[%s234_s7 + $0x8] sm:$0xff] %v1882_v49  }
 0x15a   : > { %1878 = vst [vmem:[%s234_s7] sm:$0xff] %v1877_v45  }
 0x15b PF: > { %s13_s14 = sadd.s32 1, %s2275_s14   ;;  %s2686_s12 = smov %s2271_s13 }
 0x15c   : > { %p10_p5 = scmp.ge.s32.totalorder %s13_s14, 4   ;;  %s2687_s13 = smov %s2689_s15 }
 0x15e   :  { %12 = sbr.rel (!%p10_p5) target bundleno = 2 (0x2), region = 68 }

// kernel: forward.8
= control target key start
LH: loop header
LB: loop body
LE: loop exit
PB: predicated region body
PF: predicated region fallthrough
CT: control target
= control target key end

     0   :  { %s4794_s12 = smov 0   ;;  %s4796_s13 = smov 0   ;;  %s5736_s0 = inlined_call_operand.vmem [shape: bf16[128,3200], index: 0, kind: input, shape index: {}]   ;;  %s5737_s1 = inlined_call_operand.vmem [shape: bf16[3200,128], index: 1, kind: input, shape index: {}]   ;;  %s5738_s2 = inlined_call_operand.vmem [shape: f32[128,1], index: 2, kind: input, shape index: {}]   ;;  %s5739_s3 = inlined_call_operand.vmem [shape: bf16[128,128], index: 3, kind: output, shape index: {}]  }
   0x1   :  { %s4798_s14 = smov 0  }
   0x2 LB: > { %s25_s15 = sadd.s32 1, %s4767_s13  ;;  %p3493_p0 = scmp.ge.s32.totalorder %s4771_s14, 1  ;;  %s4771_s14 = sphi %s4798_s14, %s13_s14   ;;  %s4767_s13 = sphi %s4796_s13, %s5763_s13   ;;  %s4763_s12 = sphi %s4794_s12, %s5762_s12  }
   0x3   : > { %p27_p1 = scmp.ge.s32.totalorder %s25_s15, 2  ;;  %p173_p2 = scmp.lt.s32.totalorder %s4771_s14, 3 }
   0x5   : > { %s5765_s15 = smov (%p27_p1, %s25_s15), 0  ;;  %p174_p3 = pnand %p3493_p0, %p173_p2 }
   0x7   : > { %177 = sbr.rel (%p174_p3) target bundleno = 472 (0x1d8), region = 32 }
   0xc   : > { %v4401_v0 = vld [vmem:[%s5737_s1 + $0x78] sm:$0xff]   ;;  %v4405_v4 = vld [vmem:[%s5737_s1 + $0x70] sm:$0xff]   ;;  %v4773_v6 = vmov 0   ;;  %v4409_v9 = vld [vmem:[%s5737_s1 + $0x68] sm:$0xff]   ;;  %s3494_s23 = sshll.u32 %s4763_s12, 3 }
   0xd   : > { %v4402_v1 = vld [vmem:[%s5737_s1 + $0xf8] sm:$0xff]   ;;  %3841 = vmatprep.subr.bf16.mxu0 %v4401_v0  ;;  %v4406_v5 = vld [vmem:[%s5737_s1 + $0xf0] sm:$0xff]   ;;  %4399 = vset.pattern.permute.xlu0 %v4773_v6  ;;  %v4410_v10 = vld [vmem:[%s5737_s1 + $0xe8] sm:$0xff]   ;;  %p211_p4 = scmp.lt.s32.totalorder %s3494_s23, 15 }
   0xe   : > { %v4403_v2 = vld [vmem:[%s5737_s1 + $0x38] sm:$0xff]   ;;  %3881 = vmatprep.subr.bf16.mxu1 %v4402_v1  ;;  %v4407_v7 = vld [vmem:[%s5737_s1 + $0x30] sm:$0xff]   ;;  %4400 = vset.pattern.permute.xlu1 %v4773_v6  ;;  %v4411_v11 = vld [vmem:[%s5737_s1 + $0x28] sm:$0xff]  }
   0xf   : > { %v4404_v3 = vld [vmem:[%s5737_s1 + $0xb8] sm:$0xff]   ;;  %3842 = vmatpush3.bf16.msra.mxu0 %v4403_v2  ;;  %v4408_v8 = vld [vmem:[%s5737_s1 + $0xb0] sm:$0xff]   ;;  %v4412_v12 = vld [vmem:[%s5737_s1 + $0xa8] sm:$0xff]   ;;  %s5767_s23 = smov (!%p211_p4, %s3494_s23), 15 }
  0x10   : > { %3882 = vmatpush3.bf16.msra.mxu1 %v4404_v3  ;;  %3843 = vmatprep.subr.bf16.mxu0 %v4405_v4  ;;  %v4413_v13 = vld [vmem:[%s5737_s1 + $0x60] sm:$0xff]   ;;  %v4417_v17 = vld [vmem:[%s5737_s1 + $0x58] sm:$0xff]   ;;  %v4421_v21 = vld [vmem:[%s5737_s1 + $0x50] sm:$0xff]   ;;  %s4373_s22 = smul.u32 100, %s5767_s23  ;;  %s3497_s26 = sshll.u32 %s5767_s23, 3 }
  0x11   : > { %3883 = vmatprep.subr.bf16.mxu1 %v4406_v5  ;;  %v4414_v14 = vld [vmem:[%s5737_s1 + $0xe0] sm:$0xff]   ;;  %v4418_v18 = vld [vmem:[%s5737_s1 + $0xd8] sm:$0xff]   ;;  %v4422_v22 = vld [vmem:[%s5737_s1 + $0xd0] sm:$0xff]   ;;  %s5177_s4 = scalar_lea.vmem %s5738_s2, %s3497_s26 }
  0x12   : > { %v4415_v15 = vld [vmem:[%s5737_s1 + $0x20] sm:$0xff]   ;;  %v4419_v19 = vld [vmem:[%s5737_s1 + $0x18] sm:$0xff]   ;;  %v4423_v23 = vld [vmem:[%s5737_s1 + $0x10] sm:$0xff]   ;;  %s4911_s6 = scalar_lea.vmem %s5736_s0, %s4373_s22 }
  0x13   : > { %3844 = vmatpush3.bf16.msra.mxu0 %v4407_v7  ;;  %v4416_v16 = vld [vmem:[%s5737_s1 + $0xa0] sm:$0xff]   ;;  %v4420_v20 = vld [vmem:[%s5737_s1 + $0x98] sm:$0xff]   ;;  %v4424_v24 = vld [vmem:[%s5737_s1 + $0x90] sm:$0xff]  }
  0x14   : > { %3884 = vmatpush3.bf16.msra.mxu1 %v4408_v8  ;;  %3845 = vmatprep.subr.bf16.mxu0 %v4409_v9  ;;  %v4425_v25 = vld [vmem:[%s5737_s1 + $0x48] sm:$0xff]   ;;  %v4429_v29 = vld [vmem:[%s5737_s1 + $0x40] sm:$0xff]   ;;  %v4439_v37 = vld [vmem:[%s5737_s1 + $0x178] sm:$0xff]  }
  0x15   : > { %3885 = vmatprep.subr.bf16.mxu1 %v4410_v10  ;;  %v4426_v26 = vld [vmem:[%s5737_s1 + $0xc8] sm:$0xff]   ;;  %v4430_v30 = vld [vmem:[%s5737_s1 + $0xc0] sm:$0xff]   ;;  %v4440_v38 = vld [vmem:[%s5737_s1 + $0x1f8] sm:$0xff]  }
  0x16   : > { %v4427_v27 = vld [vmem:[%s5737_s1 + $0x8] sm:$0xff]   ;;  %v4431_v31 = vld [vmem:[%s5737_s1] sm:$0xff]   ;;  %v4441_v39 = vld [vmem:[%s5737_s1 + $0x138] sm:$0xff]  }
  0x17   : > { %3846 = vmatpush3.bf16.msra.mxu0 %v4411_v11  ;;  %v4428_v28 = vld [vmem:[%s5737_s1 + $0x88] sm:$0xff]   ;;  %v4432_v32 = vld [vmem:[%s5737_s1 + $0x80] sm:$0xff]   ;;  %v4442_v40 = vld [vmem:[%s5737_s1 + $0x1b8] sm:$0xff]  }
  0x18   : > { %3886 = vmatpush3.bf16.msra.mxu1 %v4412_v12  ;;  %3847 = vmatprep.subr.bf16.mxu0 %v4413_v13  ;;  %v4433_v33 = vld [vmem:[%s4911_s6] ss:$100 sps:$4 sm:$0xff]   ;;  %v4436_v35 = vld [vmem:[%s4911_s6 + $0x8] ss:$100 sps:$4 sm:$0xff]   ;;  %v4443_v41 = vld [vmem:[%s5737_s1 + $0x170] sm:$0xff]  }
  0x19   : > { %3887 = vmatprep.subr.bf16.mxu1 %v4414_v14  ;;  %v4435_v34 = vld [vmem:[%s4911_s6 + $0x4] ss:$100 sps:$4 sm:$0xff]   ;;  %v4438_v36 = vld [vmem:[%s4911_s6 + $0xc] ss:$100 sps:$4 sm:$0xff]   ;;  %v4449_v46 = vld [vmem:[%s4911_s6 + $0xd4] ss:$100 sps:$4 sm:$0xff]  }
  0x1a   : > { %2525 = vmatprep.mubr.bf16.mxu0 %v4435_v34  ;;  %2590 = vmatprep.mubr.bf16.mxu1 %v4438_v36  ;;  %v4444_v42 = vld [vmem:[%s5737_s1 + $0x1f0] sm:$0xff]   ;;  %v4451_v47 = vld [vmem:[%s4911_s6 + $0xc8] ss:$100 sps:$4 sm:$0xff]   ;;  %v4457_v53 = vld [vmem:[%s5737_s1 + $0x160] sm:$0xff]  }
  0x1b   : > { %3848 = vmatpush3.bf16.msra.mxu0 %v4415_v15  ;;  %v4445_v43 = vld [vmem:[%s5737_s1 + $0x130] sm:$0xff]   ;;  %v4453_v49 = vld [vmem:[%s5737_s1 + $0x168] sm:$0xff]   ;;  %v4458_v54 = vld [vmem:[%s5737_s1 + $0x1e0] sm:$0xff]  }
  0x1c   : > { %3888 = vmatpush3.bf16.msra.mxu1 %v4416_v16  ;;  %3849 = vmatprep.subr.bf16.mxu0 %v4417_v17  ;;  %v4446_v44 = vld [vmem:[%s5737_s1 + $0x1b0] sm:$0xff]   ;;  %v4454_v50 = vld [vmem:[%s5737_s1 + $0x1e8] sm:$0xff]   ;;  %v4459_v55 = vld [vmem:[%s5737_s1 + $0x120] sm:$0xff]  }
  0x1d   : > { %3889 = vmatprep.subr.bf16.mxu1 %v4418_v18  ;;  %v4447_v45 = vld [vmem:[%s4911_s6 + $0xcc] ss:$100 sps:$4 sm:$0xff]   ;;  %v4460_v56 = vld [vmem:[%s5737_s1 + $0x1a0] sm:$0xff]   ;;  %v4461_v57 = vld [vmem:[%s4911_s6 + $0x194] ss:$100 sps:$4 sm:$0xff]  }
  0x1e   : > { %v4452_v48 = vld [vmem:[%s4911_s6 + $0xd0] ss:$100 sps:$4 sm:$0xff]   ;;  %v4455_v51 = vld [vmem:[%s5737_s1 + $0x128] sm:$0xff]   ;;  %v4463_v58 = vld [vmem:[%s4911_s6 + $0x19c] ss:$100 sps:$4 sm:$0xff]  }
  0x1f   : > { %3850 = vmatpush3.bf16.msra.mxu0 %v4419_v19  ;;  %v4456_v52 = vld [vmem:[%s5737_s1 + $0x1a8] sm:$0xff]   ;;  %v4465_v59 = vld [vmem:[%s4911_s6 + $0x190] ss:$100 sps:$4 sm:$0xff]   ;;  %v4466_v60 = vld [vmem:[%s4911_s6 + $0x198] ss:$100 sps:$4 sm:$0xff]  }
  0x20   : > { %3890 = vmatpush3.bf16.msra.mxu1 %v4420_v20  ;;  %3851 = vmatprep.subr.bf16.mxu0 %v4421_v21  ;;  %v4467_v61 = vld [vmem:[%s5737_s1 + $0x158] sm:$0xff]   ;;  %v4471_v1 = vld [vmem:[%s5737_s1 + $0x150] sm:$0xff]   ;;  %v4477_v6 = vld [vmem:[%s4911_s6 + $0x264] ss:$100 sps:$4 sm:$0xff]  }
  0x21   : > { %3891 = vmatprep.subr.bf16.mxu1 %v4422_v22  ;;  %v4468_v62 = vld [vmem:[%s5737_s1 + $0x1d8] sm:$0xff]   ;;  %v4472_v2 = vld [vmem:[%s5737_s1 + $0x1d0] sm:$0xff]   ;;  %v4480_v8 = vld [vmem:[%s4911_s6 + $0x260] ss:$100 sps:$4 sm:$0xff]  }
  0x22   : > { %v4469_v63 = vld [vmem:[%s5737_s1 + $0x118] sm:$0xff]   ;;  %v4473_v3 = vld [vmem:[%s5737_s1 + $0x110] sm:$0xff]   ;;  %v4481_v9 = vld [vmem:[%s5737_s1 + $0x148] sm:$0xff]  }
  0x23   : > { %3852 = vmatpush3.bf16.msra.mxu0 %v4423_v23  ;;  %v4470_v0 = vld [vmem:[%s5737_s1 + $0x198] sm:$0xff]   ;;  %v4474_v4 = vld [vmem:[%s5737_s1 + $0x190] sm:$0xff]   ;;  %v4482_v10 = vld [vmem:[%s5737_s1 + $0x1c8] sm:$0xff]  }
  0x24   : > { %3892 = vmatpush3.bf16.msra.mxu1 %v4424_v24  ;;  %3853 = vmatprep.subr.bf16.mxu0 %v4425_v25  ;;  %v4475_v5 = vld [vmem:[%s4911_s6 + $0x25c] ss:$100 sps:$4 sm:$0xff]   ;;  %v4483_v11 = vld [vmem:[%s5737_s1 + $0x108] sm:$0xff]   ;;  %v4489_v17 = vld [vmem:[%s4911_s6 + $0x10] ss:$100 sps:$4 sm:$0xff]  }
  0x25   : > { %3893 = vmatprep.subr.bf16.mxu1 %v4426_v26  ;;  %v4479_v7 = vld [vmem:[%s4911_s6 + $0x258] ss:$100 sps:$4 sm:$0xff]   ;;  %v4484_v12 = vld [vmem:[%s5737_s1 + $0x188] sm:$0xff]   ;;  %v4485_v13 = vld [vmem:[%s5737_s1 + $0x140] sm:$0xff]  }
  0x26   : > { %v4486_v14 = vld [vmem:[%s5737_s1 + $0x1c0] sm:$0xff]   ;;  %v4491_v18 = vld [vmem:[%s4911_s6 + $0x14] ss:$100 sps:$4 sm:$0xff]   ;;  %v4510_v34 = vld [vmem:[%s5737_s1 + $0x2e8] sm:$0xff]  }
  0x27   : > { %3854 = vmatpush3.bf16.msra.mxu0 %v4427_v27  ;;  %v4487_v15 = vld [vmem:[%s5737_s1 + $0x100] sm:$0xff]   ;;  %v4492_v19 = vld [vmem:[%s4911_s6 + $0x18] ss:$100 sps:$4 sm:$0xff]   ;;  %v4499_v25 = vld [vmem:[%s5737_s1 + $0x270] sm:$0xff]  }
  0x28   : > { %3894 = vmatpush3.bf16.msra.mxu1 %v4428_v28  ;;  %3855 = vmatprep.subr.bf16.mxu0 %v4429_v29  ;;  %v4488_v16 = vld [vmem:[%s5737_s1 + $0x180] sm:$0xff]   ;;  %v4495_v21 = vld [vmem:[%s5737_s1 + $0x278] sm:$0xff]   ;;  %v4500_v26 = vld [vmem:[%s5737_s1 + $0x2f0] sm:$0xff]  }
  0x29   : > { %3895 = vmatprep.subr.bf16.mxu1 %v4430_v30  ;;  %v4494_v20 = vld [vmem:[%s4911_s6 + $0x1c] ss:$100 sps:$4 sm:$0xff]   ;;  %v4501_v27 = vld [vmem:[%s5737_s1 + $0x230] sm:$0xff]   ;;  %v4505_v30 = vld [vmem:[%s4911_s6 + $0xe4] ss:$100 sps:$4 sm:$0xff]  }
  0x2a   : > { %v4496_v22 = vld [vmem:[%s5737_s1 + $0x2f8] sm:$0xff]   ;;  %v4502_v28 = vld [vmem:[%s5737_s1 + $0x2b0] sm:$0xff]   ;;  %v4512_v36 = vld [vmem:[%s5737_s1 + $0x2a8] sm:$0xff]  }
  0x2b   : > { %3856 = vmatpush3.bf16.msra.mxu0 %v4431_v31  ;;  %v4497_v23 = vld [vmem:[%s5737_s1 + $0x238] sm:$0xff]  }
  0x2c   : > { %3896 = vmatpush3.bf16.msra.mxu1 %v4432_v32  ;;  %3921 = vmatprep.subr.bf16.mxu0 %v4439_v37  ;;  %v4498_v24 = vld [vmem:[%s5737_s1 + $0x2b8] sm:$0xff]   ;;  %v4508_v32 = vld [vmem:[%s4911_s6 + $0xe0] ss:$100 sps:$4 sm:$0xff]  }
  0x2d   : > { %3961 = vmatprep.subr.bf16.mxu1 %v4440_v38  ;;  %v4503_v29 = vld [vmem:[%s4911_s6 + $0xdc] ss:$100 sps:$4 sm:$0xff]  }
  0x2e   : > { %2526 = vmatmul.mubr.bf16.vlgmr.msra.gmra.mxu0 %v4433_v33  ;;  %v4507_v31 = vld [vmem:[%s4911_s6 + $0xd8] ss:$100 sps:$4 sm:$0xff]   ;;  %v4509_v33 = vld [vmem:[%s5737_s1 + $0x268] sm:$0xff]   ;;  %v4513_v37 = vld [vmem:[%s5737_s1 + $0x260] sm:$0xff]  }
  0x2f   : > { %2591 = vmatmul.mubr.bf16.vlgmr.msra.gmra.mxu1 %v4436_v35  ;;  %3922 = vmatpush3.bf16.msra.mxu0 %v4441_v39  ;;  %v4511_v35 = vld [vmem:[%s5737_s1 + $0x228] sm:$0xff]   ;;  %v4514_v38 = vld [vmem:[%s5737_s1 + $0x2e0] sm:$0xff]  }
  0x30   : > { %3962 = vmatpush3.bf16.msra.mxu1 %v4442_v40  ;;  %3923 = vmatprep.subr.bf16.mxu0 %v4443_v41  ;;  %v4515_v39 = vld [vmem:[%s5737_s1 + $0x220] sm:$0xff]  }
  0x31   : > { %3963 = vmatprep.subr.bf16.mxu1 %v4444_v42  ;;  %2533 = vmatprep.mubr.bf16.mxu0 %v4447_v45  ;;  %v4516_v40 = vld [vmem:[%s5737_s1 + $0x2a0] sm:$0xff]   ;;  %v4519_v42 = vld [vmem:[%s4911_s6 + $0x1ac] ss:$100 sps:$4 sm:$0xff]   ;;  %v4523_v45 = vld [vmem:[%s5737_s1 + $0x258] sm:$0xff]  }
  0x32   : > { %2598 = vmatprep.mubr.bf16.mxu1 %v4449_v46  ;;  %v4517_v41 = vld [vmem:[%s4911_s6 + $0x1a4] ss:$100 sps:$4 sm:$0xff]   ;;  %v4524_v46 = vld [vmem:[%s5737_s1 + $0x2d8] sm:$0xff]  }
  0x33   : > { %3924 = vmatpush3.bf16.msra.mxu0 %v4445_v43  ;;  %v4521_v43 = vld [vmem:[%s4911_s6 + $0x1a0] ss:$100 sps:$4 sm:$0xff]  }
  0x34   : > { %3964 = vmatpush3.bf16.msra.mxu1 %v4446_v44  ;;  %3925 = vmatprep.subr.bf16.mxu0 %v4453_v49  ;;  %v4522_v44 = vld [vmem:[%s4911_s6 + $0x1a8] ss:$100 sps:$4 sm:$0xff]   ;;  %v4527_v49 = vld [vmem:[%s5737_s1 + $0x250] sm:$0xff]  }
  0x35   : > { %3965 = vmatprep.subr.bf16.mxu1 %v4454_v50  ;;  %v4528_v50 = vld [vmem:[%s5737_s1 + $0x2d0] sm:$0xff]  }
  0x36   : > { %2534 = vmatmul.mubr.bf16.gmra.mxu0 %v4451_v47  ;;  %v4525_v47 = vld [vmem:[%s5737_s1 + $0x218] sm:$0xff]  }
  0x37   : > { %2599 = vmatmul.mubr.bf16.gmra.mxu1 %v4452_v48  ;;  %3926 = vmatpush3.bf16.msra.mxu0 %v4455_v51  ;;  %v4526_v48 = vld [vmem:[%s5737_s1 + $0x298] sm:$0xff]   ;;  %v4529_v51 = vld [vmem:[%s5737_s1 + $0x210] sm:$0xff]  }
  0x38   : > { %3966 = vmatpush3.bf16.msra.mxu1 %v4456_v52  ;;  %3927 = vmatprep.subr.bf16.mxu0 %v4457_v53  ;;  %v4530_v52 = vld [vmem:[%s5737_s1 + $0x290] sm:$0xff]  }
  0x39   : > { %3967 = vmatprep.subr.bf16.mxu1 %v4458_v54  ;;  %2541 = vmatprep.mubr.bf16.mxu0 %v4461_v57  ;;  %v4531_v53 = vld [vmem:[%s4911_s6 + $0x26c] ss:$100 sps:$4 sm:$0xff]   ;;  %v4533_v54 = vld [vmem:[%s4911_s6 + $0x274] ss:$100 sps:$4 sm:$0xff]  }
  0x3a   : > { %2606 = vmatprep.mubr.bf16.mxu1 %v4463_v58  ;;  %v4537_v57 = vld [vmem:[%s5737_s1 + $0x248] sm:$0xff]  }
  0x3b   : > { %3928 = vmatpush3.bf16.msra.mxu0 %v4459_v55  ;;  %v4535_v55 = vld [vmem:[%s4911_s6 + $0x268] ss:$100 sps:$4 sm:$0xff]  }
  0x3c   : > { %3968 = vmatpush3.bf16.msra.mxu1 %v4460_v56  ;;  %3929 = vmatprep.subr.bf16.mxu0 %v4467_v61  ;;  %v4536_v56 = vld [vmem:[%s4911_s6 + $0x270] ss:$100 sps:$4 sm:$0xff]   ;;  %v4538_v58 = vld [vmem:[%s5737_s1 + $0x2c8] sm:$0xff]   ;;  %v4541_v61 = vld [vmem:[%s5737_s1 + $0x240] sm:$0xff]  }
  0x3d   : > { %3969 = vmatprep.subr.bf16.mxu1 %v4468_v62  ;;  %v4542_v62 = vld [vmem:[%s5737_s1 + $0x2c0] sm:$0xff]  }
  0x3e   : > { %2542 = vmatmul.mubr.bf16.gmra.mxu0 %v4465_v59  ;;  %v4539_v59 = vld [vmem:[%s5737_s1 + $0x208] sm:$0xff]  }
  0x3f   : > { %2607 = vmatmul.mubr.bf16.gmra.mxu1 %v4466_v60  ;;  %3930 = vmatpush3.bf16.msra.mxu0 %v4469_v63  ;;  %v4540_v60 = vld [vmem:[%s5737_s1 + $0x288] sm:$0xff]   ;;  %v4543_v63 = vld [vmem:[%s5737_s1 + $0x200] sm:$0xff]  }
  0x40   : > { %3970 = vmatpush3.bf16.msra.mxu1 %v4470_v0  ;;  %3931 = vmatprep.subr.bf16.mxu0 %v4471_v1  ;;  %v4544_v0 = vld [vmem:[%s5737_s1 + $0x280] sm:$0xff]  }
  0x41   : > { %3971 = vmatprep.subr.bf16.mxu1 %v4472_v2  ;;  %2549 = vmatprep.mubr.bf16.mxu0 %v4475_v5  ;;  %v4545_v1 = vld [vmem:[%s4911_s6 + $0x20] ss:$100 sps:$4 sm:$0xff]   ;;  %v4551_v5 = vld [vmem:[%s5737_s1 + $0x378] sm:$0xff]  }
  0x42   : > { %2614 = vmatprep.mubr.bf16.mxu1 %v4477_v6  ;;  %v4547_v2 = vld [vmem:[%s4911_s6 + $0x24] ss:$100 sps:$4 sm:$0xff]   ;;  %v4552_v6 = vld [vmem:[%s5737_s1 + $0x3f8] sm:$0xff]  }
  0x43   : > { %3932 = vmatpush3.bf16.msra.mxu0 %v4473_v3  ;;  %v4548_v3 = vld [vmem:[%s4911_s6 + $0x28] ss:$100 sps:$4 sm:$0xff]  }
  0x44   : > { %3972 = vmatpush3.bf16.msra.mxu1 %v4474_v4  ;;  %3933 = vmatprep.subr.bf16.mxu0 %v4481_v9  ;;  %v4550_v4 = vld [vmem:[%s4911_s6 + $0x2c] ss:$100 sps:$4 sm:$0xff]  }
  0x45   : > { %3973 = vmatprep.subr.bf16.mxu1 %v4482_v10  ;;  %v4555_v9 = vld [vmem:[%s5737_s1 + $0x370] sm:$0xff]  }
  0x46   : > { %2550 = vmatmul.mubr.bf16.gmra.mxu0 %v4479_v7  ;;  %v4553_v7 = vld [vmem:[%s5737_s1 + $0x338] sm:$0xff]   ;;  %v4556_v10 = vld [vmem:[%s5737_s1 + $0x3f0] sm:$0xff]  }
  0x47   : > { %2615 = vmatmul.mubr.bf16.gmra.mxu1 %v4480_v8  ;;  %3934 = vmatpush3.bf16.msra.mxu0 %v4483_v11  ;;  %v4554_v8 = vld [vmem:[%s5737_s1 + $0x3b8] sm:$0xff]   ;;  %v4557_v11 = vld [vmem:[%s5737_s1 + $0x330] sm:$0xff]  }
  0x48   : > { %3974 = vmatpush3.bf16.msra.mxu1 %v4484_v12  ;;  %3935 = vmatprep.subr.bf16.mxu0 %v4485_v13  ;;  %v4558_v12 = vld [vmem:[%s5737_s1 + $0x3b0] sm:$0xff]  }
  0x49   : > { %3975 = vmatprep.subr.bf16.mxu1 %v4486_v14  ;;  %2655 = vmatprep.mubr.bf16.mxu0 %v4491_v18  ;;  %v4559_v13 = vld [vmem:[%s4911_s6 + $0xec] ss:$100 sps:$4 sm:$0xff]   ;;  %v4561_v14 = vld [vmem:[%s4911_s6 + $0xf4] ss:$100 sps:$4 sm:$0xff]  }
  0x4a   : > { %2720 = vmatprep.mubr.bf16.mxu1 %v4494_v20  ;;  %v4566_v18 = vld [vmem:[%s5737_s1 + $0x3e8] sm:$0xff]  }
  0x4b   : > { %3936 = vmatpush3.bf16.msra.mxu0 %v4487_v15  ;;  %v4563_v15 = vld [vmem:[%s4911_s6 + $0xe8] ss:$100 sps:$4 sm:$0xff]  }
  0x4c   : > { %3976 = vmatpush3.bf16.msra.mxu1 %v4488_v16  ;;  %4001 = vmatprep.subr.bf16.mxu0 %v4495_v21  ;;  %v4564_v16 = vld [vmem:[%s4911_s6 + $0xf0] ss:$100 sps:$4 sm:$0xff]   ;;  %v4567_v20 = vld [vmem:[%s5737_s1 + $0x328] sm:$0xff]  }
  0x4d   : > { %4041 = vmatprep.subr.bf16.mxu1 %v4496_v22  ;;  %v4568_v21 = vld [vmem:[%s5737_s1 + $0x3a8] sm:$0xff]   ;;  %v4569_v22 = vld [vmem:[%s5737_s1 + $0x360] sm:$0xff]  }
  0x4e   : > { %2656 = vmatmul.mubr.bf16.vlgmr.msra.gmra.mxu0 %v4489_v17  ;;  %v4565_v17 = vld [vmem:[%s5737_s1 + $0x368] sm:$0xff]  }
  0x4f   : > { %2721 = vmatmul.mubr.bf16.vlgmr.msra.gmra.mxu1 %v4492_v19  ;;  %4002 = vmatpush3.bf16.msra.mxu0 %v4497_v23  ;;  %v741_v19 = vld [vmem:[%s5177_s4] sm:$0xff] }
  0x50   : > { %4042 = vmatpush3.bf16.msra.mxu1 %v4498_v24  ;;  %4003 = vmatprep.subr.bf16.mxu0 %v4499_v25  ;;  %v4570_v23 = vld [vmem:[%s5737_s1 + $0x3e0] sm:$0xff]   ;;  %v742_v24 = vld [vmem:[%s5177_s4 + $0x8] sm:$0xff] }
  0x51   : > { %4043 = vmatprep.subr.bf16.mxu1 %v4500_v26  ;;  %2663 = vmatprep.mubr.bf16.mxu0 %v4503_v29  ;;  %v4571_v25 = vld [vmem:[%s5737_s1 + $0x320] sm:$0xff]   ;;  %v4577_v29 = vld [vmem:[%s4911_s6 + $0x1b0] ss:$100 sps:$4 sm:$0xff]  }
  0x52   : > { %2728 = vmatprep.mubr.bf16.mxu1 %v4505_v30  ;;  %751 = vperm.xlu0 %4399, %v741_v19   ;;  %v4572_v26 = vld [vmem:[%s5737_s1 + $0x3a0] sm:$0xff]   ;;  %v4578_v30 = vld [vmem:[%s4911_s6 + $0x1b8] ss:$100 sps:$4 sm:$0xff]  }
  0x53   : > { %4004 = vmatpush3.bf16.msra.mxu0 %v4501_v27  ;;  %v4573_v27 = vld [vmem:[%s4911_s6 + $0x1b4] ss:$100 sps:$4 sm:$0xff]   ;;  %v4633_v19 = vld [vmem:[%s4911_s6 + $0x1c0] ss:$100 sps:$4 sm:$0xff]  }
  0x54   : > { %4044 = vmatpush3.bf16.msra.mxu1 %v4502_v28  ;;  %4005 = vmatprep.subr.bf16.mxu0 %v4509_v33  ;;  %v4575_v28 = vld [vmem:[%s4911_s6 + $0x1bc] ss:$100 sps:$4 sm:$0xff]   ;;  %v743_v33 = vld [vmem:[%s5177_s4 + $0x10] sm:$0xff] }
  0x55   : > { %4045 = vmatprep.subr.bf16.mxu1 %v4510_v34  ;;  %761 = vperm.xlu1 %4400, %v743_v33   ;;  %v4581_v34 = vld [vmem:[%s5737_s1 + $0x318] sm:$0xff]   ;;  %v4649_v33 = vld [vmem:[%s5737_s1 + $0x448] sm:$0xff]  }
  0x56   : > { %2664 = vmatmul.mubr.bf16.gmra.mxu0 %v4507_v31  ;;  %756 = vperm.xlu0 %4399, %v742_v24   ;;  %v4579_v31 = vld [vmem:[%s5737_s1 + $0x358] sm:$0xff]  }
  0x57   : > { %2729 = vmatmul.mubr.bf16.gmra.mxu1 %v4508_v32  ;;  %4006 = vmatpush3.bf16.msra.mxu0 %v4511_v35  ;;  %v4580_v32 = vld [vmem:[%s5737_s1 + $0x3d8] sm:$0xff]  }
  0x58   : > { %4046 = vmatpush3.bf16.msra.mxu1 %v4512_v36  ;;  %4007 = vmatprep.subr.bf16.mxu0 %v4513_v37  ;;  %v4582_v35 = vld [vmem:[%s5737_s1 + $0x398] sm:$0xff]   ;;  %v4583_v36 = vld [vmem:[%s5737_s1 + $0x350] sm:$0xff]  }
  0x59   : > { %4047 = vmatprep.subr.bf16.mxu1 %v4514_v38  ;;  %2671 = vmatprep.mubr.bf16.mxu0 %v4517_v41  ;;  %v4584_v37 = vld [vmem:[%s5737_s1 + $0x3d0] sm:$0xff]   ;;  %v744_v38 = vld [vmem:[%s5177_s4 + $0x18] sm:$0xff] }
  0x5a   : > { %2736 = vmatprep.mubr.bf16.mxu1 %v4519_v42  ;;  %766 = vperm.xlu1 %4400, %v744_v38   ;;  %v4587_v41 = vld [vmem:[%s4911_s6 + $0x27c] ss:$100 sps:$4 sm:$0xff]   ;;  %v4589_v42 = vld [vmem:[%s4911_s6 + $0x284] ss:$100 sps:$4 sm:$0xff]  }
  0x5b   : > { %4008 = vmatpush3.bf16.msra.mxu0 %v4515_v39  ;;  %v4585_v39 = vld [vmem:[%s5737_s1 + $0x310] sm:$0xff]   ;;  %v4638_v24 = vld [vmem:[%s5737_s1 + $0x498] sm:$0xff]   ;;  %v4654_v38 = vld [vmem:[%s5737_s1 + $0x4c0] sm:$0xff]  }
  0x5c   : > { %4048 = vmatpush3.bf16.msra.mxu1 %v4516_v40  ;;  %4009 = vmatprep.subr.bf16.mxu0 %v4523_v45  ;;  %v4586_v40 = vld [vmem:[%s5737_s1 + $0x390] sm:$0xff]   ;;  %v4593_v45 = vld [vmem:[%s5737_s1 + $0x348] sm:$0xff]  }
  0x5d   : > { %4049 = vmatprep.subr.bf16.mxu1 %v4524_v46  ;;  %v4594_v46 = vld [vmem:[%s5737_s1 + $0x3c8] sm:$0xff]  }
  0x5e   : > { %2672 = vmatmul.mubr.bf16.gmra.mxu0 %v4521_v43  ;;  %v4591_v43 = vld [vmem:[%s4911_s6 + $0x278] ss:$100 sps:$4 sm:$0xff]  }
  0x5f   : > { %2737 = vmatmul.mubr.bf16.gmra.mxu1 %v4522_v44  ;;  %4010 = vmatpush3.bf16.msra.mxu0 %v4525_v47  ;;  %v4592_v44 = vld [vmem:[%s4911_s6 + $0x280] ss:$100 sps:$4 sm:$0xff]  }
  0x60   : > { %4050 = vmatpush3.bf16.msra.mxu1 %v4526_v48  ;;  %4011 = vmatprep.subr.bf16.mxu0 %v4527_v49  ;;  %v745_v47 = vld [vmem:[%s5177_s4 + $0x20] sm:$0xff]  ;;  %v4595_v48 = vld [vmem:[%s5737_s1 + $0x308] sm:$0xff]  }
  0x61   : > { %4051 = vmatprep.subr.bf16.mxu1 %v4528_v50  ;;  %2679 = vmatprep.mubr.bf16.mxu0 %v4531_v53  ;;  %v4596_v49 = vld [vmem:[%s5737_s1 + $0x388] sm:$0xff]   ;;  %v4597_v50 = vld [vmem:[%s5737_s1 + $0x340] sm:$0xff]  }
  0x62   : > { %2744 = vmatprep.mubr.bf16.mxu1 %v4533_v54  ;;  %771 = vperm.xlu0 %4399, %v745_v47   ;;  %v4599_v53 = vld [vmem:[%s5737_s1 + $0x300] sm:$0xff]   ;;  %v4665_v47 = vld [vmem:[%s5737_s1 + $0x538] sm:$0xff]  }
  0x63   : > { %4012 = vmatpush3.bf16.msra.mxu0 %v4529_v51  ;;  %v4598_v51 = vld [vmem:[%s5737_s1 + $0x3c0] sm:$0xff]  }
  0x64   : > { %4052 = vmatpush3.bf16.msra.mxu1 %v4530_v52  ;;  %4013 = vmatprep.subr.bf16.mxu0 %v4537_v57  ;;  %v746_v52 = vld [vmem:[%s5177_s4 + $0x28] sm:$0xff]  ;;  %v4600_v54 = vld [vmem:[%s5737_s1 + $0x380] sm:$0xff]   ;;  %v4604_v57 = vld [vmem:[%s4911_s6 + $0x38] ss:$100 sps:$4 sm:$0xff]  }
  0x65   : > { %4053 = vmatprep.subr.bf16.mxu1 %v4538_v58  ;;  %776 = vperm.xlu1 %4400, %v746_v52   ;;  %v4606_v58 = vld [vmem:[%s4911_s6 + $0x3c] ss:$100 sps:$4 sm:$0xff]   ;;  %v4670_v52 = vld [vmem:[%s5737_s1 + $0x5b0] sm:$0xff]  }
  0x66   : > { %2680 = vmatmul.mubr.bf16.gmra.mxu0 %v4535_v55  ;;  %v4601_v55 = vld [vmem:[%s4911_s6 + $0x30] ss:$100 sps:$4 sm:$0xff]  }
  0x67   : > { %2745 = vmatmul.mubr.bf16.gmra.mxu1 %v4536_v56  ;;  %4014 = vmatpush3.bf16.msra.mxu0 %v4539_v59  ;;  %v4603_v56 = vld [vmem:[%s4911_s6 + $0x34] ss:$100 sps:$4 sm:$0xff]  }
  0x68   : > { %4054 = vmatpush3.bf16.msra.mxu1 %v4540_v60  ;;  %4015 = vmatprep.subr.bf16.mxu0 %v4541_v61  ;;  %v4607_v59 = vld [vmem:[%s5737_s1 + $0x478] sm:$0xff]   ;;  %v747_v61 = vld [vmem:[%s5177_s4 + $0x30] sm:$0xff] }
  0x69   : > { %4055 = vmatprep.subr.bf16.mxu1 %v4542_v62  ;;  %2785 = vmatprep.mubr.bf16.mxu0 %v4547_v2  ;;  %v4608_v60 = vld [vmem:[%s5737_s1 + $0x4f8] sm:$0xff]  }
  0x6a   : > { %2850 = vmatprep.mubr.bf16.mxu1 %v4550_v4  ;;  %v4609_v62 = vld [vmem:[%s5737_s1 + $0x438] sm:$0xff]   ;;  %781 = vperm.xlu0 %4399, %v747_v61   ;;  %v4614_v4 = vld [vmem:[%s5737_s1 + $0x4b0] sm:$0xff]   ;;  %v4681_v61 = vld [vmem:[%s5737_s1 + $0x560] sm:$0xff]  }
  0x6b   : > { %4016 = vmatpush3.bf16.msra.mxu0 %v4543_v63  ;;  %v4610_v63 = vld [vmem:[%s5737_s1 + $0x4b8] sm:$0xff]  }
  0x6c   : > { %4056 = vmatpush3.bf16.msra.mxu1 %v4544_v0  ;;  %4081 = vmatprep.subr.bf16.mxu0 %v4551_v5  ;;  %v4611_v0 = vld [vmem:[%s5737_s1 + $0x470] sm:$0xff]   ;;  %v748_v2 = vld [vmem:[%s5177_s4 + $0x38] sm:$0xff] }
  0x6d   : > { %4121 = vmatprep.subr.bf16.mxu1 %v4552_v6  ;;  %786 = vperm.xlu1 %4400, %v748_v2   ;;  %v4615_v5 = vld [vmem:[%s4911_s6 + $0xfc] ss:$100 sps:$4 sm:$0xff]   ;;  %v4617_v6 = vld [vmem:[%s4911_s6 + $0x104] ss:$100 sps:$4 sm:$0xff]  }
  0x6e   : > { %2786 = vmatmul.mubr.bf16.vlgmr.msra.gmra.mxu0 %v4545_v1  ;;  %v4612_v1 = vld [vmem:[%s5737_s1 + $0x4f0] sm:$0xff]   ;;  %v4687_v2 = vld [vmem:[%s4911_s6 + $0x1dc] ss:$100 sps:$4 sm:$0xff]  }
  0x6f   : > { %2851 = vmatmul.mubr.bf16.vlgmr.msra.gmra.mxu1 %v4548_v3  ;;  %4082 = vmatpush3.bf16.msra.mxu0 %v4553_v7  ;;  %v4613_v3 = vld [vmem:[%s5737_s1 + $0x430] sm:$0xff]   ;;  %v4619_v7 = vld [vmem:[%s4911_s6 + $0xf8] ss:$100 sps:$4 sm:$0xff]  }
  0x70   : > { %4122 = vmatpush3.bf16.msra.mxu1 %v4554_v8  ;;  %4083 = vmatprep.subr.bf16.mxu0 %v4555_v9  ;;  %v4620_v8 = vld [vmem:[%s4911_s6 + $0x100] ss:$100 sps:$4 sm:$0xff]   ;;  %v4621_v9 = vld [vmem:[%s5737_s1 + $0x468] sm:$0xff]  }
  0x71   : > { %4123 = vmatprep.subr.bf16.mxu1 %v4556_v10  ;;  %2793 = vmatprep.mubr.bf16.mxu0 %v4559_v13  ;;  %v4622_v10 = vld [vmem:[%s5737_s1 + $0x4e8] sm:$0xff]   ;;  %v4625_v13 = vld [vmem:[%s5737_s1 + $0x460] sm:$0xff]  }
  0x72   : > { %2858 = vmatprep.mubr.bf16.mxu1 %v4561_v14  ;;  %v4626_v14 = vld [vmem:[%s5737_s1 + $0x4e0] sm:$0xff]  }
  0x73   : > { %4084 = vmatpush3.bf16.msra.mxu0 %v4557_v11  ;;  %v4623_v11 = vld [vmem:[%s5737_s1 + $0x428] sm:$0xff]  }
  0x74   : > { %4124 = vmatpush3.bf16.msra.mxu1 %v4558_v12  ;;  %4085 = vmatprep.subr.bf16.mxu0 %v4565_v17  ;;  %v4624_v12 = vld [vmem:[%s5737_s1 + $0x4a8] sm:$0xff]  }
  0x75   : > { %4125 = vmatprep.subr.bf16.mxu1 %v4566_v18  ;;  %v4629_v17 = vld [vmem:[%s4911_s6 + $0x1c4] ss:$100 sps:$4 sm:$0xff]   ;;  %v4631_v18 = vld [vmem:[%s4911_s6 + $0x1cc] ss:$100 sps:$4 sm:$0xff]  }
  0x76   : > { %2794 = vmatmul.mubr.bf16.gmra.mxu0 %v4563_v15  ;;  %v4627_v15 = vld [vmem:[%s5737_s1 + $0x420] sm:$0xff]  }
  0x77   : > { %2859 = vmatmul.mubr.bf16.gmra.mxu1 %v4564_v16  ;;  %4086 = vmatpush3.bf16.msra.mxu0 %v4567_v20  ;;  %v4628_v16 = vld [vmem:[%s5737_s1 + $0x4a0] sm:$0xff]   ;;  %v4634_v20 = vld [vmem:[%s4911_s6 + $0x1c8] ss:$100 sps:$4 sm:$0xff]  }
  0x78   : > { %4126 = vmatpush3.bf16.msra.mxu1 %v4568_v21  ;;  %4087 = vmatprep.subr.bf16.mxu0 %v4569_v22  ;;  %v4635_v21 = vld [vmem:[%s5737_s1 + $0x458] sm:$0xff]  }
  0x79   : > { %4127 = vmatprep.subr.bf16.mxu1 %v4570_v23  ;;  %2801 = vmatprep.mubr.bf16.mxu0 %v4573_v27  ;;  %v4636_v22 = vld [vmem:[%s5737_s1 + $0x4d8] sm:$0xff]   ;;  %v4641_v27 = vld [vmem:[%s5737_s1 + $0x410] sm:$0xff]  }
  0x7a   : > { %2866 = vmatprep.mubr.bf16.mxu1 %v4575_v28  ;;  %v4637_v23 = vld [vmem:[%s5737_s1 + $0x418] sm:$0xff]   ;;  %v4642_v28 = vld [vmem:[%s5737_s1 + $0x490] sm:$0xff]  }
  0x7b   : > { %4088 = vmatpush3.bf16.msra.mxu0 %v4571_v25  ;;  %v4639_v25 = vld [vmem:[%s5737_s1 + $0x450] sm:$0xff]  }
  0x7c   : > { %4128 = vmatpush3.bf16.msra.mxu1 %v4572_v26  ;;  %4089 = vmatprep.subr.bf16.mxu0 %v4579_v31  ;;  %v4640_v26 = vld [vmem:[%s5737_s1 + $0x4d0] sm:$0xff]   ;;  %v4647_v31 = vld [vmem:[%s4911_s6 + $0x288] ss:$100 sps:$4 sm:$0xff]  }
  0x7d   : > { %4129 = vmatprep.subr.bf16.mxu1 %v4580_v32  ;;  %v4648_v32 = vld [vmem:[%s4911_s6 + $0x290] ss:$100 sps:$4 sm:$0xff]  }
  0x7e   : > { %2802 = vmatmul.mubr.bf16.gmra.mxu0 %v4577_v29  ;;  %v4643_v29 = vld [vmem:[%s4911_s6 + $0x28c] ss:$100 sps:$4 sm:$0xff]  }
  0x7f   : > { %2867 = vmatmul.mubr.bf16.gmra.mxu1 %v4578_v30  ;;  %4090 = vmatpush3.bf16.msra.mxu0 %v4581_v34  ;;  %v4645_v30 = vld [vmem:[%s4911_s6 + $0x294] ss:$100 sps:$4 sm:$0xff]   ;;  %v4650_v34 = vld [vmem:[%s5737_s1 + $0x4c8] sm:$0xff]  }
  0x80   : > { %4130 = vmatpush3.bf16.msra.mxu1 %v4582_v35  ;;  %4091 = vmatprep.subr.bf16.mxu0 %v4583_v36  ;;  %v4651_v35 = vld [vmem:[%s5737_s1 + $0x408] sm:$0xff]  }
  0x81   : > { %4131 = vmatprep.subr.bf16.mxu1 %v4584_v37  ;;  %2809 = vmatprep.mubr.bf16.mxu0 %v4587_v41  ;;  %v4652_v36 = vld [vmem:[%s5737_s1 + $0x488] sm:$0xff]   ;;  %v4653_v37 = vld [vmem:[%s5737_s1 + $0x440] sm:$0xff]  }
  0x82   : > { %2874 = vmatprep.mubr.bf16.mxu1 %v4589_v42  ;;  %v4657_v41 = vld [vmem:[%s4911_s6 + $0x40] ss:$100 sps:$4 sm:$0xff]  }
  0x83   : > { %4092 = vmatpush3.bf16.msra.mxu0 %v4585_v39  ;;  %v4655_v39 = vld [vmem:[%s5737_s1 + $0x400] sm:$0xff]  }
  0x84   : > { %4132 = vmatpush3.bf16.msra.mxu1 %v4586_v40  ;;  %4093 = vmatprep.subr.bf16.mxu0 %v4593_v45  ;;  %v4656_v40 = vld [vmem:[%s5737_s1 + $0x480] sm:$0xff]   ;;  %v4663_v45 = vld [vmem:[%s5737_s1 + $0x578] sm:$0xff]  }
  0x85   : > { %4133 = vmatprep.subr.bf16.mxu1 %v4594_v46  ;;  %v4659_v42 = vld [vmem:[%s4911_s6 + $0x44] ss:$100 sps:$4 sm:$0xff]   ;;  %v4664_v46 = vld [vmem:[%s5737_s1 + $0x5f8] sm:$0xff]  }
  0x86   : > { %2810 = vmatmul.mubr.bf16.gmra.mxu0 %v4591_v43  ;;  %v4660_v43 = vld [vmem:[%s4911_s6 + $0x48] ss:$100 sps:$4 sm:$0xff]  }
  0x87   : > { %2875 = vmatmul.mubr.bf16.gmra.mxu1 %v4592_v44  ;;  %4094 = vmatpush3.bf16.msra.mxu0 %v4595_v48  ;;  %v4662_v44 = vld [vmem:[%s4911_s6 + $0x4c] ss:$100 sps:$4 sm:$0xff]   ;;  %v4666_v48 = vld [vmem:[%s5737_s1 + $0x5b8] sm:$0xff]  }
  0x88   : > { %4134 = vmatpush3.bf16.msra.mxu1 %v4596_v49  ;;  %4095 = vmatprep.subr.bf16.mxu0 %v4597_v50  ;;  %v4667_v49 = vld [vmem:[%s5737_s1 + $0x570] sm:$0xff]  }
  0x89   : > { %4135 = vmatprep.subr.bf16.mxu1 %v4598_v51  ;;  %2915 = vmatprep.mubr.bf16.mxu0 %v4603_v56  ;;  %v4668_v50 = vld [vmem:[%s5737_s1 + $0x5f0] sm:$0xff]  }
  0x8a   : > { %2980 = vmatprep.mubr.bf16.mxu1 %v4606_v58  ;;  %v4669_v51 = vld [vmem:[%s5737_s1 + $0x530] sm:$0xff]   ;;  %v4678_v58 = vld [vmem:[%s5737_s1 + $0x5e8] sm:$0xff]  }
  0x8b   : > { %4096 = vmatpush3.bf16.msra.mxu0 %v4599_v53  ;;  %v4671_v53 = vld [vmem:[%s4911_s6 + $0x10c] ss:$100 sps:$4 sm:$0xff]  }
  0x8c   : > { %4136 = vmatpush3.bf16.msra.mxu1 %v4600_v54  ;;  %4161 = vmatprep.subr.bf16.mxu0 %v4607_v59  ;;  %v4673_v54 = vld [vmem:[%s4911_s6 + $0x114] ss:$100 sps:$4 sm:$0xff]   ;;  %v4679_v59 = vld [vmem:[%s5737_s1 + $0x528] sm:$0xff]  }
  0x8d   : > { %4201 = vmatprep.subr.bf16.mxu1 %v4608_v60  ;;  %v4676_v56 = vld [vmem:[%s4911_s6 + $0x110] ss:$100 sps:$4 sm:$0xff]   ;;  %v4680_v60 = vld [vmem:[%s5737_s1 + $0x5a8] sm:$0xff]  }
  0x8e   : > { %2916 = vmatmul.mubr.bf16.vlgmr.msra.gmra.mxu0 %v4601_v55  ;;  %v4675_v55 = vld [vmem:[%s4911_s6 + $0x108] ss:$100 sps:$4 sm:$0xff]  }
  0x8f   : > { %2981 = vmatmul.mubr.bf16.vlgmr.msra.gmra.mxu1 %v4604_v57  ;;  %4162 = vmatpush3.bf16.msra.mxu0 %v4609_v62  ;;  %v4677_v57 = vld [vmem:[%s5737_s1 + $0x568] sm:$0xff]   ;;  %v4682_v62 = vld [vmem:[%s5737_s1 + $0x5e0] sm:$0xff]  }
  0x90   : > { %4202 = vmatpush3.bf16.msra.mxu1 %v4610_v63  ;;  %4163 = vmatprep.subr.bf16.mxu0 %v4611_v0  ;;  %v4683_v63 = vld [vmem:[%s5737_s1 + $0x520] sm:$0xff]  }
  0x91   : > { %4203 = vmatprep.subr.bf16.mxu1 %v4612_v1  ;;  %2923 = vmatprep.mubr.bf16.mxu0 %v4615_v5  ;;  %v4684_v0 = vld [vmem:[%s5737_s1 + $0x5a0] sm:$0xff]   ;;  %v4685_v1 = vld [vmem:[%s4911_s6 + $0x1d4] ss:$100 sps:$4 sm:$0xff]  }
  0x92   : > { %2988 = vmatprep.mubr.bf16.mxu1 %v4617_v6  ;;  %v4690_v5 = vld [vmem:[%s4911_s6 + $0x1d8] ss:$100 sps:$4 sm:$0xff]  }
  0x93   : > { %4164 = vmatpush3.bf16.msra.mxu0 %v4613_v3  ;;  %v4689_v3 = vld [vmem:[%s4911_s6 + $0x1d0] ss:$100 sps:$4 sm:$0xff]  }
  0x94   : > { %4204 = vmatpush3.bf16.msra.mxu1 %v4614_v4  ;;  %4165 = vmatprep.subr.bf16.mxu0 %v4621_v9  ;;  %v4692_v9 = vld [vmem:[%s5737_s1 + $0x5d8] sm:$0xff]  }
  0x95   : > { %4205 = vmatprep.subr.bf16.mxu1 %v4622_v10 }
  0x96   : > { %2924 = vmatmul.mubr.bf16.gmra.mxu0 %v4619_v7  ;;  %v4691_v7 = vld [vmem:[%s5737_s1 + $0x558] sm:$0xff]  }
  0x97   : > { %2989 = vmatmul.mubr.bf16.gmra.mxu1 %v4620_v8  ;;  %4166 = vmatpush3.bf16.msra.mxu0 %v4623_v11 }
  0x98   : > { %4206 = vmatpush3.bf16.msra.mxu1 %v4624_v12  ;;  %4167 = vmatprep.subr.bf16.mxu0 %v4625_v13  ;;  %v4693_v12 = vld [vmem:[%s5737_s1 + $0x518] sm:$0xff]  }
  0x99   : > { %4207 = vmatprep.subr.bf16.mxu1 %v4626_v14  ;;  %2931 = vmatprep.mubr.bf16.mxu0 %v4629_v17  ;;  %v4695_v17 = vld [vmem:[%s5737_s1 + $0x550] sm:$0xff]  }
  0x9a   : > { %2996 = vmatprep.mubr.bf16.mxu1 %v4631_v18 }
  0x9b   : > { %4168 = vmatpush3.bf16.msra.mxu0 %v4627_v15  ;;  %v4694_v15 = vld [vmem:[%s5737_s1 + $0x598] sm:$0xff]  }
  0x9c   : > { %4208 = vmatpush3.bf16.msra.mxu1 %v4628_v16  ;;  %4169 = vmatprep.subr.bf16.mxu0 %v4635_v21 }
  0x9d   : > { %4209 = vmatprep.subr.bf16.mxu1 %v4636_v22  ;;  %v4697_v22 = vld [vmem:[%s5737_s1 + $0x510] sm:$0xff]  }
  0x9e   : > { %2932 = vmatmul.mubr.bf16.gmra.mxu0 %v4633_v19  ;;  %v4696_v19 = vld [vmem:[%s5737_s1 + $0x5d0] sm:$0xff]  }
  0x9f   : > { %2997 = vmatmul.mubr.bf16.gmra.mxu1 %v4634_v20  ;;  %4170 = vmatpush3.bf16.msra.mxu0 %v4637_v23 }
  0xa0   : > { %4210 = vmatpush3.bf16.msra.mxu1 %v4638_v24  ;;  %4171 = vmatprep.subr.bf16.mxu0 %v4639_v25  ;;  %v4698_v24 = vld [vmem:[%s5737_s1 + $0x590] sm:$0xff]   ;;  %v4699_v25 = vld [vmem:[%s4911_s6 + $0x29c] ss:$100 sps:$4 sm:$0xff]  }
  0xa1   : > { %4211 = vmatprep.subr.bf16.mxu1 %v4640_v26  ;;  %2939 = vmatprep.mubr.bf16.mxu0 %v4643_v29  ;;  %v4704_v29 = vld [vmem:[%s4911_s6 + $0x2a0] ss:$100 sps:$4 sm:$0xff]  }
  0xa2   : > { %3004 = vmatprep.mubr.bf16.mxu1 %v4645_v30 }
  0xa3   : > { %4172 = vmatpush3.bf16.msra.mxu0 %v4641_v27  ;;  %v4701_v27 = vld [vmem:[%s4911_s6 + $0x2a4] ss:$100 sps:$4 sm:$0xff]  }
  0xa4   : > { %4212 = vmatpush3.bf16.msra.mxu1 %v4642_v28  ;;  %4173 = vmatprep.subr.bf16.mxu0 %v4649_v33  ;;  %v4703_v28 = vld [vmem:[%s4911_s6 + $0x298] ss:$100 sps:$4 sm:$0xff]   ;;  %v4706_v33 = vld [vmem:[%s5737_s1 + $0x5c8] sm:$0xff]  }
  0xa5   : > { %4213 = vmatprep.subr.bf16.mxu1 %v4650_v34 }
  0xa6   : > { %2940 = vmatmul.mubr.bf16.gmra.mxu0 %v4647_v31  ;;  %v4705_v31 = vld [vmem:[%s5737_s1 + $0x548] sm:$0xff]  }
  0xa7   : > { %3005 = vmatmul.mubr.bf16.gmra.mxu1 %v4648_v32  ;;  %4174 = vmatpush3.bf16.msra.mxu0 %v4651_v35 }
  0xa8   : > { %4214 = vmatpush3.bf16.msra.mxu1 %v4652_v36  ;;  %4175 = vmatprep.subr.bf16.mxu0 %v4653_v37  ;;  %v4707_v36 = vld [vmem:[%s5737_s1 + $0x508] sm:$0xff]  }
  0xa9   : > { %4215 = vmatprep.subr.bf16.mxu1 %v4654_v38  ;;  %3045 = vmatprep.mubr.bf16.mxu0 %v4659_v42 }
  0xaa   : > { %3110 = vmatprep.mubr.bf16.mxu1 %v4662_v44 }
  0xab   : > { %4176 = vmatpush3.bf16.msra.mxu0 %v4655_v39  ;;  %v4708_v39 = vld [vmem:[%s5737_s1 + $0x588] sm:$0xff]  }
  0xac   : > { %4216 = vmatpush3.bf16.msra.mxu1 %v4656_v40  ;;  %4241 = vmatprep.subr.bf16.mxu0 %v4663_v45 }
  0xad   : > { %4281 = vmatprep.subr.bf16.mxu1 %v4664_v46  ;;  %v4711_v46 = vld [vmem:[%s5737_s1 + $0x500] sm:$0xff]  }
  0xae   : > { %3046 = vmatmul.mubr.bf16.vlgmr.msra.gmra.mxu0 %v4657_v41  ;;  %v4709_v41 = vld [vmem:[%s5737_s1 + $0x540] sm:$0xff]  }
  0xaf   : > { %3111 = vmatmul.mubr.bf16.vlgmr.msra.gmra.mxu1 %v4660_v43  ;;  %4242 = vmatpush3.bf16.msra.mxu0 %v4665_v47  ;;  %v4710_v43 = vld [vmem:[%s5737_s1 + $0x5c0] sm:$0xff]  }
  0xb0   : > { %4282 = vmatpush3.bf16.msra.mxu1 %v4666_v48  ;;  %4243 = vmatprep.subr.bf16.mxu0 %v4667_v49  ;;  %v4712_v48 = vld [vmem:[%s5737_s1 + $0x580] sm:$0xff]   ;;  %v4713_v49 = vld [vmem:[%s4911_s6 + $0x50] ss:$100 sps:$4 sm:$0xff]  }
  0xb1   : > { %4283 = vmatprep.subr.bf16.mxu1 %v4668_v50  ;;  %3053 = vmatprep.mubr.bf16.mxu0 %v4671_v53  ;;  %v4715_v50 = vld [vmem:[%s4911_s6 + $0x54] ss:$100 sps:$4 sm:$0xff]   ;;  %v4718_v53 = vld [vmem:[%s4911_s6 + $0x5c] ss:$100 sps:$4 sm:$0xff]  }
  0xb2   : > { %3118 = vmatprep.mubr.bf16.mxu1 %v4673_v54 }
  0xb3   : > { %4244 = vmatpush3.bf16.msra.mxu0 %v4669_v51 }
  0xb4   : > { %4284 = vmatpush3.bf16.msra.mxu1 %v4670_v52  ;;  %4245 = vmatprep.subr.bf16.mxu0 %v4677_v57  ;;  %v4716_v52 = vld [vmem:[%s4911_s6 + $0x58] ss:$100 sps:$4 sm:$0xff]   ;;  %v4720_v57 = vld [vmem:[%s5737_s1 + $0x630] sm:$0xff]  }
  0xb5   : > { %4285 = vmatprep.subr.bf16.mxu1 %v4678_v58 }
  0xb6   : > { %3054 = vmatmul.mubr.bf16.gmra.mxu0 %v4675_v55  ;;  %v4719_v55 = vld [vmem:[%s5737_s1 + $0x638] sm:$0xff]  }
  0xb7   : > { %3119 = vmatmul.mubr.bf16.gmra.mxu1 %v4676_v56  ;;  %4246 = vmatpush3.bf16.msra.mxu0 %v4679_v59 }
  0xb8   : > { %4286 = vmatpush3.bf16.msra.mxu1 %v4680_v60  ;;  %4247 = vmatprep.subr.bf16.mxu0 %v4681_v61  ;;  %v4721_v60 = vld [vmem:[%s4911_s6 + $0x11c] ss:$100 sps:$4 sm:$0xff]  }
  0xb9   : > { %4287 = vmatprep.subr.bf16.mxu1 %v4682_v62  ;;  %3061 = vmatprep.mubr.bf16.mxu0 %v4685_v1  ;;  %v4725_v1 = vld [vmem:[%s4911_s6 + $0x118] ss:$100 sps:$4 sm:$0xff]  }
  0xba   : > { %3126 = vmatprep.mubr.bf16.mxu1 %v4687_v2 }
  0xbb   : > { %4248 = vmatpush3.bf16.msra.mxu0 %v4683_v63  ;;  %v4723_v63 = vld [vmem:[%s4911_s6 + $0x124] ss:$100 sps:$4 sm:$0xff]  }
  0xbc   : > { %4288 = vmatpush3.bf16.msra.mxu1 %v4684_v0  ;;  %4249 = vmatprep.subr.bf16.mxu0 %v4691_v7  ;;  %v4726_v7 = vld [vmem:[%s4911_s6 + $0x120] ss:$100 sps:$4 sm:$0xff]  }
  0xbd   : > { %4289 = vmatprep.subr.bf16.mxu1 %v4692_v9 }
  0xbe   : > { %3062 = vmatmul.mubr.bf16.gmra.mxu0 %v4689_v3  ;;  %v4727_v3 = vld [vmem:[%s5737_s1 + $0x628] sm:$0xff]  }
  0xbf   : > { %3127 = vmatmul.mubr.bf16.gmra.mxu1 %v4690_v5  ;;  %4250 = vmatpush3.bf16.msra.mxu0 %v4693_v12  ;;  %v4728_v12 = vld [vmem:[%s5737_s1 + $0x620] sm:$0xff]  }
  0xc0   : > { %4290 = vmatpush3.bf16.msra.mxu1 %v4694_v15  ;;  %4251 = vmatprep.subr.bf16.mxu0 %v4695_v17 }
  0xc1   : > { %4291 = vmatprep.subr.bf16.mxu1 %v4696_v19  ;;  %3069 = vmatprep.mubr.bf16.mxu0 %v4699_v25  ;;  %v4733_v25 = vld [vmem:[%s4911_s6 + $0x1e0] ss:$100 sps:$4 sm:$0xff]  }
  0xc2   : > { %3134 = vmatprep.mubr.bf16.mxu1 %v4701_v27 }
  0xc3   : > { %4252 = vmatpush3.bf16.msra.mxu0 %v4697_v22 }
  0xc4   : > { %4292 = vmatpush3.bf16.msra.mxu1 %v4698_v24  ;;  %4253 = vmatprep.subr.bf16.mxu0 %v4705_v31 }
  0xc5   : > { %4293 = vmatprep.subr.bf16.mxu1 %v4706_v33  ;;  %v4736_v33 = vld [vmem:[%s5737_s1 + $0x610] sm:$0xff]  }
  0xc6   : > { %3070 = vmatmul.mubr.bf16.gmra.mxu0 %v4703_v28 }
  0xc7   : > { %3135 = vmatmul.mubr.bf16.gmra.mxu1 %v4704_v29  ;;  %4254 = vmatpush3.bf16.msra.mxu0 %v4707_v36  ;;  %v4737_v29 = vld [vmem:[%s4911_s6 + $0x2ac] ss:$100 sps:$4 sm:$0xff]  }
  0xc8   : > { %4294 = vmatpush3.bf16.msra.mxu1 %v4708_v39  ;;  %4255 = vmatprep.subr.bf16.mxu0 %v4709_v41 }
  0xc9   : > { %4295 = vmatprep.subr.bf16.mxu1 %v4710_v43  ;;  %3175 = vmatprep.mubr.bf16.mxu0 %v4715_v50  ;;  %v4746_v50 = vld [vmem:[%s4911_s6 + $0x1f0] ss:$100 sps:$4 sm:$0xff]  }
  0xca   : > { %3240 = vmatprep.mubr.bf16.mxu1 %v4718_v53  ;;  %v4744_v53 = vld [vmem:[%s5737_s1 + $0x600] sm:$0xff]  }
  0xcb   : > { %4256 = vmatpush3.bf16.msra.mxu0 %v4711_v46  ;;  %v4742_v46 = vld [vmem:[%s4911_s6 + $0x2b0] ss:$100 sps:$4 sm:$0xff]  }
  0xcc   : > { %4296 = vmatpush3.bf16.msra.mxu1 %v4712_v48  ;;  %4333 = vmatprep.subr.bf16.mxu0 %v4719_v55  ;;  %v4745_v48 = vld [vmem:[%s4911_s6 + $0x60] ss:$100 sps:$4 sm:$0xff]  }
  0xcd   : > { %4357 = vmatprep.subr.bf16.mxu1 %v4719_v55 }
  0xce   : > { %3176 = vmatmul.mubr.bf16.vlgmr.msra.gmra.mxu0 %v4713_v49 }
  0xcf   : > { %3241 = vmatmul.mubr.bf16.vlgmr.msra.gmra.mxu1 %v4716_v52  ;;  %4334 = vmatpush3.bf16.msra.mxu0 %v4719_v55 }
  0xd0   : > { %4365 = vmatpush3.bf16.msra.mxu1 %v4719_v55  ;;  %4335 = vmatprep.subr.bf16.mxu0 %v4720_v57 }
  0xd1   : > { %4358 = vmatprep.subr.bf16.mxu1 %v4720_v57  ;;  %3183 = vmatprep.mubr.bf16.mxu0 %v4721_v60 }
  0xd2   : > { %3248 = vmatprep.mubr.bf16.mxu1 %v4723_v63 }
  0xd3   : > { %4336 = vmatpush3.bf16.msra.mxu0 %v4720_v57 }
  0xd4   : > { %4366 = vmatpush3.bf16.msra.mxu1 %v4720_v57  ;;  %4337 = vmatprep.subr.bf16.mxu0 %v4727_v3 }
  0xd5   : > { %4359 = vmatprep.subr.bf16.mxu1 %v4727_v3 }
  0xd6   : > { %3184 = vmatmul.mubr.bf16.gmra.mxu0 %v4725_v1 }
  0xd7   : > { %3249 = vmatmul.mubr.bf16.gmra.mxu1 %v4726_v7  ;;  %4338 = vmatpush3.bf16.msra.mxu0 %v4727_v3 }
  0xd8   : > { %4367 = vmatpush3.bf16.msra.mxu1 %v4727_v3  ;;  %4339 = vmatprep.subr.bf16.mxu0 %v4728_v12 }
  0xd9   : > { %4360 = vmatprep.subr.bf16.mxu1 %v4728_v12 }
  0xdb   : > { %4340 = vmatpush3.bf16.msra.mxu0 %v4728_v12 }
  0xdc   : > { %4368 = vmatpush3.bf16.msra.mxu1 %v4728_v12 }
  0xee   : > { %v3857_v4 = vpop.f32.mrf.mxu0 }
  0xef   : > { %v3897_v6 = vpop.f32.mrf.mxu1 }
  0xf0   : > { %v3858_v8 = vpop.f32.mrf.mxu0 }
  0xf1   : > { %v5447_v10 = vadd.f32 %v3858_v8, %v3857_v4  ;;  %v3898_v11 = vpop.f32.mrf.mxu1  ;;  %v752_v4 = vpop.permute.xlu0 %751 }
  0xf2   : > { %v5452_v13 = vadd.f32 %v3898_v11, %v3897_v6  ;;  %v3860_v14 = vpop.f32.mrf.mxu0  ;;  %v4729_v11 = vld [vmem:[%s4911_s6 + $0x1e4] ss:$100 sps:$4 sm:$0xff]  }
  0xf3   : > { %v3900_v16 = vpop.f32.mrf.mxu1  ;;  %v2528_v8 = vadd.f32 %v5447_v10, %v752_v4  ;;  %3191 = vmatprep.mubr.bf16.mxu0 %v4729_v11  ;;  %v4748_v4 = vld [vmem:[%s4911_s6 + $0x2b8] ss:$100 sps:$4 sm:$0xff]  }
  0xf4   : > { %v3861_v18 = vpop.f32.mrf.mxu0  ;;  %3192 = vmatmul.mubr.bf16.gmra.mxu0 %v4733_v25 }
  0xf5   : > { %v5463_v20 = vadd.f32 %v3861_v18, %v3860_v14  ;;  %v3901_v21 = vpop.f32.mrf.mxu1  ;;  %v4731_v14 = vld [vmem:[%s4911_s6 + $0x1ec] ss:$100 sps:$4 sm:$0xff]   ;;  %v5541_v15 = vadd.f32 %v5452_v13, %v2528_v8  ;;  %v757_v10 = vpop.permute.xlu0 %756  ;;  %v4735_v13 = vld [vmem:[%s5737_s1 + $0x618] sm:$0xff]   ;;  %3199 = vmatprep.mubr.bf16.mxu0 %v4737_v29 }
  0xf6   : > { %v5468_v23 = vadd.f32 %v3901_v21, %v3900_v16  ;;  %v3863_v26 = vpop.f32.mrf.mxu0  ;;  %3256 = vmatprep.mubr.bf16.mxu1 %v4731_v14  ;;  %4341 = vmatprep.subr.bf16.mxu0 %v4735_v13 }
  0xf7   : > { %v3903_v30 = vpop.f32.mrf.mxu1  ;;  %v2531_v18 = vadd.f32 %v5463_v20, %v757_v10  ;;  %4361 = vmatprep.subr.bf16.mxu1 %v4735_v13  ;;  %4342 = vmatpush3.bf16.msra.mxu0 %v4735_v13 }
  0xf8   : > { %v3864_v32 = vpop.f32.mrf.mxu0  ;;  %4369 = vmatpush3.bf16.msra.mxu1 %v4735_v13  ;;  %4343 = vmatprep.subr.bf16.mxu0 %v4736_v33 }
  0xf9   : > { %v5483_v34 = vadd.f32 %v3864_v32, %v3863_v26  ;;  %v3904_v35 = vpop.f32.mrf.mxu1  ;;  %v4734_v26 = vld [vmem:[%s4911_s6 + $0x1e8] ss:$100 sps:$4 sm:$0xff]   ;;  %v2596_v27 = vadd.f32 %v5468_v23, %v2531_v18  ;;  %v762_v23 = vpop.permute.xlu1 %761  ;;  %4362 = vmatprep.subr.bf16.mxu1 %v4736_v33 }
  0xfa   : > { %v5488_v37 = vadd.f32 %v3904_v35, %v3903_v30  ;;  %v3866_v38 = vpop.f32.mrf.mxu0  ;;  %v4739_v30 = vld [vmem:[%s4911_s6 + $0x2b4] ss:$100 sps:$4 sm:$0xff]   ;;  %3257 = vmatmul.mubr.bf16.gmra.mxu1 %v4734_v26 }
  0xfb   : > { %v3906_v40 = vpop.f32.mrf.mxu1  ;;  %3264 = vmatprep.mubr.bf16.mxu1 %v4739_v30  ;;  %4344 = vmatpush3.bf16.msra.mxu0 %v4736_v33 }
  0xfc   : > { %v3867_v42 = vpop.f32.mrf.mxu0  ;;  %4370 = vmatpush3.bf16.msra.mxu1 %v4736_v33 }
  0xfd   : > { %v5499_v44 = vadd.f32 %v3867_v42, %v3866_v38  ;;  %v3907_v45 = vpop.f32.mrf.mxu1  ;;  %v2536_v38 = vadd.f32 %v5483_v34, %v762_v23  ;;  %v4741_v42 = vld [vmem:[%s4911_s6 + $0x2a8] ss:$100 sps:$4 sm:$0xff]   ;;  %v767_v43 = vpop.permute.xlu1 %766 }
  0xfe   : > { %v5504_v47 = vadd.f32 %v3907_v45, %v3906_v40  ;;  %v3869_v51 = vpop.f32.mrf.mxu0  ;;  %v4743_v40 = vld [vmem:[%s5737_s1 + $0x608] sm:$0xff]   ;;  %3200 = vmatmul.mubr.bf16.gmra.mxu0 %v4741_v42 }
  0xff   : > { %v3909_v54 = vpop.f32.mrf.mxu1  ;;  %v2601_v41 = vadd.f32 %v5488_v37, %v2536_v38  ;;  %v2539_v34 = vadd.f32 %v5499_v44, %v767_v43  ;;  %4345 = vmatprep.subr.bf16.mxu0 %v4743_v40  ;;  %4363 = vmatprep.subr.bf16.mxu1 %v4743_v40 }
 0x100   : > { %v3870_v56 = vpop.f32.mrf.mxu0  ;;  %4349 = vmatprep.mubr.bf16.mxu0 %v4745_v48  ;;  %4346 = vmatpush3.bf16.msra.mxu0 %v4743_v40 }
 0x101   : > { %v5519_v58 = vadd.f32 %v3870_v56, %v3869_v51  ;;  %v3910_v59 = vpop.f32.mrf.mxu1  ;;  %v2604_v37 = vadd.f32 %v5504_v47, %v2539_v34  ;;  %4371 = vmatpush3.bf16.msra.mxu1 %v4743_v40  ;;  %4347 = vmatprep.subr.bf16.mxu0 %v4744_v53  ;;  %v772_v47 = vpop.permute.xlu0 %771 }
 0x102   : > { %v5522_v61 = vadd.f32 %v3910_v59, %v3909_v54  ;;  %v3872_v62 = vpop.f32.mrf.mxu0  ;;  %3265 = vmatmul.mubr.bf16.gmra.mxu1 %v4742_v46  ;;  %4364 = vmatprep.subr.bf16.mxu1 %v4744_v53  ;;  %v777_v11 = vpop.permute.xlu1 %776 }
 0x103   : > { %v3912_v0 = vpop.f32.mrf.mxu1  ;;  %4353 = vmatprep.mubr.bf16.mxu1 %v4746_v50 }
 0x104   : > { %v3873_v2 = vpop.f32.mrf.mxu0  ;;  %4348 = vmatpush3.bf16.msra.mxu0 %v4744_v53 }
 0x105   : > { %v5529_v5 = vadd.f32 %v3873_v2, %v3872_v62  ;;  %v3913_v6 = vpop.f32.mrf.mxu1  ;;  %v4747_v2 = vld [vmem:[%s4911_s6 + $0x128] ss:$100 sps:$4 sm:$0xff]   ;;  %4372 = vmatpush3.bf16.msra.mxu1 %v4744_v53  ;;  %s3499_s6 = sshll.u32 %s5767_s23, 2 }
 0x106   : > { %v5533_v9 = vadd.f32 %v3913_v6, %v3912_v0  ;;  %v3875_v16 = vpop.f32.mrf.mxu0  ;;  %v2544_v0 = vadd.f32 %v5519_v58, %v772_v47  ;;  %v787_v33 = vpop.permute.xlu1 %786  ;;  %s234_s30 = scalar_lea.vmem %s5739_s3, %s3499_s6 }
 0x107   : > { %v3915_v17 = vpop.f32.mrf.mxu1  ;;  %v2547_v14 = vadd.f32 %v5529_v5, %v777_v11  ;;  %4350 = vmatmul.mubr.bf16.vlgmr.msra.gmra.mxu0 %v4747_v2 }
 0x108   : > { %v3876_v19 = vpop.f32.mrf.mxu0  ;;  %v2609_v6 = vadd.f32 %v5522_v61, %v2544_v0 }
 0x109   : > { %v3916_v21 = vpop.f32.mrf.mxu1  ;;  %v5547_v22 = vadd.f32 %v3876_v19, %v3875_v16  ;;  %v2612_v10 = vadd.f32 %v5533_v9, %v2547_v14 }
 0x10a   : > { %v5549_v24 = vadd.f32 %v3916_v21, %v3915_v17  ;;  %v3878_v28 = vpop.f32.mrf.mxu0  ;;  %4354 = vmatmul.mubr.bf16.vlgmr.msra.gmra.mxu1 %v4748_v4 }
 0x10b   : > { %v3918_v20 = vpop.f32.mrf.mxu1 }
 0x10c   : > { %v3879_v31 = vpop.f32.mrf.mxu0 }
 0x10d   : > { %v3919_v32 = vpop.f32.mrf.mxu1  ;;  %v5559_v35 = vadd.f32 %v3879_v31, %v3878_v28  ;;  %v782_v28 = vpop.permute.xlu0 %781 }
 0x10e   : > { %v5561_v36 = vadd.f32 %v3919_v32, %v3918_v20  ;;  %v3937_v39 = vpop.f32.mrf.mxu0  ;;  %v2552_v5 = vadd.f32 %v5547_v22, %v782_v28 }
 0x10f   : > { %v3977_v45 = vpop.f32.mrf.mxu1 }
 0x110   : > { %v3938_v49 = vpop.f32.mrf.mxu0  ;;  %v2617_v31 = vadd.f32 %v5549_v24, %v2552_v5 }
 0x111   : > { %v3939_v51 = vadd.f32 %v3938_v49, %v3937_v39  ;;  %v3978_v52 = vpop.f32.mrf.mxu1  ;;  %v2555_v39 = vadd.f32 %v5559_v35, %v787_v33 }
 0x112   : > { %v3979_v54 = vadd.f32 %v3978_v52, %v3977_v45  ;;  %v3940_v55 = vpop.f32.mrf.mxu0 }
 0x113   : > { %v2658_v56 = vadd.f32 %v3939_v51, %v5541_v15  ;;  %v3980_v44 = vpop.f32.mrf.mxu1  ;;  %v2620_v43 = vadd.f32 %v5561_v36, %v2555_v39 }
 0x114   : > { %v3941_v57 = vpop.f32.mrf.mxu0 }
 0x115   : > { %v5578_v59 = vadd.f32 %v3979_v54, %v2658_v56  ;;  %v3942_v60 = vadd.f32 %v3941_v57, %v3940_v55  ;;  %v3981_v62 = vpop.f32.mrf.mxu1 }
 0x116   : > { %v3982_v63 = vadd.f32 %v3981_v62, %v3980_v44  ;;  %v3943_v3 = vpop.f32.mrf.mxu0 }
 0x117   : > { %v2661_v1 = vadd.f32 %v3942_v60, %v2596_v27  ;;  %v3983_v8 = vpop.f32.mrf.mxu1 }
 0x118   : > { %v3944_v12 = vpop.f32.mrf.mxu0 }
 0x119   : > { %v5584_v7 = vadd.f32 %v3982_v63, %v2661_v1  ;;  %v3945_v15 = vadd.f32 %v3944_v12, %v3943_v3  ;;  %v3984_v16 = vpop.f32.mrf.mxu1 }
 0x11a   : > { %v3985_v17 = vadd.f32 %v3984_v16, %v3983_v8  ;;  %v3946_v58 = vpop.f32.mrf.mxu0 }
 0x11b   : > { %v2666_v18 = vadd.f32 %v3945_v15, %v2601_v41  ;;  %v3986_v19 = vpop.f32.mrf.mxu1 }
 0x11c   : > { %v3947_v21 = vpop.f32.mrf.mxu0 }
 0x11d   : > { %v5588_v61 = vadd.f32 %v3985_v17, %v2666_v18  ;;  %v3948_v13 = vadd.f32 %v3947_v21, %v3946_v58  ;;  %v3987_v25 = vpop.f32.mrf.mxu1 }
 0x11e   : > { %v3988_v26 = vadd.f32 %v3987_v25, %v3986_v19  ;;  %v3949_v29 = vpop.f32.mrf.mxu0 }
 0x11f   : > { %v2669_v27 = vadd.f32 %v3948_v13, %v2604_v37  ;;  %v3989_v30 = vpop.f32.mrf.mxu1 }
 0x120   : > { %v3950_v32 = vpop.f32.mrf.mxu0 }
 0x121   : > { %v5591_v20 = vadd.f32 %v3988_v26, %v2669_v27  ;;  %v3990_v9 = vpop.f32.mrf.mxu1  ;;  %v3951_v23 = vadd.f32 %v3950_v32, %v3949_v29 }
 0x122   : > { %v3991_v38 = vadd.f32 %v3990_v9, %v3989_v30  ;;  %v3952_v40 = vpop.f32.mrf.mxu0 }
 0x123   : > { %v3992_v41 = vpop.f32.mrf.mxu1  ;;  %v2674_v42 = vadd.f32 %v3951_v23, %v2609_v6 }
 0x124   : > { %v3953_v45 = vpop.f32.mrf.mxu0 }
 0x125   : > { %v3993_v22 = vpop.f32.mrf.mxu1  ;;  %v2739_v46 = vadd.f32 %v3991_v38, %v2674_v42  ;;  %v3954_v48 = vadd.f32 %v3953_v45, %v3952_v40 }
 0x126   : > { %v3994_v34 = vadd.f32 %v3993_v22, %v3992_v41  ;;  %v3955_v50 = vpop.f32.mrf.mxu0 }
 0x127   : > { %v2677_v49 = vadd.f32 %v3954_v48, %v2612_v10  ;;  %v3995_v51 = vpop.f32.mrf.mxu1 }
 0x128   : > { %v3956_v52 = vpop.f32.mrf.mxu0 }
 0x129   : > { %v2742_v24 = vadd.f32 %v3994_v34, %v2677_v49  ;;  %v3957_v53 = vadd.f32 %v3956_v52, %v3955_v50  ;;  %v3996_v37 = vpop.f32.mrf.mxu1 }
 0x12a   : > { %v3997_v54 = vadd.f32 %v3996_v37, %v3995_v51  ;;  %v3958_v55 = vpop.f32.mrf.mxu0 }
 0x12b   : > { %v2682_v35 = vadd.f32 %v3957_v53, %v2617_v31  ;;  %v3998_v56 = vpop.f32.mrf.mxu1 }
 0x12c   : > { %v3959_v44 = vpop.f32.mrf.mxu0 }
 0x12d   : > { %v2747_v57 = vadd.f32 %v3997_v54, %v2682_v35  ;;  %v3960_v60 = vadd.f32 %v3959_v44, %v3958_v55  ;;  %v3999_v36 = vpop.f32.mrf.mxu1 }
 0x12e   : > { %v4000_v62 = vadd.f32 %v3999_v36, %v3998_v56  ;;  %v4017_v0 = vpop.f32.mrf.mxu0 }
 0x12f   : > { %v2685_v47 = vadd.f32 %v3960_v60, %v2620_v43  ;;  %v4057_v1 = vpop.f32.mrf.mxu1 }
 0x130   : > { %v4018_v2 = vpop.f32.mrf.mxu0 }
 0x131   : > { %v5596_v63 = vadd.f32 %v4000_v62, %v2685_v47  ;;  %v4019_v3 = vadd.f32 %v4018_v2, %v4017_v0  ;;  %v4058_v4 = vpop.f32.mrf.mxu1 }
 0x132   : > { %v4059_v6 = vadd.f32 %v4058_v4, %v4057_v1  ;;  %v4020_v8 = vpop.f32.mrf.mxu0 }
 0x133   : > { %v2788_v11 = vadd.f32 %v4019_v3, %v5578_v59  ;;  %v4060_v12 = vpop.f32.mrf.mxu1 }
 0x134   : > { %v4021_v14 = vpop.f32.mrf.mxu0 }
 0x135   : > { %v2853_v15 = vadd.f32 %v4059_v6, %v2788_v11  ;;  %v4022_v16 = vadd.f32 %v4021_v14, %v4020_v8  ;;  %v4061_v17 = vpop.f32.mrf.mxu1 }
 0x136   : > { %v4062_v58 = vadd.f32 %v4061_v17, %v4060_v12  ;;  %v4023_v19 = vpop.f32.mrf.mxu0 }
 0x137   : > { %v2791_v10 = vadd.f32 %v4022_v16, %v5584_v7  ;;  %v4063_v21 = vpop.f32.mrf.mxu1 }
 0x138   : > { %v4024_v13 = vpop.f32.mrf.mxu0 }
 0x139   : > { %v5600_v18 = vadd.f32 %v4062_v58, %v2791_v10  ;;  %v4064_v25 = vpop.f32.mrf.mxu1  ;;  %v4025_v26 = vadd.f32 %v4024_v13, %v4023_v19 }
 0x13a   : > { %v4065_v27 = vadd.f32 %v4064_v25, %v4063_v21  ;;  %v4026_v28 = vpop.f32.mrf.mxu0 }
 0x13b   : > { %v4066_v5 = vpop.f32.mrf.mxu1  ;;  %v2796_v59 = vadd.f32 %v4025_v26, %v5588_v61 }
 0x13c   : > { %v4027_v29 = vpop.f32.mrf.mxu0 }
 0x13d   : > { %v4067_v30 = vpop.f32.mrf.mxu1  ;;  %v2861_v31 = vadd.f32 %v4065_v27, %v2796_v59  ;;  %v4028_v32 = vadd.f32 %v4027_v29, %v4026_v28 }
 0x13e   : > { %v4068_v9 = vadd.f32 %v4067_v30, %v4066_v5  ;;  %v4029_v23 = vpop.f32.mrf.mxu0 }
 0x13f   : > { %v2799_v33 = vadd.f32 %v4028_v32, %v5591_v20  ;;  %v4069_v38 = vpop.f32.mrf.mxu1 }
 0x140   : > { %v4030_v39 = vpop.f32.mrf.mxu0 }
 0x141   : > { %v5604_v7 = vadd.f32 %v4068_v9, %v2799_v33  ;;  %v4031_v40 = vadd.f32 %v4030_v39, %v4029_v23  ;;  %v4070_v41 = vpop.f32.mrf.mxu1 }
 0x142   : > { %v4071_v42 = vadd.f32 %v4070_v41, %v4069_v38  ;;  %v4032_v43 = vpop.f32.mrf.mxu0 }
 0x143   : > { %v2804_v45 = vadd.f32 %v4031_v40, %v2739_v46  ;;  %v4072_v22 = vpop.f32.mrf.mxu1 }
 0x144   : > { %v4033_v48 = vpop.f32.mrf.mxu0 }
 0x145   : > { %v2869_v61 = vadd.f32 %v4071_v42, %v2804_v45  ;;  %v4034_v34 = vadd.f32 %v4033_v48, %v4032_v43  ;;  %v4073_v49 = vpop.f32.mrf.mxu1 }
 0x146   : > { %v4074_v50 = vadd.f32 %v4073_v49, %v4072_v22  ;;  %v4035_v20 = vpop.f32.mrf.mxu0 }
 0x147   : > { %v2807_v51 = vadd.f32 %v4034_v34, %v2742_v24  ;;  %v4075_v53 = vpop.f32.mrf.mxu1 }
 0x148   : > { %v4036_v37 = vpop.f32.mrf.mxu0 }
 0x149   : > { %v5606_v52 = vadd.f32 %v4074_v50, %v2807_v51  ;;  %v4037_v54 = vadd.f32 %v4036_v37, %v4035_v20  ;;  %v4076_v55 = vpop.f32.mrf.mxu1 }
 0x14a   : > { %v4077_v35 = vadd.f32 %v4076_v55, %v4075_v53  ;;  %v4038_v56 = vpop.f32.mrf.mxu0 }
 0x14b   : > { %v2812_v44 = vadd.f32 %v4037_v54, %v2747_v57  ;;  %v4078_v60 = vpop.f32.mrf.mxu1 }
 0x14c   : > { %v4039_v36 = vpop.f32.mrf.mxu0 }
 0x14d   : > { %v2877_v46 = vadd.f32 %v4077_v35, %v2812_v44  ;;  %v4040_v62 = vadd.f32 %v4039_v36, %v4038_v56  ;;  %v4079_v47 = vpop.f32.mrf.mxu1 }
 0x14e   : > { %v4080_v0 = vadd.f32 %v4079_v47, %v4078_v60  ;;  %v4097_v24 = vpop.f32.mrf.mxu0 }
 0x14f   : > { %v2815_v1 = vadd.f32 %v4040_v62, %v5596_v63  ;;  %v4137_v3 = vpop.f32.mrf.mxu1 }
 0x150   : > { %v4098_v4 = vpop.f32.mrf.mxu0 }
 0x151   : > { %v5609_v2 = vadd.f32 %v4080_v0, %v2815_v1  ;;  %v4099_v6 = vadd.f32 %v4098_v4, %v4097_v24  ;;  %v4138_v8 = vpop.f32.mrf.mxu1 }
 0x152   : > { %v4139_v11 = vadd.f32 %v4138_v8, %v4137_v3  ;;  %v4100_v12 = vpop.f32.mrf.mxu0 }
 0x153   : > { %v2918_v14 = vadd.f32 %v4099_v6, %v2853_v15  ;;  %v4140_v16 = vpop.f32.mrf.mxu1 }
 0x154   : > { %v4101_v57 = vpop.f32.mrf.mxu0 }
 0x155   : > { %v5611_v17 = vadd.f32 %v4139_v11, %v2918_v14  ;;  %v4102_v58 = vadd.f32 %v4101_v57, %v4100_v12  ;;  %v4141_v10 = vpop.f32.mrf.mxu1 }
 0x156   : > { %v4142_v19 = vadd.f32 %v4141_v10, %v4140_v16  ;;  %v4103_v13 = vpop.f32.mrf.mxu0 }
 0x157   : > { %v2921_v21 = vadd.f32 %v4102_v58, %v5600_v18  ;;  %v4143_v25 = vpop.f32.mrf.mxu1 }
 0x158   : > { %v4104_v26 = vpop.f32.mrf.mxu0 }
 0x159   : > { %v5614_v63 = vadd.f32 %v4142_v19, %v2921_v21  ;;  %v4105_v27 = vadd.f32 %v4104_v26, %v4103_v13  ;;  %v4144_v28 = vpop.f32.mrf.mxu1 }
 0x15a   : > { %v4145_v5 = vadd.f32 %v4144_v28, %v4143_v25  ;;  %v4106_v59 = vpop.f32.mrf.mxu0 }
 0x15b   : > { %v2926_v29 = vadd.f32 %v4105_v27, %v2861_v31  ;;  %v4146_v15 = vpop.f32.mrf.mxu1 }
 0x15c   : > { %v4107_v30 = vpop.f32.mrf.mxu0 }
 0x15d   : > { %v5616_v32 = vadd.f32 %v4145_v5, %v2926_v29  ;;  %v4108_v9 = vadd.f32 %v4107_v30, %v4106_v59  ;;  %v4147_v33 = vpop.f32.mrf.mxu1 }
 0x15e   : > { %v4148_v23 = vadd.f32 %v4147_v33, %v4146_v15  ;;  %v4109_v39 = vpop.f32.mrf.mxu0 }
 0x15f   : > { %v2929_v38 = vadd.f32 %v4108_v9, %v5604_v7  ;;  %v4149_v40 = vpop.f32.mrf.mxu1 }
 0x160   : > { %v4110_v41 = vpop.f32.mrf.mxu0 }
 0x161   : > { %v5619_v18 = vadd.f32 %v4148_v23, %v2929_v38  ;;  %v4150_v42 = vpop.f32.mrf.mxu1  ;;  %v4111_v43 = vadd.f32 %v4110_v41, %v4109_v39 }
 0x162   : > { %v4151_v45 = vadd.f32 %v4150_v42, %v4149_v40  ;;  %v4112_v22 = vpop.f32.mrf.mxu0 }
 0x163   : > { %v4152_v48 = vpop.f32.mrf.mxu1  ;;  %v2934_v31 = vadd.f32 %v4111_v43, %v2869_v61 }
 0x164   : > { %v4113_v34 = vpop.f32.mrf.mxu0 }
 0x165   : > { %v4153_v49 = vpop.f32.mrf.mxu1  ;;  %v5621_v50 = vadd.f32 %v4151_v45, %v2934_v31  ;;  %v4114_v51 = vadd.f32 %v4113_v34, %v4112_v22 }
 0x166   : > { %v4154_v20 = vadd.f32 %v4153_v49, %v4152_v48  ;;  %v4115_v7 = vpop.f32.mrf.mxu0 }
 0x167   : > { %v2937_v53 = vadd.f32 %v4114_v51, %v5606_v52  ;;  %v4155_v54 = vpop.f32.mrf.mxu1 }
 0x168   : > { %v4116_v55 = vpop.f32.mrf.mxu0 }
 0x169   : > { %v5624_v37 = vadd.f32 %v4154_v20, %v2937_v53  ;;  %v4117_v35 = vadd.f32 %v4116_v55, %v4115_v7  ;;  %v4156_v56 = vpop.f32.mrf.mxu1 }
 0x16a   : > { %v4118_v44 = vpop.f32.mrf.mxu0  ;;  %v4157_v36 = vadd.f32 %v4156_v56, %v4155_v54 }
 0x16b   : > { %v2942_v60 = vadd.f32 %v4117_v35, %v2877_v46  ;;  %v5626_v62 = vpop.f32.mrf.mxu1 }
 0x16c   : > { %v4119_v47 = vpop.f32.mrf.mxu0 }
 0x16d   : > { %v5628_v61 = vadd.f32 %v4157_v36, %v2942_v60  ;;  %v5630_v0 = vpop.f32.mrf.mxu1  ;;  %v4120_v56 = vadd.f32 %v4119_v47, %v4118_v44 }
 0x16e   : > { %v4177_v1 = vpop.f32.mrf.mxu0 }
 0x16f   : > { %v5632_v24 = vpop.f32.mrf.mxu1 }
 0x170   : > { %v4178_v52 = vpop.f32.mrf.mxu0 }
 0x171   : > { %v5634_v3 = vpop.f32.mrf.mxu1  ;;  %v4179_v60 = vadd.f32 %v4178_v52, %v4177_v1  ;;  %v4160_v52 = vadd.f32 %v5630_v0, %v5626_v62 }
 0x172   : > { %v4180_v4 = vpop.f32.mrf.mxu0 }
 0x173   : > { %v5636_v6 = vpop.f32.mrf.mxu1 }
 0x174   : > { %v4181_v8 = vpop.f32.mrf.mxu0 }
 0x175   : > { %v5638_v11 = vpop.f32.mrf.mxu1 }
 0x176   : > { %v4183_v46 = vpop.f32.mrf.mxu0 }
 0x177   : > { %v5640_v12 = vpop.f32.mrf.mxu1 }
 0x178   : > { %v4184_v14 = vpop.f32.mrf.mxu0 }
 0x179   : > { %v4224_v16 = vpop.f32.mrf.mxu1 }
 0x17a   : > { %v4186_v57 = vpop.f32.mrf.mxu0 }
 0x17b   : > { %v5642_v58 = vpop.f32.mrf.mxu1 }
 0x17c   : > { %v4187_v10 = vpop.f32.mrf.mxu0 }
 0x17d   : > { %v5644_v19 = vpop.f32.mrf.mxu1 }
 0x17e   : > { %v4189_v21 = vpop.f32.mrf.mxu0 }
 0x17f   : > { %v5646_v13 = vpop.f32.mrf.mxu1 }
 0x180   : > { %v4190_v25 = vpop.f32.mrf.mxu0 }
 0x181   : > { %v5648_v26 = vpop.f32.mrf.mxu1  ;;  %v4191_v47 = vadd.f32 %v4190_v25, %v4189_v21 }
 0x182   : > { %v4192_v27 = vpop.f32.mrf.mxu0 }
 0x183   : > { %v5650_v28 = vpop.f32.mrf.mxu1 }
 0x184   : > { %v4193_v5 = vpop.f32.mrf.mxu0 }
 0x185   : > { %v5652_v59 = vpop.f32.mrf.mxu1 }
 0x186   : > { %5740 = vst [vmem:[#allocation2_spill] sm:$0xff] %v5652_v59  ;;  %v4195_v29 = vpop.f32.mrf.mxu0 }
 0x187   : > { %v4235_v15 = vpop.f32.mrf.mxu1 }
 0x188   : > { %v4196_v30 = vpop.f32.mrf.mxu0 }
 0x189   : > { %v4236_v9 = vpop.f32.mrf.mxu1 }
 0x18a   : > { %v4198_v33 = vpop.f32.mrf.mxu0  ;;  %v4237_v62 = vadd.f32 %v4236_v9, %v4235_v15 }
 0x18b   : > { %v5654_v23 = vpop.f32.mrf.mxu1 }
 0x18c   : > { %v4199_v38 = vpop.f32.mrf.mxu0 }
 0x18d   : > { %v5656_v39 = vpop.f32.mrf.mxu1 }
 0x18e   : > { %v4257_v40 = vpop.f32.mrf.mxu0 }
 0x18f   : > { %v5658_v41 = vpop.f32.mrf.mxu1 }
 0x190   : > { %5741 = vst [vmem:[#allocation3_spill] sm:$0xff] %v5658_v41  ;;  %v4258_v42 = vpop.f32.mrf.mxu0  ;;  %v4197_v41 = vadd.f32 %v4196_v30, %v4195_v29  ;;  %v4228_v30 = vadd.f32 %v5644_v19, %v5642_v58  ;;  %v5751_v19 = vld [vmem:[#allocation2_spill] sm:$0xff] }
 0x191   : > { %v5660_v43 = vpop.f32.mrf.mxu1 }
 0x192   : > { %5742 = vst [vmem:[#allocation4_spill] sm:$0xff] %v5660_v43  ;;  %v5662_v45 = vpop.f32.mrf.mxu0  ;;  %v4185_v43 = vadd.f32 %v4184_v14, %v4183_v46  ;;  %v4194_v14 = vadd.f32 %v4193_v5, %v4192_v27  ;;  %v4231_v27 = vadd.f32 %v5648_v26, %v5646_v13  ;;  %v4259_v5 = vadd.f32 %v4258_v42, %v4257_v40 }
 0x193   : > { %5743 = vst [vmem:[#allocation5_spill] sm:$0xff] %v5662_v45  ;;  %v5664_v22 = vpop.f32.mrf.mxu1  ;;  %v3048_v45 = vadd.f32 %v4179_v60, %v5611_v17  ;;  %v4222_v17 = vadd.f32 %v5638_v11, %v5636_v6 }
 0x194   : > { %5744 = vst [vmem:[#allocation6_spill] sm:$0xff] %v5664_v22  ;;  %v5666_v48 = vpop.f32.mrf.mxu0  ;;  %v4182_v22 = vadd.f32 %v4181_v8, %v4180_v4  ;;  %v3056_v44 = vadd.f32 %v4185_v43, %v5616_v32  ;;  %v4219_v4 = vadd.f32 %v5634_v3, %v5632_v24  ;;  %v3072_v8 = vadd.f32 %v4197_v41, %v5628_v61 }
 0x195   : > { %5745 = vst [vmem:[#allocation7_spill] sm:$0xff] %v5666_v48  ;;  %v5668_v31 = vpop.f32.mrf.mxu1  ;;  %v3064_v61 = vadd.f32 %v4191_v47, %v5621_v50  ;;  %v4240_v50 = vadd.f32 %v5656_v39, %v5654_v23 }
 0x196   : > { %5746 = vst [vmem:[#allocation8_spill] sm:$0xff] %v5668_v31  ;;  %v4263_v34 = vpop.f32.mrf.mxu0  ;;  %v3137_v6 = vadd.f32 %v4237_v62, %v3072_v8 }
 0x197   : > { %v5670_v49 = vpop.f32.mrf.mxu1  ;;  %v3129_v58 = vadd.f32 %v4231_v27, %v3064_v61  ;;  %v5756_v47 = vld [vmem:[#allocation3_spill] sm:$0xff] }
 0x198   : > { %5747 = vst [vmem:[#allocation9_spill] sm:$0xff] %v5670_v49  ;;  %v4264_v51 = vpop.f32.mrf.mxu0 }
 0x199   : > { %v5672_v20 = vpop.f32.mrf.mxu1  ;;  %v4265_v3 = vadd.f32 %v4264_v51, %v4263_v34 }
 0x19a   : > { %5748 = vst [vmem:[#allocation10_spill] sm:$0xff] %v5672_v20  ;;  %v4266_v53 = vpop.f32.mrf.mxu0  ;;  %v2945_v20 = vadd.f32 %v4120_v56, %v5609_v2  ;;  %v4200_v2 = vadd.f32 %v4199_v38, %v4198_v33 }
 0x19b   : > { %v5674_v7 = vpop.f32.mrf.mxu1 }
 0x19c   : > { %5749 = vst [vmem:[#allocation11_spill] sm:$0xff] %v5674_v7  ;;  %v4267_v54 = vpop.f32.mrf.mxu0  ;;  %v4188_v7 = vadd.f32 %v4187_v10, %v4186_v57  ;;  %v3010_v57 = vadd.f32 %v4160_v52, %v2945_v20  ;;  %v3113_v10 = vadd.f32 %v4219_v4, %v3048_v45  ;;  %v4234_v45 = vadd.f32 %v5751_v19, %v5650_v28  ;;  %v5753_v34 = vld [vmem:[#allocation7_spill] sm:$0xff]  ;;  %v5757_v52 = vld [vmem:[#allocation4_spill] sm:$0xff] }
 0x19d   : > { %v5676_v55 = vpop.f32.mrf.mxu1  ;;  %v4268_v15 = vadd.f32 %v4267_v54, %v4266_v53  ;;  %v4299_v4 = vadd.f32 %v5757_v52, %v5756_v47  ;;  %v5761_v62 = vld [vmem:[#allocation8_spill] sm:$0xff] }
 0x19e   : > { %5750 = vst [vmem:[#allocation12_spill] sm:$0xff] %v5676_v55  ;;  %v3051_v55 = vadd.f32 %v4182_v22, %v5614_v63  ;;  %v4225_v63 = vadd.f32 %v4224_v16, %v5640_v12  ;;  %v3059_v21 = vadd.f32 %v4188_v7, %v5619_v18  ;;  %v3075_v11 = vadd.f32 %v4200_v2, %v3010_v57  ;;  %v5752_v22 = vld [vmem:[#allocation5_spill] sm:$0xff] }
 0x19f   : > { %v3067_v18 = vadd.f32 %v4194_v14, %v5624_v37  ;;  %v4262_v51 = vadd.f32 %v5753_v34, %v5752_v22  ;;  %v3178_v54 = vadd.f32 %v4259_v5, %v3113_v10  ;;  %v5754_v23 = vld [vmem:[#allocation9_spill] sm:$0xff] }
 0x1a0   : > { %v3116_v25 = vadd.f32 %v4222_v17, %v3051_v55  ;;  %v3121_v24 = vadd.f32 %v4225_v63, %v3056_v44  ;;  %v3124_v33 = vadd.f32 %v4228_v30, %v3059_v21  ;;  %v3140_v37 = vadd.f32 %v4240_v50, %v3075_v11  ;;  %v5760_v21 = vld [vmem:[#allocation6_spill] sm:$0xff] }
 0x1a1   : > { %v3132_v7 = vadd.f32 %v4234_v45, %v3067_v18  ;;  %v5755_v39 = vld [vmem:[#allocation10_spill] sm:$0xff]  ;;  %v3243_v61 = vadd.f32 %v4299_v4, %v3178_v54 }
 0x1a2   : > { %v3186_v13 = vadd.f32 %v4265_v3, %v3121_v24  ;;  %v3189_v55 = vadd.f32 %v4268_v15, %v3124_v33  ;;  %v3181_v8 = vadd.f32 %v4262_v51, %v3116_v25 }
 0x1a3   : > { %v5758_v2 = vld [vmem:[#allocation11_spill] sm:$0xff] }
 0x1b4   : > { %v4269_v35 = vpop.f32.mrf.mxu0 }
 0x1b6   : > { %v4270_v31 = vpop.f32.mrf.mxu0 }
 0x1b7   : > { %v4271_v38 = vadd.f32 %v4270_v31, %v4269_v35  ;;  %v4305_v31 = vadd.f32 %v5755_v39, %v5754_v23 }
 0x1b8   : > { %v4272_v49 = vpop.f32.mrf.mxu0 }
 0x1b9   : > { %v3194_v35 = vadd.f32 %v4271_v38, %v3129_v58  ;;  %v3251_v17 = vadd.f32 %v4305_v31, %v3186_v13 }
 0x1ba   : > { %v5678_v36 = vpop.f32.mrf.mxu1  ;;  %v4273_v1 = vpop.f32.mrf.mxu0 }
 0x1bb   : > { %v4274_v40 = vadd.f32 %v4273_v1, %v4272_v49  ;;  %v5759_v49 = vld [vmem:[#allocation12_spill] sm:$0xff] }
 0x1bc   : > { %v5680_v48 = vpop.f32.mrf.mxu1  ;;  %v4308_v1 = vadd.f32 %v5759_v49, %v5758_v2 }
 0x1bd   : > { %v4311_v14 = vadd.f32 %v5680_v48, %v5678_v36 }
 0x1be   : > { %v5684_v59 = vpop.f32.mrf.mxu1  ;;  %v4275_v32 = vpop.f32.mrf.mxu0 }
 0x1c0   : > { %v5693_v46 = vpop.f32.mrf.mxu1  ;;  %v4276_v29 = vpop.f32.mrf.mxu0 }
 0x1c1   : > { %v4277_v12 = vadd.f32 %v4276_v29, %v4275_v32  ;;  %v3197_v32 = vadd.f32 %v4274_v40, %v3132_v7  ;;  %v3254_v29 = vadd.f32 %v4308_v1, %v3189_v55  ;;  %v4314_v25 = vadd.f32 %v5693_v46, %v5684_v59 }
 0x1c2   : > { %v4315_v0 = vpop.f32.mrf.mxu1  ;;  %v4278_v9 = vpop.f32.mrf.mxu0 }
 0x1c3   : > { %v3202_v41 = vadd.f32 %v4277_v12, %v3137_v6  ;;  %v3259_v6 = vadd.f32 %v4311_v14, %v3194_v35  ;;  %v3262_v15 = vadd.f32 %v4314_v25, %v3197_v32 }
 0x1c4   : > { %v4316_v16 = vpop.f32.mrf.mxu1  ;;  %v4279_v26 = vpop.f32.mrf.mxu0 }
 0x1c5   : > { %v4317_v42 = vadd.f32 %v4316_v16, %v4315_v0  ;;  %v4280_v20 = vadd.f32 %v4279_v26, %v4278_v9  ;;  %v4302_v0 = vadd.f32 %v5761_v62, %v5760_v21 }
 0x1c6   : > { %v4318_v43 = vpop.f32.mrf.mxu1 }
 0x1c7   : > { %v3205_v56 = vadd.f32 %v4280_v20, %v3140_v37  ;;  %v4351_v28 = vpop.f32.mrf.mxu0  ;;  %v3267_v44 = vadd.f32 %v4317_v42, %v3202_v41  ;;  %v3246_v36 = vadd.f32 %v4302_v0, %v3181_v8 }
 0x1c8   : > { %v4319_v53 = vpop.f32.mrf.mxu1  ;;  %v3316_v24 = vadd.f32 %v4351_v28, %v3251_v17 }
 0x1c9   : > { %v4320_v60 = vadd.f32 %v4319_v53, %v4318_v43  ;;  %v3307_v57 = vpop.f32.mrf.mxu0 }
 0x1ca   : > { %v4355_v63 = vpop.f32.mrf.mxu1  ;;  %v3308_v12 = vadd.f32 %v3307_v57, %v3243_v61  ;;  %v3340_v9 = vmax.f32 %v3316_v24, 0.0 }
 0x1cb   : > { %v3270_v10 = vadd.f32 %v4320_v60, %v3205_v56  ;;  %v3332_v30 = vadd.f32 %v4355_v63, %v3267_v44  ;;  %v4352_v11 = vpop.f32.mrf.mxu0 }
 0x1cc   : > { %v3323_v3 = vpop.f32.mrf.mxu1  ;;  %v3319_v16 = vadd.f32 %v4352_v11, %v3254_v29  ;;  %v3338_v43 = vmax.f32 %v3308_v12, 0.0 }
 0x1cd   : > { %v3324_v27 = vadd.f32 %v3323_v3, %v3259_v6  ;;  %v3310_v5 = vpop.f32.mrf.mxu0  ;;  %v3344_v41 = vmax.f32 %v3332_v30, 0.0 }
 0x1ce   : > { %v4356_v48 = vpop.f32.mrf.mxu1  ;;  %v3341_v33 = vmax.f32 %v3319_v16, 0.0  ;;  %v3311_v50 = vadd.f32 %v3310_v5, %v3246_v36 }
 0x1cf   : > { %v3335_v18 = vadd.f32 %v4356_v48, %v3270_v10  ;;  %v3342_v45 = vmax.f32 %v3324_v27, 0.0 }
 0x1d0   : > { %v3326_v38 = vpop.f32.mrf.mxu1  ;;  %v3826_v58 = vpack.c.bf16 %v3341_v33, %v3340_v9  ;;  %v3339_v19 = vmax.f32 %v3311_v50, 0.0 }
 0x1d1   : > { %v3345_v59 = vmax.f32 %v3335_v18, 0.0  ;;  %v3327_v46 = vadd.f32 %v3326_v38, %v3262_v15 }
 0x1d2   : > { %3838 = vst [vmem:[%s234_s30 + $0x8] sm:$0xff] %v3826_v58   ;;  %v3821_v51 = vpack.c.bf16 %v3339_v19, %v3338_v43 }
 0x1d3   : > { %v3836_v22 = vpack.c.bf16 %v3345_v59, %v3344_v41  ;;  %v3343_v34 = vmax.f32 %v3327_v46, 0.0 }
 0x1d4   : > { %3822 = vst [vmem:[%s234_s30] sm:$0xff] %v3821_v51  }
 0x1d5   : > { %3840 = vst [vmem:[%s234_s30 + $0x18] sm:$0xff] %v3836_v22   ;;  %v3831_v13 = vpack.c.bf16 %v3343_v34, %v3342_v45 }
 0x1d7   : > { %3839 = vst [vmem:[%s234_s30 + $0x10] sm:$0xff] %v3831_v13  }
 0x1d8 PF: > { %s13_s14 = sadd.s32 1, %s4771_s14   ;;  %s5762_s12 = smov %s4767_s13 }
 0x1d9   : > { %p10_p5 = scmp.ge.s32.totalorder %s13_s14, 4   ;;  %s5763_s13 = smov %s5765_s15 }
 0x1db   :  { %12 = sbr.rel (!%p10_p5) target bundleno = 2 (0x2), region = 68 }

// kernel: tile.18
= control target key start
LH: loop header
LB: loop body
LE: loop exit
PB: predicated region body
PF: predicated region fallthrough
CT: control target
= control target key end

     0   :  { %s22_s0 = inlined_call_operand.vmem [shape: f32[64], index: 0, kind: input, shape index: {}]   ;;  %s23_s1 = inlined_call_operand.vmem [shape: f32[4,64], index: 1, kind: output, shape index: {}]  }
   0x1   :  { %v4_v0 = vld [vmem:[%s22_s0] ss:$0 sm:$0xff] }
   0x2   :  { %5 = vst [vmem:[%s23_s1] sm:$0xf] %v4_v0 }

// kernel: forward.9
= control target key start
LH: loop header
LB: loop body
LE: loop exit
PB: predicated region body
PF: predicated region fallthrough
CT: control target
= control target key end

     0   :  { %s2846_s12 = smov 0   ;;  %s2848_s13 = smov 0   ;;  %s3310_s0 = inlined_call_operand.vmem [shape: bf16[256,1152], index: 0, kind: input, shape index: {}]   ;;  %s3311_s1 = inlined_call_operand.vmem [shape: bf16[1152,128], index: 1, kind: input, shape index: {}]   ;;  %s3312_s2 = inlined_call_operand.vmem [shape: f32[256,1], index: 2, kind: input, shape index: {}]   ;;  %s3313_s3 = inlined_call_operand.vmem [shape: bf16[256,128], index: 3, kind: output, shape index: {}]  }
   0x1   :  { %s2850_s14 = smov 0  }
   0x2 LB: > { %s25_s15 = sadd.s32 1, %s2819_s13  ;;  %p2045_p0 = scmp.ge.s32.totalorder %s2823_s14, 1  ;;  %s2823_s14 = sphi %s2850_s14, %s13_s14   ;;  %s2819_s13 = sphi %s2848_s13, %s3345_s13   ;;  %s2815_s12 = sphi %s2846_s12, %s3344_s12  }
   0x3   : > { %p27_p1 = scmp.ge.s32.totalorder %s25_s15, 2  ;;  %p173_p2 = scmp.lt.s32.totalorder %s2823_s14, 3 }
   0x5   : > { %s3347_s15 = smov (%p27_p1, %s25_s15), 0  ;;  %p174_p3 = pnand %p2045_p0, %p173_p2 }
   0x7   : > { %177 = sbr.rel (%p174_p3) target bundleno = 389 (0x185), region = 32 }
   0xc   : > { %v2625_v0 = vld [vmem:[%s3311_s1 + $0x78] sm:$0xff]   ;;  %v2825_v4 = vmov 0   ;;  %v2629_v5 = vld [vmem:[%s3311_s1 + $0x70] sm:$0xff]   ;;  %v2633_v9 = vld [vmem:[%s3311_s1 + $0x68] sm:$0xff]   ;;  %s2046_s23 = sshll.u32 %s2815_s12, 4 }
   0xd   : > { %v2626_v1 = vld [vmem:[%s3311_s1 + $0xf8] sm:$0xff]   ;;  %2277 = vmatprep.subr.bf16.mxu0 %v2625_v0  ;;  %2623 = vset.pattern.permute.xlu0 %v2825_v4  ;;  %v2630_v6 = vld [vmem:[%s3311_s1 + $0xf0] sm:$0xff]   ;;  %v2634_v10 = vld [vmem:[%s3311_s1 + $0xe8] sm:$0xff]   ;;  %p211_p4 = scmp.lt.s32.totalorder %s2046_s23, 31 }
   0xe   : > { %v2627_v2 = vld [vmem:[%s3311_s1 + $0x38] sm:$0xff]   ;;  %2341 = vmatprep.subr.bf16.mxu1 %v2626_v1  ;;  %2624 = vset.pattern.permute.xlu1 %v2825_v4  ;;  %v2631_v7 = vld [vmem:[%s3311_s1 + $0x30] sm:$0xff]   ;;  %v2635_v11 = vld [vmem:[%s3311_s1 + $0x28] sm:$0xff]  }
   0xf   : > { %v2628_v3 = vld [vmem:[%s3311_s1 + $0xb8] sm:$0xff]   ;;  %2278 = vmatpush3.bf16.msra.mxu0 %v2627_v2  ;;  %v2632_v8 = vld [vmem:[%s3311_s1 + $0xb0] sm:$0xff]   ;;  %v2636_v12 = vld [vmem:[%s3311_s1 + $0xa8] sm:$0xff]   ;;  %s3349_s23 = smov (!%p211_p4, %s2046_s23), 31 }
  0x10   : > { %2342 = vmatpush3.bf16.msra.mxu1 %v2628_v3  ;;  %2279 = vmatprep.subr.bf16.mxu0 %v2629_v5  ;;  %v2637_v13 = vld [vmem:[%s3311_s1 + $0x60] sm:$0xff]   ;;  %v2641_v17 = vld [vmem:[%s3311_s1 + $0x58] sm:$0xff]   ;;  %v2645_v21 = vld [vmem:[%s3311_s1 + $0x50] sm:$0xff]   ;;  %s2597_s22 = smul.u32 36, %s3349_s23  ;;  %s2049_s9 = sshll.u32 %s3349_s23, 3 }
  0x11   : > { %2343 = vmatprep.subr.bf16.mxu1 %v2630_v6  ;;  %v2638_v14 = vld [vmem:[%s3311_s1 + $0xe0] sm:$0xff]   ;;  %v2642_v18 = vld [vmem:[%s3311_s1 + $0xd8] sm:$0xff]   ;;  %v2646_v22 = vld [vmem:[%s3311_s1 + $0xd0] sm:$0xff]   ;;  %s3107_s18 = scalar_lea.vmem %s3312_s2, %s2049_s9 }
  0x12   : > { %v2639_v15 = vld [vmem:[%s3311_s1 + $0x20] sm:$0xff]   ;;  %v2643_v19 = vld [vmem:[%s3311_s1 + $0x18] sm:$0xff]   ;;  %v2647_v23 = vld [vmem:[%s3311_s1 + $0x10] sm:$0xff]   ;;  %s2963_s6 = scalar_lea.vmem %s3310_s0, %s2597_s22 }
  0x13   : > { %2280 = vmatpush3.bf16.msra.mxu0 %v2631_v7  ;;  %v2640_v16 = vld [vmem:[%s3311_s1 + $0xa0] sm:$0xff]   ;;  %v2644_v20 = vld [vmem:[%s3311_s1 + $0x98] sm:$0xff]   ;;  %v2648_v24 = vld [vmem:[%s3311_s1 + $0x90] sm:$0xff]  }
  0x14   : > { %2344 = vmatpush3.bf16.msra.mxu1 %v2632_v8  ;;  %2281 = vmatprep.subr.bf16.mxu0 %v2633_v9  ;;  %v2649_v25 = vld [vmem:[%s3311_s1 + $0x48] sm:$0xff]   ;;  %v2653_v29 = vld [vmem:[%s3311_s1 + $0x40] sm:$0xff]   ;;  %v2663_v37 = vld [vmem:[%s3311_s1 + $0x178] sm:$0xff]  }
  0x15   : > { %2345 = vmatprep.subr.bf16.mxu1 %v2634_v10  ;;  %v2650_v26 = vld [vmem:[%s3311_s1 + $0xc8] sm:$0xff]   ;;  %v2654_v30 = vld [vmem:[%s3311_s1 + $0xc0] sm:$0xff]   ;;  %v2664_v38 = vld [vmem:[%s3311_s1 + $0x1f8] sm:$0xff]  }
  0x16   : > { %v2651_v27 = vld [vmem:[%s3311_s1 + $0x8] sm:$0xff]   ;;  %v2655_v31 = vld [vmem:[%s3311_s1] sm:$0xff]   ;;  %v2665_v39 = vld [vmem:[%s3311_s1 + $0x138] sm:$0xff]  }
  0x17   : > { %2282 = vmatpush3.bf16.msra.mxu0 %v2635_v11  ;;  %v2652_v28 = vld [vmem:[%s3311_s1 + $0x88] sm:$0xff]   ;;  %v2656_v32 = vld [vmem:[%s3311_s1 + $0x80] sm:$0xff]   ;;  %v2666_v40 = vld [vmem:[%s3311_s1 + $0x1b8] sm:$0xff]  }
  0x18   : > { %2346 = vmatpush3.bf16.msra.mxu1 %v2636_v12  ;;  %2283 = vmatprep.subr.bf16.mxu0 %v2637_v13  ;;  %v2657_v33 = vld [vmem:[%s2963_s6] ss:$36 sps:$4 sm:$0xff]   ;;  %v2660_v35 = vld [vmem:[%s2963_s6 + $0x8] ss:$36 sps:$4 sm:$0xff]   ;;  %v2669_v42 = vld [vmem:[%s2963_s6 + $0x54] ss:$36 sps:$4 sm:$0xff]  }
  0x19   : > { %2347 = vmatprep.subr.bf16.mxu1 %v2638_v14  ;;  %v2659_v34 = vld [vmem:[%s2963_s6 + $0x4] ss:$36 sps:$4 sm:$0xff]   ;;  %v2662_v36 = vld [vmem:[%s2963_s6 + $0xc] ss:$36 sps:$4 sm:$0xff]   ;;  %v2677_v49 = vld [vmem:[%s2963_s6 + $0x94] ss:$36 sps:$4 sm:$0xff]  }
  0x1a   : > { %1389 = vmatprep.mubr.bf16.mxu0 %v2659_v34  ;;  %1486 = vmatprep.mubr.bf16.mxu1 %v2662_v36  ;;  %v2667_v41 = vld [vmem:[%s2963_s6 + $0x4c] ss:$36 sps:$4 sm:$0xff]   ;;  %v2679_v50 = vld [vmem:[%s2963_s6 + $0x9c] ss:$36 sps:$4 sm:$0xff]   ;;  %v2689_v58 = vld [vmem:[%s2963_s6 + $0xe4] ss:$36 sps:$4 sm:$0xff]  }
  0x1b   : > { %2284 = vmatpush3.bf16.msra.mxu0 %v2639_v15  ;;  %v2671_v43 = vld [vmem:[%s2963_s6 + $0x48] ss:$36 sps:$4 sm:$0xff]   ;;  %v2672_v44 = vld [vmem:[%s2963_s6 + $0x50] ss:$36 sps:$4 sm:$0xff]   ;;  %v2682_v52 = vld [vmem:[%s2963_s6 + $0x98] ss:$36 sps:$4 sm:$0xff]  }
  0x1c   : > { %2348 = vmatpush3.bf16.msra.mxu1 %v2640_v16  ;;  %2285 = vmatprep.subr.bf16.mxu0 %v2641_v17  ;;  %v2673_v45 = vld [vmem:[%s3311_s1 + $0x170] sm:$0xff]   ;;  %v2683_v53 = vld [vmem:[%s3311_s1 + $0x168] sm:$0xff]   ;;  %v2687_v57 = vld [vmem:[%s2963_s6 + $0xdc] ss:$36 sps:$4 sm:$0xff]  }
  0x1d   : > { %2349 = vmatprep.subr.bf16.mxu1 %v2642_v18  ;;  %v2674_v46 = vld [vmem:[%s3311_s1 + $0x1f0] sm:$0xff]   ;;  %v2684_v54 = vld [vmem:[%s3311_s1 + $0x1e8] sm:$0xff]   ;;  %v2691_v59 = vld [vmem:[%s2963_s6 + $0xd8] ss:$36 sps:$4 sm:$0xff]  }
  0x1e   : > { %v2675_v47 = vld [vmem:[%s3311_s1 + $0x130] sm:$0xff]   ;;  %v2685_v55 = vld [vmem:[%s3311_s1 + $0x128] sm:$0xff]   ;;  %v2692_v60 = vld [vmem:[%s2963_s6 + $0xe0] ss:$36 sps:$4 sm:$0xff]  }
  0x1f   : > { %2286 = vmatpush3.bf16.msra.mxu0 %v2643_v19  ;;  %v2676_v48 = vld [vmem:[%s3311_s1 + $0x1b0] sm:$0xff]   ;;  %v2686_v56 = vld [vmem:[%s3311_s1 + $0x1a8] sm:$0xff]   ;;  %v2693_v61 = vld [vmem:[%s3311_s1 + $0x160] sm:$0xff]  }
  0x20   : > { %2350 = vmatpush3.bf16.msra.mxu1 %v2644_v20  ;;  %2287 = vmatprep.subr.bf16.mxu0 %v2645_v21  ;;  %v2681_v51 = vld [vmem:[%s2963_s6 + $0x90] ss:$36 sps:$4 sm:$0xff]   ;;  %v2694_v62 = vld [vmem:[%s3311_s1 + $0x1e0] sm:$0xff]   ;;  %v2703_v4 = vld [vmem:[%s3311_s1 + $0x158] sm:$0xff]  }
  0x21   : > { %2351 = vmatprep.subr.bf16.mxu1 %v2646_v22  ;;  %v2695_v63 = vld [vmem:[%s3311_s1 + $0x120] sm:$0xff]   ;;  %v2699_v2 = vld [vmem:[%s2963_s6 + $0x12c] ss:$36 sps:$4 sm:$0xff]   ;;  %v2704_v6 = vld [vmem:[%s3311_s1 + $0x1d8] sm:$0xff]  }
  0x22   : > { %v2696_v0 = vld [vmem:[%s3311_s1 + $0x1a0] sm:$0xff]   ;;  %v2702_v5 = vld [vmem:[%s2963_s6 + $0x128] ss:$36 sps:$4 sm:$0xff]   ;;  %v2705_v7 = vld [vmem:[%s3311_s1 + $0x118] sm:$0xff]  }
  0x23   : > { %2288 = vmatpush3.bf16.msra.mxu0 %v2647_v23  ;;  %v2697_v1 = vld [vmem:[%s2963_s6 + $0x124] ss:$36 sps:$4 sm:$0xff]   ;;  %v2706_v8 = vld [vmem:[%s3311_s1 + $0x198] sm:$0xff]   ;;  %v2707_v9 = vld [vmem:[%s2963_s6 + $0x16c] ss:$36 sps:$4 sm:$0xff]  }
  0x24   : > { %2352 = vmatpush3.bf16.msra.mxu1 %v2648_v24  ;;  %2289 = vmatprep.subr.bf16.mxu0 %v2649_v25  ;;  %v2701_v3 = vld [vmem:[%s2963_s6 + $0x120] ss:$36 sps:$4 sm:$0xff]   ;;  %v2709_v10 = vld [vmem:[%s2963_s6 + $0x174] ss:$36 sps:$4 sm:$0xff]   ;;  %v2711_v13 = vld [vmem:[%s2963_s6 + $0x168] ss:$36 sps:$4 sm:$0xff]  }
  0x25   : > { %2353 = vmatprep.subr.bf16.mxu1 %v2650_v26  ;;  %v2713_v11 = vld [vmem:[%s3311_s1 + $0x150] sm:$0xff]   ;;  %v2719_v18 = vld [vmem:[%s2963_s6 + $0x1bc] ss:$36 sps:$4 sm:$0xff]   ;;  %v2723_v19 = vld [vmem:[%s3311_s1 + $0x148] sm:$0xff]  }
  0x26   : > { %v2714_v12 = vld [vmem:[%s3311_s1 + $0x1d0] sm:$0xff]   ;;  %v2724_v20 = vld [vmem:[%s3311_s1 + $0x1c8] sm:$0xff]   ;;  %v2722_v24 = vld [vmem:[%s2963_s6 + $0x1b8] ss:$36 sps:$4 sm:$0xff]  }
  0x27   : > { %2290 = vmatpush3.bf16.msra.mxu0 %v2651_v27  ;;  %v2715_v14 = vld [vmem:[%s3311_s1 + $0x110] sm:$0xff]   ;;  %v2725_v21 = vld [vmem:[%s3311_s1 + $0x108] sm:$0xff]   ;;  %v2727_v25 = vld [vmem:[%s2963_s6 + $0x1fc] ss:$36 sps:$4 sm:$0xff]  }
  0x28   : > { %2354 = vmatpush3.bf16.msra.mxu1 %v2652_v28  ;;  %2291 = vmatprep.subr.bf16.mxu0 %v2653_v29  ;;  %v2716_v15 = vld [vmem:[%s3311_s1 + $0x190] sm:$0xff]   ;;  %v2726_v22 = vld [vmem:[%s3311_s1 + $0x188] sm:$0xff]   ;;  %v2733_v27 = vld [vmem:[%s3311_s1 + $0x140] sm:$0xff]  }
  0x29   : > { %2355 = vmatprep.subr.bf16.mxu1 %v2654_v30  ;;  %v2712_v16 = vld [vmem:[%s2963_s6 + $0x170] ss:$36 sps:$4 sm:$0xff]   ;;  %v2729_v26 = vld [vmem:[%s2963_s6 + $0x204] ss:$36 sps:$4 sm:$0xff]  }
  0x2a   : > { %v2717_v17 = vld [vmem:[%s2963_s6 + $0x1b4] ss:$36 sps:$4 sm:$0xff]   ;;  %v2734_v28 = vld [vmem:[%s3311_s1 + $0x1c0] sm:$0xff]  }
  0x2b   : > { %2292 = vmatpush3.bf16.msra.mxu0 %v2655_v31  ;;  %v2721_v23 = vld [vmem:[%s2963_s6 + $0x1b0] ss:$36 sps:$4 sm:$0xff]   ;;  %v2735_v29 = vld [vmem:[%s3311_s1 + $0x100] sm:$0xff]   ;;  %v2731_v31 = vld [vmem:[%s2963_s6 + $0x1f8] ss:$36 sps:$4 sm:$0xff]  }
  0x2c   : > { %2356 = vmatpush3.bf16.msra.mxu1 %v2656_v32  ;;  %2405 = vmatprep.subr.bf16.mxu0 %v2663_v37  ;;  %v2736_v30 = vld [vmem:[%s3311_s1 + $0x180] sm:$0xff]   ;;  %v2739_v34 = vld [vmem:[%s2963_s6 + $0x14] ss:$36 sps:$4 sm:$0xff]   ;;  %v462_v37 = vld [vmem:[%s3107_s18 + $0x8] sm:$0xff] }
  0x2d   : > { %2469 = vmatprep.subr.bf16.mxu1 %v2664_v38  ;;  %v2732_v32 = vld [vmem:[%s2963_s6 + $0x200] ss:$36 sps:$4 sm:$0xff]   ;;  %v2737_v38 = vld [vmem:[%s2963_s6 + $0x10] ss:$36 sps:$4 sm:$0xff]  }
  0x2e   : > { %1390 = vmatmul.mubr.bf16.vlgmr.msra.gmra.mxu0 %v2657_v33  ;;  %v2743_v33 = vld [vmem:[%s3311_s1 + $0x238] sm:$0xff]   ;;  %v461_v36 = vld [vmem:[%s3107_s18] sm:$0xff] }
  0x2f   : > { %1487 = vmatmul.mubr.bf16.vlgmr.msra.gmra.mxu1 %v2660_v35  ;;  %2406 = vmatpush3.bf16.msra.mxu0 %v2665_v39  ;;  %v2742_v35 = vld [vmem:[%s2963_s6 + $0x1c] ss:$36 sps:$4 sm:$0xff]  }
  0x30   : > { %2470 = vmatpush3.bf16.msra.mxu1 %v2666_v40  ;;  %1397 = vmatprep.mubr.bf16.mxu0 %v2667_v41  ;;  %v2740_v39 = vld [vmem:[%s2963_s6 + $0x18] ss:$36 sps:$4 sm:$0xff]   ;;  %v463_v40 = vld [vmem:[%s3107_s18 + $0x10] sm:$0xff] }
  0x31   : > { %1494 = vmatprep.mubr.bf16.mxu1 %v2669_v42  ;;  %2407 = vmatprep.subr.bf16.mxu0 %v2673_v45  ;;  %v2744_v41 = vld [vmem:[%s2963_s6 + $0x5c] ss:$36 sps:$4 sm:$0xff]   ;;  %v2746_v42 = vld [vmem:[%s2963_s6 + $0x64] ss:$36 sps:$4 sm:$0xff]  }
  0x32   : > { %2471 = vmatprep.subr.bf16.mxu1 %v2674_v46  ;;  %479 = vperm.xlu0 %2623, %v461_v36   ;;  %v464_v45 = vld [vmem:[%s3107_s18 + $0x18] sm:$0xff]  ;;  %v465_v46 = vld [vmem:[%s3107_s18 + $0x20] sm:$0xff] }
  0x33   : > { %2408 = vmatpush3.bf16.msra.mxu0 %v2675_v47  ;;  %489 = vperm.xlu1 %2624, %v463_v40   ;;  %v2748_v47 = vld [vmem:[%s2963_s6 + $0x58] ss:$36 sps:$4 sm:$0xff]  }
  0x34   : > { %2472 = vmatpush3.bf16.msra.mxu1 %v2676_v48  ;;  %2409 = vmatprep.subr.bf16.mxu0 %v2683_v53  ;;  %v2749_v48 = vld [vmem:[%s2963_s6 + $0x60] ss:$36 sps:$4 sm:$0xff]   ;;  %v467_v53 = vld [vmem:[%s3107_s18 + $0x30] sm:$0xff] }
  0x35   : > { %2473 = vmatprep.subr.bf16.mxu1 %v2684_v54  ;;  %v468_v54 = vld [vmem:[%s3107_s18 + $0x38] sm:$0xff] }
  0x36   : > { %1398 = vmatmul.mubr.bf16.gmra.mxu0 %v2671_v43  ;;  %484 = vperm.xlu0 %2623, %v462_v37   ;;  %v2750_v43 = vld [vmem:[%s3311_s1 + $0x230] sm:$0xff]  }
  0x37   : > { %1495 = vmatmul.mubr.bf16.gmra.mxu1 %v2672_v44  ;;  %1405 = vmatprep.mubr.bf16.mxu0 %v2677_v49  ;;  %v2757_v44 = vld [vmem:[%s3311_s1 + $0x228] sm:$0xff]  }
  0x38   : > { %1502 = vmatprep.mubr.bf16.mxu1 %v2679_v50  ;;  %2410 = vmatpush3.bf16.msra.mxu0 %v2685_v55  ;;  %v2751_v49 = vld [vmem:[%s2963_s6 + $0xa4] ss:$36 sps:$4 sm:$0xff]   ;;  %v2771_v55 = vld [vmem:[%s3311_s1 + $0x218] sm:$0xff]  }
  0x39   : > { %2474 = vmatpush3.bf16.msra.mxu1 %v2686_v56  ;;  %2411 = vmatprep.subr.bf16.mxu0 %v2693_v61  ;;  %v466_v50 = vld [vmem:[%s3107_s18 + $0x28] sm:$0xff]  ;;  %v2755_v56 = vld [vmem:[%s2963_s6 + $0xa0] ss:$36 sps:$4 sm:$0xff]  }
  0x3a   : > { %2475 = vmatprep.subr.bf16.mxu1 %v2694_v62  ;;  %494 = vperm.xlu1 %2624, %v464_v45   ;;  %v469_v61 = vld [vmem:[%s3107_s18 + $0x40] sm:$0xff]  ;;  %v2762_v62 = vld [vmem:[%s2963_s6 + $0xe8] ss:$36 sps:$4 sm:$0xff]  }
  0x3b   : > { %499 = vperm.xlu0 %2623, %v465_v46  }
  0x3c   : > { %2412 = vmatpush3.bf16.msra.mxu0 %v2695_v63  ;;  %v470_v63 = vld [vmem:[%s3107_s18 + $0x48] sm:$0xff] }
  0x3d   : > { %2476 = vmatpush3.bf16.msra.mxu1 %v2696_v0  ;;  %2413 = vmatprep.subr.bf16.mxu0 %v2703_v4  ;;  %v2785_v0 = vld [vmem:[%s3311_s1 + $0x208] sm:$0xff]   ;;  %v471_v4 = vld [vmem:[%s3107_s18 + $0x50] sm:$0xff] }
  0x3e   : > { %1406 = vmatmul.mubr.bf16.gmra.mxu0 %v2681_v51  ;;  %2477 = vmatprep.subr.bf16.mxu1 %v2704_v6  ;;  %v2753_v51 = vld [vmem:[%s2963_s6 + $0xac] ss:$36 sps:$4 sm:$0xff]   ;;  %v472_v6 = vld [vmem:[%s3107_s18 + $0x58] sm:$0xff] }
  0x3f   : > { %1503 = vmatmul.mubr.bf16.gmra.mxu1 %v2682_v52  ;;  %1413 = vmatprep.mubr.bf16.mxu0 %v2687_v57  ;;  %v2764_v52 = vld [vmem:[%s3311_s1 + $0x220] sm:$0xff]   ;;  %v2756_v57 = vld [vmem:[%s2963_s6 + $0xa8] ss:$36 sps:$4 sm:$0xff]  }
  0x40   : > { %1510 = vmatprep.mubr.bf16.mxu1 %v2689_v58  ;;  %2414 = vmatpush3.bf16.msra.mxu0 %v2705_v7  ;;  %v2758_v58 = vld [vmem:[%s2963_s6 + $0xec] ss:$36 sps:$4 sm:$0xff]   ;;  %v473_v7 = vld [vmem:[%s3107_s18 + $0x60] sm:$0xff] }
  0x41   : > { %2478 = vmatpush3.bf16.msra.mxu1 %v2706_v8  ;;  %2415 = vmatprep.subr.bf16.mxu0 %v2713_v11  ;;  %v2769_v8 = vld [vmem:[%s2963_s6 + $0x130] ss:$36 sps:$4 sm:$0xff]   ;;  %v474_v11 = vld [vmem:[%s3107_s18 + $0x68] sm:$0xff] }
  0x42   : > { %2479 = vmatprep.subr.bf16.mxu1 %v2714_v12  ;;  %504 = vperm.xlu1 %2624, %v466_v50   ;;  %v2774_v12 = vld [vmem:[%s2963_s6 + $0x184] ss:$36 sps:$4 sm:$0xff]  }
  0x43   : > { %509 = vperm.xlu0 %2623, %v467_v53  }
  0x44   : > { %2416 = vmatpush3.bf16.msra.mxu0 %v2715_v14  ;;  %v476_v14 = vld [vmem:[%s3107_s18 + $0x78] sm:$0xff] }
  0x45   : > { %2480 = vmatpush3.bf16.msra.mxu1 %v2716_v15  ;;  %2417 = vmatprep.subr.bf16.mxu0 %v2723_v19  ;;  %v2776_v15 = vld [vmem:[%s2963_s6 + $0x178] ss:$36 sps:$4 sm:$0xff]   ;;  %v2783_v19 = vld [vmem:[%s2963_s6 + $0x1c0] ss:$36 sps:$4 sm:$0xff]  }
  0x46   : > { %1414 = vmatmul.mubr.bf16.gmra.mxu0 %v2691_v59  ;;  %2481 = vmatprep.subr.bf16.mxu1 %v2724_v20  ;;  %v2760_v59 = vld [vmem:[%s2963_s6 + $0xf4] ss:$36 sps:$4 sm:$0xff]   ;;  %v2784_v20 = vld [vmem:[%s2963_s6 + $0x1c8] ss:$36 sps:$4 sm:$0xff]  }
  0x47   : > { %1511 = vmatmul.mubr.bf16.gmra.mxu1 %v2692_v60  ;;  %1421 = vmatprep.mubr.bf16.mxu0 %v2697_v1  ;;  %v2778_v60 = vld [vmem:[%s3311_s1 + $0x210] sm:$0xff]  }
  0x48   : > { %1518 = vmatprep.mubr.bf16.mxu1 %v2699_v2  ;;  %2418 = vmatpush3.bf16.msra.mxu0 %v2725_v21  ;;  %v2763_v1 = vld [vmem:[%s2963_s6 + $0xf0] ss:$36 sps:$4 sm:$0xff]  }
  0x49   : > { %2482 = vmatpush3.bf16.msra.mxu1 %v2726_v22  ;;  %2419 = vmatprep.subr.bf16.mxu0 %v2733_v27  ;;  %v2765_v2 = vld [vmem:[%s2963_s6 + $0x134] ss:$36 sps:$4 sm:$0xff]   ;;  %v2786_v21 = vld [vmem:[%s2963_s6 + $0x20c] ss:$36 sps:$4 sm:$0xff]  }
  0x4a   : > { %2483 = vmatprep.subr.bf16.mxu1 %v2734_v28  ;;  %514 = vperm.xlu1 %2624, %v468_v54   ;;  %v2788_v22 = vld [vmem:[%s2963_s6 + $0x214] ss:$36 sps:$4 sm:$0xff]   ;;  %v2795_v27 = vld [vmem:[%s2963_s6 + $0x68] ss:$36 sps:$4 sm:$0xff]  }
  0x4b   : > { %519 = vperm.xlu0 %2623, %v469_v61   ;;  %v2796_v28 = vld [vmem:[%s2963_s6 + $0x188] ss:$36 sps:$4 sm:$0xff]  }
  0x4c   : > { %2420 = vmatpush3.bf16.msra.mxu0 %v2735_v29  ;;  %v2797_v29 = vld [vmem:[%s2963_s6 + $0xb0] ss:$36 sps:$4 sm:$0xff]  }
  0x4d   : > { %2484 = vmatpush3.bf16.msra.mxu1 %v2736_v30  ;;  %2549 = vmatprep.subr.bf16.mxu0 %v2743_v33  ;;  %v2798_v30 = vld [vmem:[%s2963_s6 + $0x1d0] ss:$36 sps:$4 sm:$0xff]  }
  0x4e   : > { %1422 = vmatmul.mubr.bf16.gmra.mxu0 %v2701_v3  ;;  %2581 = vmatprep.subr.bf16.mxu1 %v2743_v33  ;;  %v2767_v3 = vld [vmem:[%s2963_s6 + $0x13c] ss:$36 sps:$4 sm:$0xff]  }
  0x4f   : > { %1519 = vmatmul.mubr.bf16.gmra.mxu1 %v2702_v5  ;;  %1429 = vmatprep.mubr.bf16.mxu0 %v2707_v9  ;;  %v2792_v5 = vld [vmem:[%s3311_s1 + $0x200] sm:$0xff]   ;;  %v2770_v9 = vld [vmem:[%s2963_s6 + $0x138] ss:$36 sps:$4 sm:$0xff]  }
  0x50   : > { %1526 = vmatprep.mubr.bf16.mxu1 %v2709_v10  ;;  %524 = vperm.xlu1 %2624, %v470_v63   ;;  %v2772_v10 = vld [vmem:[%s2963_s6 + $0x17c] ss:$36 sps:$4 sm:$0xff]  }
  0x51   : > { %529 = vperm.xlu0 %2623, %v471_v4  }
  0x54   : > { %534 = vperm.xlu1 %2624, %v472_v6  }
  0x55   : > { %539 = vperm.xlu0 %2623, %v473_v7  }
  0x56   : > { %1430 = vmatmul.mubr.bf16.gmra.mxu0 %v2711_v13  ;;  %v475_v13 = vld [vmem:[%s3107_s18 + $0x70] sm:$0xff] }
  0x57   : > { %1527 = vmatmul.mubr.bf16.gmra.mxu1 %v2712_v16  ;;  %1437 = vmatprep.mubr.bf16.mxu0 %v2717_v17  ;;  %v2777_v16 = vld [vmem:[%s2963_s6 + $0x180] ss:$36 sps:$4 sm:$0xff]  }
  0x58   : > { %1534 = vmatprep.mubr.bf16.mxu1 %v2719_v18  ;;  %544 = vperm.xlu1 %2624, %v474_v11   ;;  %v2779_v17 = vld [vmem:[%s2963_s6 + $0x1c4] ss:$36 sps:$4 sm:$0xff]   ;;  %v2781_v18 = vld [vmem:[%s2963_s6 + $0x1cc] ss:$36 sps:$4 sm:$0xff]  }
  0x59   : > { %549 = vperm.xlu0 %2623, %v475_v13  }
  0x5c   : > { %554 = vperm.xlu1 %2624, %v476_v14  }
  0x5e   : > { %1438 = vmatmul.mubr.bf16.gmra.mxu0 %v2721_v23  ;;  %v2790_v23 = vld [vmem:[%s2963_s6 + $0x208] ss:$36 sps:$4 sm:$0xff]  }
  0x5f   : > { %1535 = vmatmul.mubr.bf16.gmra.mxu1 %v2722_v24  ;;  %1445 = vmatprep.mubr.bf16.mxu0 %v2727_v25  ;;  %v2791_v24 = vld [vmem:[%s2963_s6 + $0x210] ss:$36 sps:$4 sm:$0xff]   ;;  %v2793_v25 = vld [vmem:[%s2963_s6 + $0x20] ss:$36 sps:$4 sm:$0xff]  }
  0x60   : > { %1542 = vmatprep.mubr.bf16.mxu1 %v2729_v26  ;;  %v2794_v26 = vld [vmem:[%s2963_s6 + $0x140] ss:$36 sps:$4 sm:$0xff]  }
  0x66   : > { %1446 = vmatmul.mubr.bf16.gmra.mxu0 %v2731_v31  ;;  %v2799_v31 = vld [vmem:[%s2963_s6 + $0xf8] ss:$36 sps:$4 sm:$0xff]  }
  0x67   : > { %1543 = vmatmul.mubr.bf16.gmra.mxu1 %v2732_v32  ;;  %1583 = vmatprep.mubr.bf16.mxu0 %v2739_v34  ;;  %v2800_v32 = vld [vmem:[%s2963_s6 + $0x218] ss:$36 sps:$4 sm:$0xff]   ;;  %s2051_s6 = sshll.u32 %s3349_s23, 2 }
  0x68   : > { %1680 = vmatprep.mubr.bf16.mxu1 %v2742_v35  ;;  %s3285_s8 = scalar_lea.vmem %s3313_s3, %s2051_s6 }
  0x6e   : > { %1584 = vmatmul.mubr.bf16.vlgmr.msra.gmra.mxu0 %v2737_v38 }
  0x6f   : > { %1681 = vmatmul.mubr.bf16.vlgmr.msra.gmra.mxu1 %v2740_v39  ;;  %2550 = vmatpush3.bf16.msra.mxu0 %v2743_v33 }
  0x70   : > { %2589 = vmatpush3.bf16.msra.mxu1 %v2743_v33  ;;  %1591 = vmatprep.mubr.bf16.mxu0 %v2744_v41 }
  0x71   : > { %1688 = vmatprep.mubr.bf16.mxu1 %v2746_v42  ;;  %2551 = vmatprep.subr.bf16.mxu0 %v2750_v43 }
  0x72   : > { %2582 = vmatprep.subr.bf16.mxu1 %v2750_v43 }
  0x73   : > { %2552 = vmatpush3.bf16.msra.mxu0 %v2750_v43 }
  0x74   : > { %2590 = vmatpush3.bf16.msra.mxu1 %v2750_v43  ;;  %2553 = vmatprep.subr.bf16.mxu0 %v2757_v44 }
  0x75   : > { %2583 = vmatprep.subr.bf16.mxu1 %v2757_v44 }
  0x76   : > { %1592 = vmatmul.mubr.bf16.gmra.mxu0 %v2748_v47 }
  0x77   : > { %1689 = vmatmul.mubr.bf16.gmra.mxu1 %v2749_v48  ;;  %1599 = vmatprep.mubr.bf16.mxu0 %v2751_v49 }
  0x78   : > { %1696 = vmatprep.mubr.bf16.mxu1 %v2753_v51  ;;  %2554 = vmatpush3.bf16.msra.mxu0 %v2757_v44 }
  0x79   : > { %2591 = vmatpush3.bf16.msra.mxu1 %v2757_v44  ;;  %2555 = vmatprep.subr.bf16.mxu0 %v2764_v52 }
  0x7a   : > { %2584 = vmatprep.subr.bf16.mxu1 %v2764_v52 }
  0x7c   : > { %2556 = vmatpush3.bf16.msra.mxu0 %v2764_v52 }
  0x7d   : > { %2592 = vmatpush3.bf16.msra.mxu1 %v2764_v52  ;;  %2557 = vmatprep.subr.bf16.mxu0 %v2771_v55 }
  0x7e   : > { %1600 = vmatmul.mubr.bf16.gmra.mxu0 %v2755_v56  ;;  %2585 = vmatprep.subr.bf16.mxu1 %v2771_v55 }
  0x7f   : > { %1697 = vmatmul.mubr.bf16.gmra.mxu1 %v2756_v57  ;;  %1607 = vmatprep.mubr.bf16.mxu0 %v2758_v58 }
  0x80   : > { %1704 = vmatprep.mubr.bf16.mxu1 %v2760_v59  ;;  %2558 = vmatpush3.bf16.msra.mxu0 %v2771_v55 }
  0x81   : > { %2593 = vmatpush3.bf16.msra.mxu1 %v2771_v55  ;;  %2559 = vmatprep.subr.bf16.mxu0 %v2778_v60 }
  0x82   : > { %2586 = vmatprep.subr.bf16.mxu1 %v2778_v60 }
  0x84   : > { %2560 = vmatpush3.bf16.msra.mxu0 %v2778_v60 }
  0x85   : > { %2594 = vmatpush3.bf16.msra.mxu1 %v2778_v60  ;;  %2561 = vmatprep.subr.bf16.mxu0 %v2785_v0 }
  0x86   : > { %1608 = vmatmul.mubr.bf16.gmra.mxu0 %v2762_v62  ;;  %2587 = vmatprep.subr.bf16.mxu1 %v2785_v0 }
  0x87   : > { %1705 = vmatmul.mubr.bf16.gmra.mxu1 %v2763_v1  ;;  %1615 = vmatprep.mubr.bf16.mxu0 %v2765_v2 }
  0x88   : > { %1712 = vmatprep.mubr.bf16.mxu1 %v2767_v3  ;;  %2562 = vmatpush3.bf16.msra.mxu0 %v2785_v0 }
  0x89   : > { %2595 = vmatpush3.bf16.msra.mxu1 %v2785_v0  ;;  %2563 = vmatprep.subr.bf16.mxu0 %v2792_v5 }
  0x8a   : > { %2588 = vmatprep.subr.bf16.mxu1 %v2792_v5 }
  0x8c   : > { %2564 = vmatpush3.bf16.msra.mxu0 %v2792_v5 }
  0x8d   : > { %2596 = vmatpush3.bf16.msra.mxu1 %v2792_v5 }
  0x8e   : > { %1616 = vmatmul.mubr.bf16.gmra.mxu0 %v2769_v8 }
  0x8f   : > { %1713 = vmatmul.mubr.bf16.gmra.mxu1 %v2770_v9  ;;  %1623 = vmatprep.mubr.bf16.mxu0 %v2772_v10 }
  0x90   : > { %1720 = vmatprep.mubr.bf16.mxu1 %v2774_v12 }
  0x96   : > { %1624 = vmatmul.mubr.bf16.gmra.mxu0 %v2776_v15 }
  0x97   : > { %1721 = vmatmul.mubr.bf16.gmra.mxu1 %v2777_v16  ;;  %1631 = vmatprep.mubr.bf16.mxu0 %v2779_v17 }
  0x98   : > { %1728 = vmatprep.mubr.bf16.mxu1 %v2781_v18 }
  0x9e   : > { %1632 = vmatmul.mubr.bf16.gmra.mxu0 %v2783_v19 }
  0x9f   : > { %1729 = vmatmul.mubr.bf16.gmra.mxu1 %v2784_v20  ;;  %1639 = vmatprep.mubr.bf16.mxu0 %v2786_v21 }
  0xa0   : > { %1736 = vmatprep.mubr.bf16.mxu1 %v2788_v22 }
  0xa6   : > { %1640 = vmatmul.mubr.bf16.gmra.mxu0 %v2790_v23 }
  0xa7   : > { %1737 = vmatmul.mubr.bf16.gmra.mxu1 %v2791_v24  ;;  %2565 = vmatprep.mubr.bf16.mxu0 %v2793_v25 }
  0xa8   : > { %2573 = vmatprep.mubr.bf16.mxu1 %v2794_v26 }
  0xad   : > { %v480_v34 = vpop.permute.xlu0 %479 }
  0xae   : > { %2566 = vmatmul.mubr.bf16.vlgmr.msra.gmra.mxu0 %v2795_v27  ;;  %v490_v50 = vpop.permute.xlu1 %489 }
  0xaf   : > { %2574 = vmatmul.mubr.bf16.vlgmr.msra.gmra.mxu1 %v2796_v28  ;;  %2569 = vmatprep.mubr.bf16.mxu0 %v2797_v29 }
  0xb0   : > { %2577 = vmatprep.mubr.bf16.mxu1 %v2798_v30 }
  0xb1   : > { %v485_v44 = vpop.permute.xlu0 %484 }
  0xb5   : > { %v495_v62 = vpop.permute.xlu1 %494 }
  0xb6   : > { %2570 = vmatmul.mubr.bf16.gmra.mxu0 %v2799_v31  ;;  %v500_v7 = vpop.permute.xlu0 %499 }
  0xb7   : > { %2578 = vmatmul.mubr.bf16.gmra.mxu1 %v2800_v32 }
  0xbd   : > { %v505_v16 = vpop.permute.xlu1 %504 }
  0xbe   : > { %v510_v25 = vpop.permute.xlu0 %509 }
  0xee   : > { %v2293_v33 = vpop.f32.mrf.mxu0 }
  0xef   : > { %v2357_v35 = vpop.f32.mrf.mxu1 }
  0xf0   : > { %v2294_v36 = vpop.f32.mrf.mxu0 }
  0xf1   : > { %v2295_v37 = vadd.f32 %v2294_v36, %v2293_v33  ;;  %v2358_v38 = vpop.f32.mrf.mxu1 }
  0xf2   : > { %v2359_v39 = vadd.f32 %v2358_v38, %v2357_v35  ;;  %v2296_v40 = vpop.f32.mrf.mxu0 }
  0xf3   : > { %v1392_v41 = vadd.f32 %v2295_v37, %v480_v34  ;;  %v2360_v42 = vpop.f32.mrf.mxu1  ;;  %v515_v34 = vpop.permute.xlu1 %514 }
  0xf4   : > { %v2297_v43 = vpop.f32.mrf.mxu0 }
  0xf5   : > { %v3185_v45 = vadd.f32 %v2359_v39, %v1392_v41  ;;  %v2298_v46 = vadd.f32 %v2297_v43, %v2296_v40  ;;  %v2361_v47 = vpop.f32.mrf.mxu1  ;;  %v520_v43 = vpop.permute.xlu0 %519 }
  0xf6   : > { %v2362_v48 = vadd.f32 %v2361_v47, %v2360_v42  ;;  %v2299_v49 = vpop.f32.mrf.mxu0 }
  0xf7   : > { %v1395_v51 = vadd.f32 %v2298_v46, %v485_v44  ;;  %v2363_v52 = vpop.f32.mrf.mxu1 }
  0xf8   : > { %v2300_v53 = vpop.f32.mrf.mxu0 }
  0xf9   : > { %v3187_v54 = vadd.f32 %v2362_v48, %v1395_v51  ;;  %v2301_v55 = vadd.f32 %v2300_v53, %v2299_v49  ;;  %v2364_v56 = vpop.f32.mrf.mxu1  ;;  %v525_v53 = vpop.permute.xlu1 %524 }
  0xfa   : > { %v2365_v57 = vadd.f32 %v2364_v56, %v2363_v52  ;;  %v2302_v58 = vpop.f32.mrf.mxu0 }
  0xfb   : > { %v1400_v59 = vadd.f32 %v2301_v55, %v490_v50  ;;  %v2366_v60 = vpop.f32.mrf.mxu1 }
  0xfc   : > { %v2303_v61 = vpop.f32.mrf.mxu0 }
  0xfd   : > { %v3189_v63 = vadd.f32 %v2365_v57, %v1400_v59  ;;  %v2304_v0 = vadd.f32 %v2303_v61, %v2302_v58  ;;  %v2367_v1 = vpop.f32.mrf.mxu1 }
  0xfe   : > { %v2368_v2 = vadd.f32 %v2367_v1, %v2366_v60  ;;  %v2305_v3 = vpop.f32.mrf.mxu0 }
  0xff   : > { %v1403_v4 = vadd.f32 %v2304_v0, %v495_v62  ;;  %v2369_v5 = vpop.f32.mrf.mxu1  ;;  %v530_v0 = vpop.permute.xlu0 %529 }
 0x100   : > { %v2306_v6 = vpop.f32.mrf.mxu0 }
 0x101   : > { %v3191_v8 = vadd.f32 %v2368_v2, %v1403_v4  ;;  %v2307_v9 = vadd.f32 %v2306_v6, %v2305_v3  ;;  %v2370_v10 = vpop.f32.mrf.mxu1 }
 0x102   : > { %v2371_v11 = vadd.f32 %v2370_v10, %v2369_v5  ;;  %v2308_v12 = vpop.f32.mrf.mxu0  ;;  %v535_v10 = vpop.permute.xlu1 %534 }
 0x103   : > { %v1408_v13 = vadd.f32 %v2307_v9, %v500_v7  ;;  %v2372_v14 = vpop.f32.mrf.mxu1 }
 0x104   : > { %v2309_v15 = vpop.f32.mrf.mxu0 }
 0x105   : > { %v3193_v17 = vadd.f32 %v2371_v11, %v1408_v13  ;;  %v2310_v18 = vadd.f32 %v2309_v15, %v2308_v12  ;;  %v2373_v19 = vpop.f32.mrf.mxu1 }
 0x106   : > { %v2374_v20 = vadd.f32 %v2373_v19, %v2372_v14  ;;  %v2311_v21 = vpop.f32.mrf.mxu0 }
 0x107   : > { %v1411_v22 = vadd.f32 %v2310_v18, %v505_v16  ;;  %v2375_v23 = vpop.f32.mrf.mxu1 }
 0x108   : > { %v2312_v24 = vpop.f32.mrf.mxu0 }
 0x109   : > { %v3195_v26 = vadd.f32 %v2374_v20, %v1411_v22  ;;  %v2313_v27 = vadd.f32 %v2312_v24, %v2311_v21  ;;  %v2376_v28 = vpop.f32.mrf.mxu1  ;;  %v540_v20 = vpop.permute.xlu0 %539 }
 0x10a   : > { %v2377_v29 = vadd.f32 %v2376_v28, %v2375_v23  ;;  %v2314_v30 = vpop.f32.mrf.mxu0 }
 0x10b   : > { %3314 = vst [vmem:[#allocation2_spill] sm:$0xff] %v3195_v26  ;;  %v1416_v31 = vadd.f32 %v2313_v27, %v510_v25  ;;  %v2378_v32 = vpop.f32.mrf.mxu1 }
 0x10c   : > { %v2315_v33 = vpop.f32.mrf.mxu0 }
 0x10d   : > { %v3197_v35 = vadd.f32 %v2377_v29, %v1416_v31  ;;  %v2316_v36 = vadd.f32 %v2315_v33, %v2314_v30  ;;  %v2379_v37 = vpop.f32.mrf.mxu1  ;;  %v545_v30 = vpop.permute.xlu1 %544 }
 0x10e   : > { %v2380_v38 = vadd.f32 %v2379_v37, %v2378_v32  ;;  %v2317_v39 = vpop.f32.mrf.mxu0 }
 0x10f   : > { %v1419_v40 = vadd.f32 %v2316_v36, %v515_v34  ;;  %v2381_v41 = vpop.f32.mrf.mxu1 }
 0x110   : > { %v2318_v42 = vpop.f32.mrf.mxu0 }
 0x111   : > { %v3199_v44 = vadd.f32 %v2380_v38, %v1419_v40  ;;  %v2319_v46 = vadd.f32 %v2318_v42, %v2317_v39  ;;  %v2382_v47 = vpop.f32.mrf.mxu1  ;;  %v550_v40 = vpop.permute.xlu0 %549 }
 0x112   : > { %v2383_v48 = vadd.f32 %v2382_v47, %v2381_v41  ;;  %v2320_v49 = vpop.f32.mrf.mxu0 }
 0x113   : > { %3315 = vst [vmem:[#allocation3_spill] sm:$0xff] %v3199_v44  ;;  %v1424_v50 = vadd.f32 %v2319_v46, %v520_v43  ;;  %v2384_v51 = vpop.f32.mrf.mxu1 }
 0x114   : > { %v2321_v52 = vpop.f32.mrf.mxu0 }
 0x115   : > { %v3201_v55 = vadd.f32 %v2383_v48, %v1424_v50  ;;  %v2322_v56 = vadd.f32 %v2321_v52, %v2320_v49  ;;  %v2385_v57 = vpop.f32.mrf.mxu1 }
 0x116   : > { %v2386_v58 = vadd.f32 %v2385_v57, %v2384_v51  ;;  %v2323_v59 = vpop.f32.mrf.mxu0  ;;  %v555_v51 = vpop.permute.xlu1 %554 }
 0x117   : > { %v1427_v60 = vadd.f32 %v2322_v56, %v525_v53  ;;  %v2387_v61 = vpop.f32.mrf.mxu1 }
 0x118   : > { %v2324_v62 = vpop.f32.mrf.mxu0 }
 0x119   : > { %v3203_v1 = vadd.f32 %v2386_v58, %v1427_v60  ;;  %v2325_v2 = vadd.f32 %v2324_v62, %v2323_v59  ;;  %v2388_v3 = vpop.f32.mrf.mxu1 }
 0x11a   : > { %v2389_v4 = vadd.f32 %v2388_v3, %v2387_v61  ;;  %v2326_v5 = vpop.f32.mrf.mxu0 }
 0x11b   : > { %3316 = vst [vmem:[#allocation4_spill] sm:$0xff] %v3203_v1  ;;  %v1432_v6 = vadd.f32 %v2325_v2, %v530_v0  ;;  %v2390_v7 = vpop.f32.mrf.mxu1 }
 0x11c   : > { %v2327_v9 = vpop.f32.mrf.mxu0 }
 0x11d   : > { %v3205_v11 = vadd.f32 %v2389_v4, %v1432_v6  ;;  %v2328_v12 = vadd.f32 %v2327_v9, %v2326_v5  ;;  %v2391_v13 = vpop.f32.mrf.mxu1 }
 0x11e   : > { %v2392_v14 = vadd.f32 %v2391_v13, %v2390_v7  ;;  %v2329_v15 = vpop.f32.mrf.mxu0 }
 0x11f   : > { %v1435_v16 = vadd.f32 %v2328_v12, %v535_v10  ;;  %v2393_v18 = vpop.f32.mrf.mxu1 }
 0x120   : > { %v2330_v19 = vpop.f32.mrf.mxu0 }
 0x121   : > { %v3207_v21 = vadd.f32 %v2392_v14, %v1435_v16  ;;  %v2331_v22 = vadd.f32 %v2330_v19, %v2329_v15  ;;  %v2394_v23 = vpop.f32.mrf.mxu1 }
 0x122   : > { %v2395_v24 = vadd.f32 %v2394_v23, %v2393_v18  ;;  %v2332_v25 = vpop.f32.mrf.mxu0 }
 0x123   : > { %3317 = vst [vmem:[#allocation5_spill] sm:$0xff] %v3207_v21  ;;  %v1440_v27 = vadd.f32 %v2331_v22, %v540_v20  ;;  %v2396_v28 = vpop.f32.mrf.mxu1 }
 0x124   : > { %v2333_v29 = vpop.f32.mrf.mxu0 }
 0x125   : > { %v3209_v31 = vadd.f32 %v2395_v24, %v1440_v27  ;;  %v2334_v32 = vadd.f32 %v2333_v29, %v2332_v25  ;;  %v2397_v33 = vpop.f32.mrf.mxu1 }
 0x126   : > { %v2398_v34 = vadd.f32 %v2397_v33, %v2396_v28  ;;  %v2335_v36 = vpop.f32.mrf.mxu0 }
 0x127   : > { %3318 = vst [vmem:[#allocation6_spill] sm:$0xff] %v3209_v31  ;;  %v1443_v37 = vadd.f32 %v2334_v32, %v545_v30  ;;  %v2399_v38 = vpop.f32.mrf.mxu1 }
 0x128   : > { %v2336_v39 = vpop.f32.mrf.mxu0 }
 0x129   : > { %v3211_v41 = vadd.f32 %v2398_v34, %v1443_v37  ;;  %v2337_v42 = vadd.f32 %v2336_v39, %v2335_v36  ;;  %v2400_v43 = vpop.f32.mrf.mxu1 }
 0x12a   : > { %v2401_v46 = vadd.f32 %v2400_v43, %v2399_v38  ;;  %v2338_v47 = vpop.f32.mrf.mxu0 }
 0x12b   : > { %3319 = vst [vmem:[#allocation7_spill] sm:$0xff] %v3211_v41  ;;  %v1448_v48 = vadd.f32 %v2337_v42, %v550_v40  ;;  %v2402_v49 = vpop.f32.mrf.mxu1 }
 0x12c   : > { %v2339_v50 = vpop.f32.mrf.mxu0 }
 0x12d   : > { %v3213_v52 = vadd.f32 %v2401_v46, %v1448_v48  ;;  %v2340_v53 = vadd.f32 %v2339_v50, %v2338_v47  ;;  %v2403_v56 = vpop.f32.mrf.mxu1 }
 0x12e   : > { %v2404_v57 = vadd.f32 %v2403_v56, %v2402_v49  ;;  %v2421_v58 = vpop.f32.mrf.mxu0 }
 0x12f   : > { %3320 = vst [vmem:[#allocation8_spill] sm:$0xff] %v3213_v52  ;;  %v1451_v59 = vadd.f32 %v2340_v53, %v555_v51  ;;  %v2485_v60 = vpop.f32.mrf.mxu1 }
 0x130   : > { %v2422_v61 = vpop.f32.mrf.mxu0 }
 0x131   : > { %v3215_v62 = vadd.f32 %v2404_v57, %v1451_v59  ;;  %v2423_v0 = vadd.f32 %v2422_v61, %v2421_v58  ;;  %v2486_v2 = vpop.f32.mrf.mxu1 }
 0x132   : > { %v2424_v3 = vpop.f32.mrf.mxu0  ;;  %v2487_v5 = vadd.f32 %v2486_v2, %v2485_v60 }
 0x133   : > { %3321 = vst [vmem:[#allocation9_spill] sm:$0xff] %v3215_v62  ;;  %v1586_v4 = vadd.f32 %v2423_v0, %v3185_v45  ;;  %v3218_v6 = vpop.f32.mrf.mxu1 }
 0x134   : > { %v2425_v7 = vpop.f32.mrf.mxu0 }
 0x135   : > { %v3220_v9 = vpop.f32.mrf.mxu1  ;;  %v3222_v10 = vadd.f32 %v2487_v5, %v1586_v4  ;;  %v2426_v41 = vadd.f32 %v2425_v7, %v2424_v3 }
 0x136   : > { %v2427_v12 = vpop.f32.mrf.mxu0 }
 0x137   : > { %3322 = vst [vmem:[#allocation10_spill] sm:$0xff] %v3222_v10  ;;  %v2491_v13 = vpop.f32.mrf.mxu1  ;;  %v1589_v21 = vadd.f32 %v2426_v41, %v3187_v54 }
 0x138   : > { %v2428_v14 = vpop.f32.mrf.mxu0 }
 0x139   : > { %v2492_v15 = vpop.f32.mrf.mxu1  ;;  %v2429_v10 = vadd.f32 %v2428_v14, %v2427_v12  ;;  %v2490_v12 = vadd.f32 %v3220_v9, %v3218_v6 }
 0x13a   : > { %v2430_v16 = vpop.f32.mrf.mxu0  ;;  %v2493_v14 = vadd.f32 %v2492_v15, %v2491_v13 }
 0x13b   : > { %v2494_v18 = vpop.f32.mrf.mxu1 }
 0x13c   : > { %v2431_v19 = vpop.f32.mrf.mxu0 }
 0x13d   : > { %v2495_v20 = vpop.f32.mrf.mxu1  ;;  %v2432_v52 = vadd.f32 %v2431_v19, %v2430_v16 }
 0x13e   : > { %v2433_v22 = vpop.f32.mrf.mxu0  ;;  %v2496_v16 = vadd.f32 %v2495_v20, %v2494_v18 }
 0x13f   : > { %v2497_v23 = vpop.f32.mrf.mxu1 }
 0x140   : > { %v2434_v24 = vpop.f32.mrf.mxu0 }
 0x141   : > { %v2498_v45 = vpop.f32.mrf.mxu1 }
 0x142   : > { %v2436_v25 = vpop.f32.mrf.mxu0 }
 0x143   : > { %v3224_v27 = vpop.f32.mrf.mxu1 }
 0x144   : > { %v2437_v28 = vpop.f32.mrf.mxu0 }
 0x145   : > { %v3226_v29 = vpop.f32.mrf.mxu1  ;;  %v2438_v54 = vadd.f32 %v2437_v28, %v2436_v25 }
 0x146   : > { %v2439_v30 = vpop.f32.mrf.mxu0  ;;  %v3260_v9 = vadd.f32 %v3226_v29, %v3224_v27 }
 0x147   : > { %v3228_v32 = vpop.f32.mrf.mxu1 }
 0x148   : > { %v2440_v33 = vpop.f32.mrf.mxu0 }
 0x149   : > { %v2504_v34 = vpop.f32.mrf.mxu1  ;;  %v2441_v1 = vadd.f32 %v2440_v33, %v2439_v30 }
 0x14a   : > { %v2442_v36 = vpop.f32.mrf.mxu0  ;;  %v2505_v13 = vadd.f32 %v2504_v34, %v3228_v32 }
 0x14b   : > { %v3230_v37 = vpop.f32.mrf.mxu1 }
 0x14c   : > { %3323 = vst [vmem:[#allocation11_spill] sm:$0xff] %v3230_v37  ;;  %v2443_v38 = vpop.f32.mrf.mxu0 }
 0x14d   : > { %v3232_v39 = vpop.f32.mrf.mxu1  ;;  %v2444_v15 = vadd.f32 %v2443_v38, %v2442_v36 }
 0x14e   : > { %3324 = vst [vmem:[#allocation12_spill] sm:$0xff] %v3232_v39  ;;  %v2445_v40 = vpop.f32.mrf.mxu0  ;;  %v2435_v39 = vadd.f32 %v2434_v24, %v2433_v22  ;;  %v2499_v24 = vadd.f32 %v2498_v45, %v2497_v23  ;;  %v3331_v45 = vld [vmem:[#allocation5_spill] sm:$0xff] }
 0x14f   : > { %v3234_v42 = vpop.f32.mrf.mxu1 }
 0x150   : > { %3325 = vst [vmem:[#allocation13_spill] sm:$0xff] %v3234_v42  ;;  %v2446_v43 = vpop.f32.mrf.mxu0  ;;  %v1602_v3 = vadd.f32 %v2435_v39, %v3193_v17 }
 0x151   : > { %v2510_v46 = vpop.f32.mrf.mxu1  ;;  %v2447_v19 = vadd.f32 %v2446_v43, %v2445_v40 }
 0x152   : > { %v2448_v47 = vpop.f32.mrf.mxu0  ;;  %v3256_v6 = vadd.f32 %v2499_v24, %v1602_v3  ;;  %v3341_v24 = vld [vmem:[#allocation7_spill] sm:$0xff] }
 0x153   : > { %v2512_v48 = vpop.f32.mrf.mxu1  ;;  %v1618_v18 = vadd.f32 %v2447_v19, %v3201_v55 }
 0x154   : > { %v2449_v49 = vpop.f32.mrf.mxu0 }
 0x155   : > { %v2513_v50 = vpop.f32.mrf.mxu1  ;;  %v2450_v41 = vadd.f32 %v2449_v49, %v2448_v47 }
 0x156   : > { %v2451_v51 = vpop.f32.mrf.mxu0  ;;  %v2514_v47 = vadd.f32 %v2513_v50, %v2512_v48 }
 0x157   : > { %v2515_v53 = vpop.f32.mrf.mxu1  ;;  %v3332_v40 = vld [vmem:[#allocation13_spill] sm:$0xff] }
 0x158   : > { %v2452_v56 = vpop.f32.mrf.mxu0  ;;  %v2511_v43 = vadd.f32 %v2510_v46, %v3332_v40 }
 0x159   : > { %v2516_v57 = vpop.f32.mrf.mxu1  ;;  %v2453_v7 = vadd.f32 %v2452_v56, %v2451_v51  ;;  %v3333_v56 = vld [vmem:[#allocation3_spill] sm:$0xff] }
 0x15a   : > { %v2454_v58 = vpop.f32.mrf.mxu0  ;;  %v2517_v23 = vadd.f32 %v2516_v57, %v2515_v53 }
 0x15b   : > { %v2518_v59 = vpop.f32.mrf.mxu1  ;;  %v1626_v17 = vadd.f32 %v2453_v7, %v3205_v11 }
 0x15c   : > { %v2455_v60 = vpop.f32.mrf.mxu0 }
 0x15d   : > { %v2519_v61 = vpop.f32.mrf.mxu1  ;;  %v2456_v30 = vadd.f32 %v2455_v60, %v2454_v58  ;;  %v1723_v55 = vadd.f32 %v2517_v23, %v1626_v17  ;;  %v1613_v58 = vadd.f32 %v2444_v15, %v3333_v56  ;;  %v3334_v60 = vld [vmem:[#allocation11_spill] sm:$0xff]  ;;  %v3342_v15 = vld [vmem:[#allocation9_spill] sm:$0xff] }
 0x15e   : > { %v2457_v0 = vpop.f32.mrf.mxu0  ;;  %v2520_v32 = vadd.f32 %v2519_v61, %v2518_v59 }
 0x15f   : > { %v3236_v2 = vpop.f32.mrf.mxu1  ;;  %v1629_v25 = vadd.f32 %v2456_v30, %v3331_v45 }
 0x160   : > { %3326 = vst [vmem:[#allocation14_spill] sm:$0xff] %v3236_v2  ;;  %v2458_v4 = vpop.f32.mrf.mxu0  ;;  %v1594_v2 = vadd.f32 %v2429_v10, %v3189_v63  ;;  %v1610_v63 = vadd.f32 %v2441_v1, %v3197_v35  ;;  %v3329_v1 = vld [vmem:[#allocation2_spill] sm:$0xff] }
 0x161   : > { %v3238_v5 = vpop.f32.mrf.mxu1  ;;  %v3265_v20 = vadd.f32 %v2438_v54, %v3329_v1  ;;  %v2459_v34 = vadd.f32 %v2458_v4, %v2457_v0  ;;  %v3339_v0 = vld [vmem:[#allocation10_spill] sm:$0xff] }
 0x162   : > { %3327 = vst [vmem:[#allocation15_spill] sm:$0xff] %v3238_v5  ;;  %v2460_v62 = vpop.f32.mrf.mxu0  ;;  %v1597_v5 = vadd.f32 %v2432_v52, %v3191_v8  ;;  %v1686_v8 = vadd.f32 %v2490_v12, %v1589_v21  ;;  %v1691_v39 = vadd.f32 %v2493_v14, %v1594_v2  ;;  %v3330_v21 = vld [vmem:[#allocation4_spill] sm:$0xff]  ;;  %v1707_v49 = vadd.f32 %v2505_v13, %v1610_v63 }
 0x163   : > { %v3240_v31 = vpop.f32.mrf.mxu1  ;;  %v1621_v11 = vadd.f32 %v2450_v41, %v3330_v21  ;;  %v3335_v2 = vld [vmem:[#allocation12_spill] sm:$0xff] }
 0x164   : > { %3328 = vst [vmem:[#allocation16_spill] sm:$0xff] %v3240_v31  ;;  %v2461_v37 = vpop.f32.mrf.mxu0  ;;  %v1694_v51 = vadd.f32 %v2496_v16, %v1597_v5  ;;  %v2508_v53 = vadd.f32 %v3335_v2, %v3334_v60  ;;  %v1715_v5 = vadd.f32 %v2511_v43, %v1618_v18  ;;  %v3340_v16 = vld [vmem:[#allocation6_spill] sm:$0xff] }
 0x165   : > { %v3242_v44 = vpop.f32.mrf.mxu1  ;;  %v2462_v36 = vadd.f32 %v2461_v37, %v2460_v62  ;;  %v3338_v62 = vld [vmem:[#allocation8_spill] sm:$0xff]  ;;  %v1634_v19 = vadd.f32 %v2459_v34, %v3340_v16 }
 0x166   : > { %v2463_v42 = vpop.f32.mrf.mxu0 }
 0x167   : > { %v3245_v26 = vpop.f32.mrf.mxu1  ;;  %v3336_v50 = vld [vmem:[#allocation14_spill] sm:$0xff]  ;;  %v1637_v54 = vadd.f32 %v2462_v36, %v3341_v24  ;;  %v1710_v36 = vadd.f32 %v2508_v53, %v1613_v58 }
 0x168   : > { %v2464_v31 = vpop.f32.mrf.mxu0 }
 0x169   : > { %v2528_v22 = vpop.f32.mrf.mxu1  ;;  %v2465_v27 = vadd.f32 %v2464_v31, %v2463_v42  ;;  %v1726_v31 = vadd.f32 %v2520_v32, %v1629_v25  ;;  %v1718_v42 = vadd.f32 %v2514_v47, %v1621_v11  ;;  %v3337_v59 = vld [vmem:[#allocation15_spill] sm:$0xff] }
 0x16a   : > { %v2466_v33 = vpop.f32.mrf.mxu0  ;;  %v2523_v61 = vadd.f32 %v3337_v59, %v3336_v50  ;;  %v2529_v63 = vadd.f32 %v2528_v22, %v3245_v26 }
 0x16b   : > { %v3253_v10 = vpop.f32.mrf.mxu1  ;;  %v1642_v37 = vadd.f32 %v2465_v27, %v3338_v62 }
 0x16c   : > { %v2467_v52 = vpop.f32.mrf.mxu0  ;;  %v1731_v32 = vadd.f32 %v2523_v61, %v1634_v19 }
 0x16d   : > { %v2531_v35 = vpop.f32.mrf.mxu1  ;;  %v2468_v7 = vadd.f32 %v2467_v52, %v2466_v33  ;;  %v1739_v22 = vadd.f32 %v2529_v63, %v1642_v37 }
 0x16e   : > { %v2567_v28 = vpop.f32.mrf.mxu0 }
 0x16f   : > { %v2575_v29 = vpop.f32.mrf.mxu1  ;;  %v1788_v57 = vadd.f32 %v2567_v28, %v1691_v39  ;;  %v1645_v18 = vadd.f32 %v2468_v7, %v3342_v15 }
 0x170   : > { %v1779_v38 = vpop.f32.mrf.mxu0  ;;  %v1820_v46 = vadd.f32 %v2575_v29, %v1723_v55  ;;  %v3343_v55 = vld [vmem:[#allocation16_spill] sm:$0xff] }
 0x171   : > { %v1811_v3 = vpop.f32.mrf.mxu1  ;;  %v1780_v4 = vadd.f32 %v1779_v38, %v3339_v0  ;;  %v1844_v17 = vmax.f32 %v1788_v57, 0.0  ;;  %v2526_v38 = vadd.f32 %v3242_v44, %v3343_v55 }
 0x172   : > { %v2568_v48 = vpop.f32.mrf.mxu0  ;;  %v1812_v41 = vadd.f32 %v1811_v3, %v1715_v5  ;;  %v1852_v1 = vmax.f32 %v1820_v46, 0.0  ;;  %v1702_v3 = vadd.f32 %v3260_v9, %v3265_v20 }
 0x173   : > { %v1791_v12 = vadd.f32 %v2568_v48, %v1694_v51  ;;  %v2576_v14 = vpop.f32.mrf.mxu1  ;;  %v1842_v23 = vmax.f32 %v1780_v4, 0.0  ;;  %v1734_v53 = vadd.f32 %v2526_v38, %v1637_v54 }
 0x174   : > { %v1823_v30 = vadd.f32 %v2576_v14, %v1726_v31  ;;  %v1782_v33 = vpop.f32.mrf.mxu0  ;;  %v1850_v28 = vmax.f32 %v1812_v41, 0.0 }
 0x175   : > { %v1845_v52 = vmax.f32 %v1791_v12, 0.0  ;;  %v1783_v39 = vadd.f32 %v1782_v33, %v1686_v8  ;;  %v1814_v13 = vpop.f32.mrf.mxu1  ;;  %v2532_v8 = vadd.f32 %v2531_v35, %v3253_v10 }
 0x176   : > { %v1853_v51 = vmax.f32 %v1823_v30, 0.0  ;;  %v1815_v21 = vadd.f32 %v1814_v13, %v1718_v42  ;;  %v2571_v11 = vpop.f32.mrf.mxu0 }
 0x177   : > { %v2238_v45 = vpack.c.bf16 %v1845_v52, %v1844_v17  ;;  %v1843_v26 = vmax.f32 %v1783_v39, 0.0  ;;  %v2579_v25 = vpop.f32.mrf.mxu1  ;;  %v1804_v29 = vadd.f32 %v2571_v11, %v1707_v49  ;;  %v1742_v10 = vadd.f32 %v2532_v8, %v1645_v18 }
 0x178   : > { %v2258_v40 = vpack.c.bf16 %v1853_v51, %v1852_v1  ;;  %v1851_v43 = vmax.f32 %v1815_v21, 0.0  ;;  %v1795_v47 = vpop.f32.mrf.mxu0  ;;  %v1836_v60 = vadd.f32 %v2579_v25, %v1739_v22 }
 0x179   : > { %2270 = vst [vmem:[%s3285_s8 + $0x8] sm:$0xff] %v2238_v45   ;;  %v2233_v27 = vpack.c.bf16 %v1843_v26, %v1842_v23  ;;  %v1827_v34 = vpop.f32.mrf.mxu1  ;;  %v1796_v35 = vadd.f32 %v1795_v47, %v3256_v6  ;;  %v1848_v44 = vmax.f32 %v1804_v29, 0.0 }
 0x17a   : > { %2274 = vst [vmem:[%s3285_s8 + $0x28] sm:$0xff] %v2258_v40   ;;  %v2253_v56 = vpack.c.bf16 %v1851_v43, %v1850_v28  ;;  %v2572_v2 = vpop.f32.mrf.mxu0  ;;  %v1828_v49 = vadd.f32 %v1827_v34, %v1731_v32  ;;  %v1856_v42 = vmax.f32 %v1836_v60, 0.0 }
 0x17b   : > { %2234 = vst [vmem:[%s3285_s8] sm:$0xff] %v2233_v27   ;;  %v1807_v57 = vadd.f32 %v2572_v2, %v1710_v36  ;;  %v2580_v5 = vpop.f32.mrf.mxu1  ;;  %v1846_v59 = vmax.f32 %v1796_v35, 0.0 }
 0x17c   : > { %2273 = vst [vmem:[%s3285_s8 + $0x20] sm:$0xff] %v2253_v56   ;;  %v1839_v7 = vadd.f32 %v2580_v5, %v1742_v10  ;;  %v1798_v58 = vpop.f32.mrf.mxu0  ;;  %v1854_v9 = vmax.f32 %v1828_v49, 0.0 }
 0x17d   : > { %v1849_v46 = vmax.f32 %v1807_v57, 0.0  ;;  %v1799_v48 = vadd.f32 %v1798_v58, %v1702_v3  ;;  %v1830_v31 = vpop.f32.mrf.mxu1 }
 0x17e   : > { %v1857_v6 = vmax.f32 %v1839_v7, 0.0  ;;  %v1831_v50 = vadd.f32 %v1830_v31, %v1734_v53 }
 0x17f   : > { %v2248_v61 = vpack.c.bf16 %v1849_v46, %v1848_v44  ;;  %v1847_v62 = vmax.f32 %v1799_v48, 0.0 }
 0x180   : > { %v2268_v20 = vpack.c.bf16 %v1857_v6, %v1856_v42  ;;  %v1855_v37 = vmax.f32 %v1831_v50, 0.0 }
 0x181   : > { %2272 = vst [vmem:[%s3285_s8 + $0x18] sm:$0xff] %v2248_v61   ;;  %v2243_v0 = vpack.c.bf16 %v1847_v62, %v1846_v59 }
 0x182   : > { %2276 = vst [vmem:[%s3285_s8 + $0x38] sm:$0xff] %v2268_v20   ;;  %v2263_v4 = vpack.c.bf16 %v1855_v37, %v1854_v9 }
 0x183   : > { %2271 = vst [vmem:[%s3285_s8 + $0x10] sm:$0xff] %v2243_v0  }
 0x184   : > { %2275 = vst [vmem:[%s3285_s8 + $0x30] sm:$0xff] %v2263_v4  }
 0x185 PF: > { %s13_s14 = sadd.s32 1, %s2823_s14   ;;  %s3344_s12 = smov %s2819_s13 }
 0x186   : > { %p10_p5 = scmp.ge.s32.totalorder %s13_s14, 4   ;;  %s3345_s13 = smov %s3347_s15 }
 0x188   :  { %12 = sbr.rel (!%p10_p5) target bundleno = 2 (0x2), region = 68 }

// kernel: tile.23
= control target key start
LH: loop header
LB: loop body
LE: loop exit
PB: predicated region body
PF: predicated region fallthrough
CT: control target
= control target key end

     0   :  { %s22_s0 = inlined_call_operand.vmem [shape: f32[32], index: 0, kind: input, shape index: {}]   ;;  %s23_s1 = inlined_call_operand.vmem [shape: f32[4,32], index: 1, kind: output, shape index: {}]  }
   0x1   :  { %v4_v0 = vld [vmem:[%s22_s0] ss:$0 sm:$0xff] }
   0x2   :  { %5 = vst [vmem:[%s23_s1] sm:$0xf] %v4_v0 }

// kernel: forward.10
= control target key start
LH: loop header
LB: loop body
LE: loop exit
PB: predicated region body
PF: predicated region fallthrough
CT: control target
= control target key end

     0   :  { %s1464_s12 = smov 0   ;;  %s1466_s13 = smov 0   ;;  %s1663_s0 = inlined_call_operand.vmem [shape: bf16[128,640], index: 0, kind: input, shape index: {}]   ;;  %s1664_s1 = inlined_call_operand.vmem [shape: bf16[640,128], index: 1, kind: input, shape index: {}]   ;;  %s1665_s2 = inlined_call_operand.vmem [shape: f32[128,1], index: 2, kind: input, shape index: {}]   ;;  %s1666_s3 = inlined_call_operand.vmem [shape: bf16[128,128], index: 3, kind: output, shape index: {}]  }
   0x1   :  { %s1468_s14 = smov 0  }
   0x2 LB: > { %s25_s15 = sadd.s32 1, %s1437_s13  ;;  %p1083_p0 = scmp.ge.s32.totalorder %s1441_s14, 1  ;;  %s1441_s14 = sphi %s1468_s14, %s13_s14   ;;  %s1437_s13 = sphi %s1466_s13, %s1668_s13   ;;  %s1433_s12 = sphi %s1464_s12, %s1667_s12  }
   0x3   : > { %p27_p1 = scmp.ge.s32.totalorder %s25_s15, 2  ;;  %p173_p2 = scmp.lt.s32.totalorder %s1441_s14, 3 }
   0x5   : > { %s1670_s15 = smov (%p27_p1, %s25_s15), 0  ;;  %p174_p3 = pnand %p1083_p0, %p173_p2 }
   0x6   : > { %s1084_s23 = sshll.u32 (!%p174_p3), %s1433_s12, 3 }
   0x7   : > { %177 = sbr.rel (%p174_p3) target bundleno = 286 (0x11e), region = 32  ;;  %p211_p4 = scmp.lt.s32.totalorder (!%p174_p3), %s1084_s23, 15 }
   0xc   : > { %v1351_v0 = vld [vmem:[%s1664_s1 + $0x78] sm:$0xff]   ;;  %v1443_v4 = vmov 0   ;;  %v1355_v5 = vld [vmem:[%s1664_s1 + $0x70] sm:$0xff]   ;;  %v1359_v9 = vld [vmem:[%s1664_s1 + $0x68] sm:$0xff]   ;;  %s1672_s23 = smov (!%p211_p4, %s1084_s23), 15 }
   0xd   : > { %v1352_v1 = vld [vmem:[%s1664_s1 + $0xf8] sm:$0xff]   ;;  %1191 = vmatprep.subr.bf16.mxu0 %v1351_v0  ;;  %1349 = vset.pattern.permute.xlu0 %v1443_v4  ;;  %v1356_v6 = vld [vmem:[%s1664_s1 + $0xf0] sm:$0xff]   ;;  %v1360_v10 = vld [vmem:[%s1664_s1 + $0xe8] sm:$0xff]   ;;  %s1323_s22 = smul.u32 20, %s1672_s23  ;;  %s1087_s26 = sshll.u32 %s1672_s23, 3 }
   0xe   : > { %v1353_v2 = vld [vmem:[%s1664_s1 + $0x38] sm:$0xff]   ;;  %1231 = vmatprep.subr.bf16.mxu1 %v1352_v1  ;;  %1350 = vset.pattern.permute.xlu1 %v1443_v4  ;;  %v1357_v7 = vld [vmem:[%s1664_s1 + $0x30] sm:$0xff]   ;;  %v1361_v11 = vld [vmem:[%s1664_s1 + $0x28] sm:$0xff]   ;;  %s1625_s4 = scalar_lea.vmem %s1665_s2, %s1087_s26 }
   0xf   : > { %v1354_v3 = vld [vmem:[%s1664_s1 + $0xb8] sm:$0xff]   ;;  %1192 = vmatpush3.bf16.msra.mxu0 %v1353_v2  ;;  %v1358_v8 = vld [vmem:[%s1664_s1 + $0xb0] sm:$0xff]   ;;  %v1362_v12 = vld [vmem:[%s1664_s1 + $0xa8] sm:$0xff]   ;;  %s1581_s6 = scalar_lea.vmem %s1663_s0, %s1323_s22 }
  0x10   : > { %1232 = vmatpush3.bf16.msra.mxu1 %v1354_v3  ;;  %1193 = vmatprep.subr.bf16.mxu0 %v1355_v5  ;;  %v1363_v13 = vld [vmem:[%s1664_s1 + $0x60] sm:$0xff]   ;;  %v1367_v17 = vld [vmem:[%s1664_s1 + $0x58] sm:$0xff]   ;;  %v1371_v21 = vld [vmem:[%s1664_s1 + $0x50] sm:$0xff]  }
  0x11   : > { %1233 = vmatprep.subr.bf16.mxu1 %v1356_v6  ;;  %v1364_v14 = vld [vmem:[%s1664_s1 + $0xe0] sm:$0xff]   ;;  %v1368_v18 = vld [vmem:[%s1664_s1 + $0xd8] sm:$0xff]   ;;  %v1372_v22 = vld [vmem:[%s1664_s1 + $0xd0] sm:$0xff]  }
  0x12   : > { %v1365_v15 = vld [vmem:[%s1664_s1 + $0x20] sm:$0xff]   ;;  %v1369_v19 = vld [vmem:[%s1664_s1 + $0x18] sm:$0xff]   ;;  %v1373_v23 = vld [vmem:[%s1664_s1 + $0x10] sm:$0xff]  }
  0x13   : > { %1194 = vmatpush3.bf16.msra.mxu0 %v1357_v7  ;;  %v1366_v16 = vld [vmem:[%s1664_s1 + $0xa0] sm:$0xff]   ;;  %v1370_v20 = vld [vmem:[%s1664_s1 + $0x98] sm:$0xff]   ;;  %v1374_v24 = vld [vmem:[%s1664_s1 + $0x90] sm:$0xff]  }
  0x14   : > { %1234 = vmatpush3.bf16.msra.mxu1 %v1358_v8  ;;  %1195 = vmatprep.subr.bf16.mxu0 %v1359_v9  ;;  %v1375_v25 = vld [vmem:[%s1664_s1 + $0x48] sm:$0xff]   ;;  %v1379_v29 = vld [vmem:[%s1664_s1 + $0x40] sm:$0xff]   ;;  %v1389_v37 = vld [vmem:[%s1664_s1 + $0x138] sm:$0xff]  }
  0x15   : > { %1235 = vmatprep.subr.bf16.mxu1 %v1360_v10  ;;  %v1376_v26 = vld [vmem:[%s1664_s1 + $0xc8] sm:$0xff]   ;;  %v1380_v30 = vld [vmem:[%s1664_s1 + $0xc0] sm:$0xff]   ;;  %v1390_v38 = vld [vmem:[%s1664_s1 + $0x130] sm:$0xff]  }
  0x16   : > { %v1377_v27 = vld [vmem:[%s1664_s1 + $0x8] sm:$0xff]   ;;  %v1381_v31 = vld [vmem:[%s1664_s1] sm:$0xff]   ;;  %v1401_v46 = vld [vmem:[%s1581_s6 + $0x5c] ss:$20 sps:$4 sm:$0xff]  }
  0x17   : > { %1196 = vmatpush3.bf16.msra.mxu0 %v1361_v11  ;;  %v1378_v28 = vld [vmem:[%s1664_s1 + $0x88] sm:$0xff]   ;;  %v1382_v32 = vld [vmem:[%s1664_s1 + $0x80] sm:$0xff]   ;;  %v1405_v47 = vld [vmem:[%s1664_s1 + $0x118] sm:$0xff]  }
  0x18   : > { %1236 = vmatpush3.bf16.msra.mxu1 %v1362_v12  ;;  %1197 = vmatprep.subr.bf16.mxu0 %v1363_v13  ;;  %v1383_v33 = vld [vmem:[%s1581_s6] ss:$20 sps:$4 sm:$0xff]   ;;  %v1385_v34 = vld [vmem:[%s1581_s6 + $0x4] ss:$20 sps:$4 sm:$0xff]   ;;  %v1386_v35 = vld [vmem:[%s1581_s6 + $0x8] ss:$20 sps:$4 sm:$0xff]  }
  0x19   : > { %1237 = vmatprep.subr.bf16.mxu1 %v1364_v14  ;;  %v1388_v36 = vld [vmem:[%s1581_s6 + $0xc] ss:$20 sps:$4 sm:$0xff]   ;;  %765 = vmatprep.mubr.bf16.mxu0 %v1385_v34  ;;  %v1393_v40 = vld [vmem:[%s1581_s6 + $0x34] ss:$20 sps:$4 sm:$0xff]   ;;  %v1396_v43 = vld [vmem:[%s1581_s6 + $0x30] ss:$20 sps:$4 sm:$0xff]  }
  0x1a   : > { %830 = vmatprep.mubr.bf16.mxu1 %v1388_v36  ;;  %v1391_v39 = vld [vmem:[%s1581_s6 + $0x2c] ss:$20 sps:$4 sm:$0xff]   ;;  %v1395_v41 = vld [vmem:[%s1581_s6 + $0x28] ss:$20 sps:$4 sm:$0xff]   ;;  %v1403_v48 = vld [vmem:[%s1581_s6 + $0x50] ss:$20 sps:$4 sm:$0xff]  }
  0x1b   : > { %1198 = vmatpush3.bf16.msra.mxu0 %v1365_v15  ;;  %v1397_v42 = vld [vmem:[%s1664_s1 + $0x128] sm:$0xff]   ;;  %v1398_v45 = vld [vmem:[%s1664_s1 + $0x120] sm:$0xff]   ;;  %v1407_v50 = vld [vmem:[%s1581_s6 + $0x7c] ss:$20 sps:$4 sm:$0xff]  }
  0x1c   : > { %1238 = vmatpush3.bf16.msra.mxu1 %v1366_v16  ;;  %1199 = vmatprep.subr.bf16.mxu0 %v1367_v17  ;;  %v1399_v44 = vld [vmem:[%s1581_s6 + $0x54] ss:$20 sps:$4 sm:$0xff]   ;;  %v1404_v49 = vld [vmem:[%s1581_s6 + $0x58] ss:$20 sps:$4 sm:$0xff]   ;;  %v341_v53 = vld [vmem:[%s1625_s4] sm:$0xff] }
  0x1d   : > { %1239 = vmatprep.subr.bf16.mxu1 %v1368_v18  ;;  %v1409_v51 = vld [vmem:[%s1581_s6 + $0x84] ss:$20 sps:$4 sm:$0xff]   ;;  %v1406_v52 = vld [vmem:[%s1664_s1 + $0x110] sm:$0xff]   ;;  %v1413_v54 = vld [vmem:[%s1664_s1 + $0x108] sm:$0xff]   ;;  %351 = vperm.xlu0 %1349, %v341_v53  }
  0x1e   : > { %v343_v55 = vld [vmem:[%s1625_s4 + $0x10] sm:$0xff]  ;;  %v1411_v56 = vld [vmem:[%s1581_s6 + $0x78] ss:$20 sps:$4 sm:$0xff]   ;;  %v1414_v60 = vld [vmem:[%s1664_s1 + $0x100] sm:$0xff]  }
  0x1f   : > { %1200 = vmatpush3.bf16.msra.mxu0 %v1369_v19  ;;  %v1412_v57 = vld [vmem:[%s1581_s6 + $0x80] ss:$20 sps:$4 sm:$0xff]   ;;  %v1415_v58 = vld [vmem:[%s1581_s6 + $0x10] ss:$20 sps:$4 sm:$0xff]   ;;  %361 = vperm.xlu1 %1350, %v343_v55   ;;  %v342_v61 = vld [vmem:[%s1625_s4 + $0x8] sm:$0xff] }
  0x20   : > { %1240 = vmatpush3.bf16.msra.mxu1 %v1370_v20  ;;  %1201 = vmatprep.subr.bf16.mxu0 %v1371_v21  ;;  %v1416_v59 = vld [vmem:[%s1581_s6 + $0x60] ss:$20 sps:$4 sm:$0xff]   ;;  %v344_v62 = vld [vmem:[%s1625_s4 + $0x18] sm:$0xff]  ;;  %v346_v2 = vld [vmem:[%s1625_s4 + $0x28] sm:$0xff] }
  0x21   : > { %1241 = vmatprep.subr.bf16.mxu1 %v1372_v22  ;;  %356 = vperm.xlu0 %1349, %v342_v61   ;;  %v1417_v63 = vld [vmem:[%s1581_s6 + $0x38] ss:$20 sps:$4 sm:$0xff]   ;;  %v345_v0 = vld [vmem:[%s1625_s4 + $0x20] sm:$0xff]  ;;  %v1418_v1 = vld [vmem:[%s1581_s6 + $0x88] ss:$20 sps:$4 sm:$0xff]   ;;  %s1089_s6 = sshll.u32 %s1672_s23, 2 }
  0x22   : > { %v347_v3 = vld [vmem:[%s1625_s4 + $0x30] sm:$0xff]  ;;  %v348_v4 = vld [vmem:[%s1625_s4 + $0x38] sm:$0xff]  ;;  %s234_s11 = scalar_lea.vmem %s1666_s3, %s1089_s6 }
  0x23   : > { %1202 = vmatpush3.bf16.msra.mxu0 %v1373_v23  ;;  %366 = vperm.xlu1 %1350, %v344_v62  }
  0x24   : > { %1242 = vmatpush3.bf16.msra.mxu1 %v1374_v24  ;;  %1203 = vmatprep.subr.bf16.mxu0 %v1375_v25 }
  0x25   : > { %1243 = vmatprep.subr.bf16.mxu1 %v1376_v26  ;;  %371 = vperm.xlu0 %1349, %v345_v0  }
  0x27   : > { %1204 = vmatpush3.bf16.msra.mxu0 %v1377_v27  ;;  %376 = vperm.xlu1 %1350, %v346_v2  }
  0x28   : > { %1244 = vmatpush3.bf16.msra.mxu1 %v1378_v28  ;;  %1205 = vmatprep.subr.bf16.mxu0 %v1379_v29 }
  0x29   : > { %1245 = vmatprep.subr.bf16.mxu1 %v1380_v30  ;;  %381 = vperm.xlu0 %1349, %v347_v3  }
  0x2b   : > { %1206 = vmatpush3.bf16.msra.mxu0 %v1381_v31  ;;  %386 = vperm.xlu1 %1350, %v348_v4  }
  0x2c   : > { %1246 = vmatpush3.bf16.msra.mxu1 %v1382_v32  ;;  %1283 = vmatprep.subr.bf16.mxu0 %v1389_v37 }
  0x2d   : > { %1307 = vmatprep.subr.bf16.mxu1 %v1389_v37 }
  0x2e   : > { %766 = vmatmul.mubr.bf16.vlgmr.msra.gmra.mxu0 %v1383_v33 }
  0x2f   : > { %831 = vmatmul.mubr.bf16.vlgmr.msra.gmra.mxu1 %v1386_v35  ;;  %1284 = vmatpush3.bf16.msra.mxu0 %v1389_v37 }
  0x30   : > { %1315 = vmatpush3.bf16.msra.mxu1 %v1389_v37  ;;  %1285 = vmatprep.subr.bf16.mxu0 %v1390_v38 }
  0x31   : > { %1308 = vmatprep.subr.bf16.mxu1 %v1390_v38  ;;  %773 = vmatprep.mubr.bf16.mxu0 %v1391_v39 }
  0x32   : > { %838 = vmatprep.mubr.bf16.mxu1 %v1393_v40 }
  0x33   : > { %1286 = vmatpush3.bf16.msra.mxu0 %v1390_v38 }
  0x34   : > { %1316 = vmatpush3.bf16.msra.mxu1 %v1390_v38  ;;  %1287 = vmatprep.subr.bf16.mxu0 %v1397_v42 }
  0x35   : > { %1309 = vmatprep.subr.bf16.mxu1 %v1397_v42 }
  0x36   : > { %774 = vmatmul.mubr.bf16.gmra.mxu0 %v1395_v41 }
  0x37   : > { %839 = vmatmul.mubr.bf16.gmra.mxu1 %v1396_v43  ;;  %781 = vmatprep.mubr.bf16.mxu0 %v1399_v44 }
  0x38   : > { %1288 = vmatpush3.bf16.msra.mxu0 %v1397_v42  ;;  %846 = vmatprep.mubr.bf16.mxu1 %v1401_v46 }
  0x39   : > { %1317 = vmatpush3.bf16.msra.mxu1 %v1397_v42  ;;  %1289 = vmatprep.subr.bf16.mxu0 %v1398_v45 }
  0x3a   : > { %1310 = vmatprep.subr.bf16.mxu1 %v1398_v45 }
  0x3c   : > { %1290 = vmatpush3.bf16.msra.mxu0 %v1398_v45 }
  0x3d   : > { %1318 = vmatpush3.bf16.msra.mxu1 %v1398_v45  ;;  %1291 = vmatprep.subr.bf16.mxu0 %v1405_v47 }
  0x3e   : > { %782 = vmatmul.mubr.bf16.gmra.mxu0 %v1403_v48  ;;  %1311 = vmatprep.subr.bf16.mxu1 %v1405_v47 }
  0x3f   : > { %847 = vmatmul.mubr.bf16.gmra.mxu1 %v1404_v49  ;;  %789 = vmatprep.mubr.bf16.mxu0 %v1407_v50 }
  0x40   : > { %1292 = vmatpush3.bf16.msra.mxu0 %v1405_v47  ;;  %854 = vmatprep.mubr.bf16.mxu1 %v1409_v51 }
  0x41   : > { %1319 = vmatpush3.bf16.msra.mxu1 %v1405_v47  ;;  %1293 = vmatprep.subr.bf16.mxu0 %v1406_v52 }
  0x42   : > { %1312 = vmatprep.subr.bf16.mxu1 %v1406_v52 }
  0x44   : > { %1294 = vmatpush3.bf16.msra.mxu0 %v1406_v52 }
  0x45   : > { %1320 = vmatpush3.bf16.msra.mxu1 %v1406_v52  ;;  %1295 = vmatprep.subr.bf16.mxu0 %v1413_v54 }
  0x46   : > { %790 = vmatmul.mubr.bf16.gmra.mxu0 %v1411_v56  ;;  %1313 = vmatprep.subr.bf16.mxu1 %v1413_v54 }
  0x47   : > { %855 = vmatmul.mubr.bf16.gmra.mxu1 %v1412_v57  ;;  %1299 = vmatprep.mubr.bf16.mxu0 %v1415_v58 }
  0x48   : > { %1296 = vmatpush3.bf16.msra.mxu0 %v1413_v54  ;;  %1303 = vmatprep.mubr.bf16.mxu1 %v1416_v59 }
  0x49   : > { %1321 = vmatpush3.bf16.msra.mxu1 %v1413_v54  ;;  %1297 = vmatprep.subr.bf16.mxu0 %v1414_v60 }
  0x4a   : > { %1314 = vmatprep.subr.bf16.mxu1 %v1414_v60 }
  0x4c   : > { %1298 = vmatpush3.bf16.msra.mxu0 %v1414_v60 }
  0x4d   : > { %1322 = vmatpush3.bf16.msra.mxu1 %v1414_v60 }
  0x4f   : > { %1300 = vmatmul.mubr.bf16.vlgmr.msra.gmra.mxu0 %v1417_v63 }
  0x50   : > { %1304 = vmatmul.mubr.bf16.vlgmr.msra.gmra.mxu1 %v1418_v1 }
  0x98   : > { %v352_v17 = vpop.permute.xlu0 %351 }
  0x9a   : > { %v362_v20 = vpop.permute.xlu1 %361 }
  0x9c   : > { %v357_v25 = vpop.permute.xlu0 %356 }
  0x9e   : > { %v367_v28 = vpop.permute.xlu1 %366 }
  0xa0   : > { %v372_v31 = vpop.permute.xlu0 %371 }
  0xa2   : > { %v377_v37 = vpop.permute.xlu1 %376 }
  0xa4   : > { %v382_v43 = vpop.permute.xlu0 %381 }
  0xa6   : > { %v387_v58 = vpop.permute.xlu1 %386 }
  0xee   : > { %v1207_v5 = vpop.f32.mrf.mxu0 }
  0xef   : > { %v1247_v6 = vpop.f32.mrf.mxu1 }
  0xf0   : > { %v1208_v7 = vpop.f32.mrf.mxu0 }
  0xf1   : > { %v1248_v8 = vpop.f32.mrf.mxu1  ;;  %v1209_v41 = vadd.f32 %v1208_v7, %v1207_v5 }
  0xf2   : > { %v1210_v9 = vpop.f32.mrf.mxu0  ;;  %v1249_v0 = vadd.f32 %v1248_v8, %v1247_v6 }
  0xf3   : > { %v1647_v10 = vpop.f32.mrf.mxu1  ;;  %v768_v55 = vadd.f32 %v1209_v41, %v352_v17 }
  0xf4   : > { %v1211_v11 = vpop.f32.mrf.mxu0 }
  0xf5   : > { %v1251_v12 = vpop.f32.mrf.mxu1  ;;  %v1212_v48 = vadd.f32 %v1211_v11, %v1210_v9 }
  0xf6   : > { %v1213_v13 = vpop.f32.mrf.mxu0 }
  0xf7   : > { %v1253_v14 = vpop.f32.mrf.mxu1  ;;  %v771_v1 = vadd.f32 %v1212_v48, %v357_v25 }
  0xf8   : > { %v1214_v15 = vpop.f32.mrf.mxu0 }
  0xf9   : > { %v1254_v16 = vpop.f32.mrf.mxu1  ;;  %v1215_v36 = vadd.f32 %v1214_v15, %v1213_v13  ;;  %v1252_v13 = vadd.f32 %v1251_v12, %v1647_v10  ;;  %v833_v15 = vadd.f32 %v1249_v0, %v768_v55 }
  0xfa   : > { %v1216_v18 = vpop.f32.mrf.mxu0  ;;  %v1255_v56 = vadd.f32 %v1254_v16, %v1253_v14 }
  0xfb   : > { %v1256_v19 = vpop.f32.mrf.mxu1  ;;  %v776_v49 = vadd.f32 %v1215_v36, %v362_v20 }
  0xfc   : > { %v1217_v21 = vpop.f32.mrf.mxu0 }
  0xfd   : > { %v1257_v22 = vpop.f32.mrf.mxu1  ;;  %v1218_v42 = vadd.f32 %v1217_v21, %v1216_v18  ;;  %v841_v3 = vadd.f32 %v1255_v56, %v776_v49 }
  0xfe   : > { %v1219_v23 = vpop.f32.mrf.mxu0  ;;  %v1258_v2 = vadd.f32 %v1257_v22, %v1256_v19  ;;  %v836_v22 = vadd.f32 %v1252_v13, %v771_v1 }
  0xff   : > { %v1259_v24 = vpop.f32.mrf.mxu1  ;;  %v779_v57 = vadd.f32 %v1218_v42, %v367_v28 }
 0x100   : > { %v1220_v26 = vpop.f32.mrf.mxu0 }
 0x101   : > { %v1260_v27 = vpop.f32.mrf.mxu1  ;;  %v1221_v45 = vadd.f32 %v1220_v26, %v1219_v23  ;;  %v844_v17 = vadd.f32 %v1258_v2, %v779_v57 }
 0x102   : > { %v1222_v29 = vpop.f32.mrf.mxu0  ;;  %v1261_v5 = vadd.f32 %v1260_v27, %v1259_v24 }
 0x103   : > { %v1262_v30 = vpop.f32.mrf.mxu1  ;;  %v784_v59 = vadd.f32 %v1221_v45, %v372_v31 }
 0x104   : > { %v1223_v32 = vpop.f32.mrf.mxu0 }
 0x105   : > { %v1263_v33 = vpop.f32.mrf.mxu1  ;;  %v1224_v51 = vadd.f32 %v1223_v32, %v1222_v29  ;;  %v849_v21 = vadd.f32 %v1261_v5, %v784_v59 }
 0x106   : > { %v1225_v34 = vpop.f32.mrf.mxu0  ;;  %v1264_v18 = vadd.f32 %v1263_v33, %v1262_v30 }
 0x107   : > { %v1265_v35 = vpop.f32.mrf.mxu1  ;;  %v787_v7 = vadd.f32 %v1224_v51, %v377_v37 }
 0x108   : > { %v1226_v38 = vpop.f32.mrf.mxu0 }
 0x109   : > { %v1227_v39 = vadd.f32 %v1226_v38, %v1225_v34  ;;  %v1266_v40 = vpop.f32.mrf.mxu1  ;;  %v852_v27 = vadd.f32 %v1264_v18, %v787_v7 }
 0x10a   : > { %v1228_v44 = vpop.f32.mrf.mxu0  ;;  %v1267_v52 = vadd.f32 %v1266_v40, %v1265_v35 }
 0x10b   : > { %v792_v46 = vadd.f32 %v1227_v39, %v382_v43  ;;  %v1268_v47 = vpop.f32.mrf.mxu1 }
 0x10c   : > { %v1229_v50 = vpop.f32.mrf.mxu0 }
 0x10d   : > { %v1230_v53 = vadd.f32 %v1229_v50, %v1228_v44  ;;  %v1269_v54 = vpop.f32.mrf.mxu1  ;;  %v857_v63 = vadd.f32 %v1267_v52, %v792_v46 }
 0x10e   : > { %v1270_v61 = vadd.f32 %v1269_v54, %v1268_v47 }
 0x10f   : > { %v795_v60 = vadd.f32 %v1230_v53, %v387_v58  ;;  %v1301_v62 = vpop.f32.mrf.mxu0 }
 0x110   : > { %v1305_v4 = vpop.f32.mrf.mxu1  ;;  %v906_v14 = vadd.f32 %v1301_v62, %v841_v3 }
 0x111   : > { %v897_v9 = vpop.f32.mrf.mxu0  ;;  %v860_v11 = vadd.f32 %v1270_v61, %v795_v60  ;;  %v922_v20 = vadd.f32 %v1305_v4, %v857_v63 }
 0x112   : > { %v913_v16 = vpop.f32.mrf.mxu1  ;;  %v898_v6 = vadd.f32 %v897_v9, %v833_v15  ;;  %v930_v28 = vmax.f32 %v906_v14, 0.0 }
 0x113   : > { %v1302_v23 = vpop.f32.mrf.mxu0  ;;  %v914_v25 = vadd.f32 %v913_v16, %v849_v21  ;;  %v934_v31 = vmax.f32 %v922_v20, 0.0 }
 0x114   : > { %v909_v8 = vadd.f32 %v1302_v23, %v844_v17  ;;  %v1306_v19 = vpop.f32.mrf.mxu1  ;;  %v928_v33 = vmax.f32 %v898_v6, 0.0 }
 0x115   : > { %v925_v24 = vadd.f32 %v1306_v19, %v860_v11  ;;  %v900_v26 = vpop.f32.mrf.mxu0  ;;  %v932_v36 = vmax.f32 %v914_v25, 0.0 }
 0x116   : > { %v931_v29 = vmax.f32 %v909_v8, 0.0  ;;  %v901_v10 = vadd.f32 %v900_v26, %v836_v22  ;;  %v916_v12 = vpop.f32.mrf.mxu1 }
 0x117   : > { %v935_v30 = vmax.f32 %v925_v24, 0.0  ;;  %v917_v32 = vadd.f32 %v916_v12, %v852_v27 }
 0x118   : > { %v1176_v34 = vpack.c.bf16 %v931_v29, %v930_v28  ;;  %v929_v35 = vmax.f32 %v901_v10, 0.0 }
 0x119   : > { %v1186_v37 = vpack.c.bf16 %v935_v30, %v934_v31  ;;  %v933_v38 = vmax.f32 %v917_v32, 0.0 }
 0x11a   : > { %1188 = vst [vmem:[%s234_s11 + $0x8] sm:$0xff] %v1176_v34   ;;  %v1171_v39 = vpack.c.bf16 %v929_v35, %v928_v33 }
 0x11b   : > { %1190 = vst [vmem:[%s234_s11 + $0x18] sm:$0xff] %v1186_v37   ;;  %v1181_v40 = vpack.c.bf16 %v933_v38, %v932_v36 }
 0x11c   : > { %1172 = vst [vmem:[%s234_s11] sm:$0xff] %v1171_v39  }
 0x11d   : > { %1189 = vst [vmem:[%s234_s11 + $0x10] sm:$0xff] %v1181_v40  }
 0x11e PF: > { %s13_s14 = sadd.s32 1, %s1441_s14   ;;  %s1667_s12 = smov %s1437_s13 }
 0x11f   : > { %p10_p5 = scmp.ge.s32.totalorder %s13_s14, 4   ;;  %s1668_s13 = smov %s1670_s15 }
 0x121   :  { %12 = sbr.rel (!%p10_p5) target bundleno = 2 (0x2), region = 68 }

// kernel: tile.28
= control target key start
LH: loop header
LB: loop body
LE: loop exit
PB: predicated region body
PF: predicated region fallthrough
CT: control target
= control target key end

     0   :  { %s22_s0 = inlined_call_operand.vmem [shape: f32[3], index: 0, kind: input, shape index: {}]   ;;  %s23_s1 = inlined_call_operand.vmem [shape: f32[4,3], index: 1, kind: output, shape index: {}]  }
   0x1   :  { %v4_v0 = vld [vmem:[%s22_s0] ss:$0 sm:$0xff] }
   0x2   :  { %5 = vst [vmem:[%s23_s1] sm:$0xf] %v4_v0 }

// kernel: tile.29
= control target key start
LH: loop header
LB: loop body
LE: loop exit
PB: predicated region body
PF: predicated region fallthrough
CT: control target
= control target key end

     0   :  { %vm8_vm0 = vcmask 23552   ;;  %s40_s8 = smov 3   ;;  %s41_s9 = smov 6   ;;  %vm14_vm1 = vcmask 97352   ;;  %vm20_vm2 = vcmask 72752   ;;  %vm26_vm3 = vcmask 48152   ;;  %s58_s0 = inlined_call_operand.vmem [shape: f32[4,3], index: 0, kind: input, shape index: {}]   ;;  %s59_s1 = inlined_call_operand.vmem [shape: f32[12], index: 1, kind: output, shape index: {}]  }
   0x1   :  { %v5_v0 = vld [vmem:[%s58_s0] sm:$0xf]  ;;  %s39_s0 = smov 9  }
   0x2   :  { %6 = vst [vmem:[#allocation1] sm:$0xf] %v5_v0 }
   0x9   :  { %v11_v1 = vld [vmem:[#allocation1 + $0x3] sm:$0x1]   ;;  %v23_v2 = vld [vmem:[#allocation1 + $0x1] sm:$0x1]   ;;  %v7_v3 = vld [vmem:[#allocation1] sm:$0x1]  }
   0xa   :  { %12 = vrot.lane.b32.xlu0 %v11_v1, %s39_s0  ;;  %24 = vrot.lane.b32.xlu1 %v23_v2, %s40_s8  ;;  %v17_v4 = vld [vmem:[#allocation1 + $0x2] sm:$0x1]   ;;  %9 = vst.msk [vmem:[#allocation0] sm:$0x1] %vm8_vm0, %v7_v3  }
   0xe   :  { %18 = vrot.lane.b32.xlu0 %v17_v4, %s41_s9 }
  0x7c   :  { %v13_v5 = vpop.permute.xlu0 %12   ;;  %v25_v6 = vpop.permute.xlu1 %24  }
  0x7d   :  { %15 = vst.msk [vmem:[#allocation0] sm:$0x1] %vm14_vm1, %v13_v5  }
  0x80   :  { %v19_v7 = vpop.permute.xlu0 %18  }
  0x81   :  { %21 = vst.msk [vmem:[#allocation0] sm:$0x1] %vm20_vm2, %v19_v7  }
  0x82   :  { %27 = vst.msk [vmem:[#allocation0] sm:$0x1] %vm26_vm3, %v25_v6  }
  0x89   :  { %v32_v8 = vld [vmem:[#allocation0] sm:$0x1] }
  0x8a   :  { %35 = vst [vmem:[%s59_s1] sm:$0x1] %v32_v8 }

// kernel: forward.11
= control target key start
LH: loop header
LB: loop body
LE: loop exit
PB: predicated region body
PF: predicated region fallthrough
CT: control target
= control target key end

     0   :  { %s1291_s12 = smov 0   ;;  %s1293_s13 = smov 0   ;;  %s1532_s0 = inlined_call_operand.vmem [shape: bf16[16,384], index: 0, kind: input, shape index: {}]   ;;  %s1533_s1 = inlined_call_operand.vmem [shape: bf16[384,512], index: 1, kind: input, shape index: {}]   ;;  %s1534_s2 = inlined_call_operand.vmem [shape: f32[16,1], index: 2, kind: input, shape index: {}]   ;;  %s1535_s3 = inlined_call_operand.vmem [shape: f32[16,512], index: 3, kind: output, shape index: {}]  }
   0x1   :  { %s1295_s14 = smov 0   ;;  %s1297_s15 = smov 0  }
   0x2   :  { %s1299_s16 = smov 0  }
   0x3 LB: > { %s22_s17 = sadd.s32 1, %s1264_s15  ;;  %s1022_s18 = sadd.s32 4294967295, %s1268_s16   ;;  %s1268_s16 = sphi %s1299_s16, %s13_s16   ;;  %s1264_s15 = sphi %s1297_s15, %s1540_s15   ;;  %s1260_s14 = sphi %s1295_s14, %s1539_s14   ;;  %s1256_s13 = sphi %s1293_s13, %s1538_s13   ;;  %s1252_s12 = sphi %s1291_s12, %s1537_s12  }
   0x4   : > { %p23_p0 = scmp.ge.s32.totalorder %s22_s17, 2  ;;  %p65_p1 = scmp.ne.s32.totalorder %s1256_s13, %s1252_s12 }
   0x5   : > { %p66_p2 = scmp.eq.s32.totalorder %s1268_s16, 0  ;;  %p123_p4 = scmp.eq.s32.totalorder %s1022_s18, 1 }
   0x6   : > { %s1542_s17 = smov (%p23_p0, %s22_s17), 0  ;;  %s58_s20 = sadd.s32 1, %s1256_s13 }
   0x7   : > { %p67_p3 = por %p66_p2, %p65_p1  ;;  %s55_s19 = ssub.s32 %s1264_s15, %s1542_s17 }
   0x8   : > { %p56_p5 = scmp.eq.s32.totalorder %s55_s19, 0  ;;  %p1326_p6 = por %p123_p4, %p65_p1 }
   0x9   : > { %p1027_p7 = scmp.ge.s32.totalorder %s1268_s16, 2 }
   0xa   : > { %s1331_s22 = scalar_select %p56_p5, %s1256_s13, %s58_s20  }
   0xb   : > { %164 = sbr.rel (%p1027_p7) target bundleno = 44 (0x2c), region = 24 }
  0x10   : > { %167 = sbr.rel (!%p67_p3) target bundleno = 44 (0x2c), region = 28  ;;  %s169_s23 = sand.u32 (%p67_p3), 1, %s1256_s13  }
  0x11   : > { %s1092_s24 = sshll.u32 (%p67_p3), %s1264_s15, 3  ;;  %s1094_s25 = smul.u32 (%p67_p3), 384, %s169_s23 }
  0x12   : > { %s1339_s28 = scalar_lea.vmem (%p67_p3), %s1533_s1, %s1092_s24 }
  0x13   : > { %v297_v0 = vld [vmem:[%s1339_s28] sm:$0xff] (%p67_p3)  ;;  %v299_v1 = vld [vmem:[%s1339_s28 + $0x10] sm:$0xff] (%p67_p3)  ;;  %s1347_s29 = scalar_lea.vmem (%p67_p3), [#allocation2], %s1094_s25 }
  0x14   : > { %v301_v2 = vld [vmem:[%s1339_s28 + $0x20] sm:$0xff] (%p67_p3)  ;;  %v303_v3 = vld [vmem:[%s1339_s28 + $0x30] sm:$0xff] (%p67_p3)  ;;  %298 = vst [vmem:[%s1347_s29] sm:$0xff] (%p67_p3), %v297_v0  ;;  %300 = vst [vmem:[%s1347_s29 + $0x8] sm:$0xff] (%p67_p3), %v299_v1 }
  0x15   : > { %v305_v4 = vld [vmem:[%s1339_s28 + $0x40] sm:$0xff]  ;;  %v307_v5 = vld [vmem:[%s1339_s28 + $0x50] sm:$0xff]  ;;  %302 = vst [vmem:[%s1347_s29 + $0x10] sm:$0xff] %v301_v2  ;;  %304 = vst [vmem:[%s1347_s29 + $0x18] sm:$0xff] %v303_v3 }
  0x16   : > { %306 = vst [vmem:[%s1347_s29 + $0x20] sm:$0xff] %v305_v4  ;;  %308 = vst [vmem:[%s1347_s29 + $0x28] sm:$0xff] %v307_v5  ;;  %v309_v6 = vld [vmem:[%s1339_s28 + $0x60] sm:$0xff]  ;;  %v311_v7 = vld [vmem:[%s1339_s28 + $0x70] sm:$0xff] }
  0x17   : > { %v313_v8 = vld [vmem:[%s1339_s28 + $0x80] sm:$0xff]  ;;  %310 = vst [vmem:[%s1347_s29 + $0x30] sm:$0xff] %v309_v6  ;;  %312 = vst [vmem:[%s1347_s29 + $0x38] sm:$0xff] %v311_v7  ;;  %v315_v9 = vld [vmem:[%s1339_s28 + $0x90] sm:$0xff] }
  0x18   : > { %314 = vst [vmem:[%s1347_s29 + $0x40] sm:$0xff] %v313_v8  ;;  %v317_v10 = vld [vmem:[%s1339_s28 + $0xa0] sm:$0xff]  ;;  %v319_v11 = vld [vmem:[%s1339_s28 + $0xb0] sm:$0xff]  ;;  %316 = vst [vmem:[%s1347_s29 + $0x48] sm:$0xff] %v315_v9 }
  0x19   : > { %318 = vst [vmem:[%s1347_s29 + $0x50] sm:$0xff] %v317_v10  ;;  %320 = vst [vmem:[%s1347_s29 + $0x58] sm:$0xff] %v319_v11  ;;  %v321_v12 = vld [vmem:[%s1339_s28 + $0xc0] sm:$0xff]  ;;  %v323_v13 = vld [vmem:[%s1339_s28 + $0xd0] sm:$0xff] }
  0x1a   : > { %v325_v14 = vld [vmem:[%s1339_s28 + $0xe0] sm:$0xff]  ;;  %322 = vst [vmem:[%s1347_s29 + $0x60] sm:$0xff] %v321_v12  ;;  %324 = vst [vmem:[%s1347_s29 + $0x68] sm:$0xff] %v323_v13  ;;  %v327_v15 = vld [vmem:[%s1339_s28 + $0xf0] sm:$0xff] }
  0x1b   : > { %326 = vst [vmem:[%s1347_s29 + $0x70] sm:$0xff] %v325_v14  ;;  %v329_v16 = vld [vmem:[%s1339_s28 + $0x100] sm:$0xff]  ;;  %v331_v17 = vld [vmem:[%s1339_s28 + $0x110] sm:$0xff]  ;;  %328 = vst [vmem:[%s1347_s29 + $0x78] sm:$0xff] %v327_v15 }
  0x1c   : > { %330 = vst [vmem:[%s1347_s29 + $0x80] sm:$0xff] %v329_v16  ;;  %332 = vst [vmem:[%s1347_s29 + $0x88] sm:$0xff] %v331_v17  ;;  %v333_v18 = vld [vmem:[%s1339_s28 + $0x120] sm:$0xff]  ;;  %v335_v19 = vld [vmem:[%s1339_s28 + $0x130] sm:$0xff] }
  0x1d   : > { %v337_v20 = vld [vmem:[%s1339_s28 + $0x140] sm:$0xff]  ;;  %334 = vst [vmem:[%s1347_s29 + $0x90] sm:$0xff] %v333_v18  ;;  %336 = vst [vmem:[%s1347_s29 + $0x98] sm:$0xff] %v335_v19  ;;  %v339_v21 = vld [vmem:[%s1339_s28 + $0x150] sm:$0xff] }
  0x1e   : > { %338 = vst [vmem:[%s1347_s29 + $0xa0] sm:$0xff] %v337_v20  ;;  %v341_v22 = vld [vmem:[%s1339_s28 + $0x160] sm:$0xff]  ;;  %v343_v23 = vld [vmem:[%s1339_s28 + $0x170] sm:$0xff]  ;;  %340 = vst [vmem:[%s1347_s29 + $0xa8] sm:$0xff] %v339_v21 }
  0x1f   : > { %342 = vst [vmem:[%s1347_s29 + $0xb0] sm:$0xff] %v341_v22  ;;  %344 = vst [vmem:[%s1347_s29 + $0xb8] sm:$0xff] %v343_v23  ;;  %v345_v24 = vld [vmem:[%s1339_s28 + $0x180] sm:$0xff]  ;;  %v347_v25 = vld [vmem:[%s1339_s28 + $0x190] sm:$0xff] }
  0x20   : > { %v349_v26 = vld [vmem:[%s1339_s28 + $0x1a0] sm:$0xff]  ;;  %346 = vst [vmem:[%s1347_s29 + $0xc0] sm:$0xff] %v345_v24  ;;  %348 = vst [vmem:[%s1347_s29 + $0xc8] sm:$0xff] %v347_v25  ;;  %v351_v27 = vld [vmem:[%s1339_s28 + $0x1b0] sm:$0xff] }
  0x21   : > { %350 = vst [vmem:[%s1347_s29 + $0xd0] sm:$0xff] %v349_v26  ;;  %v353_v28 = vld [vmem:[%s1339_s28 + $0x1c0] sm:$0xff]  ;;  %v355_v29 = vld [vmem:[%s1339_s28 + $0x1d0] sm:$0xff]  ;;  %352 = vst [vmem:[%s1347_s29 + $0xd8] sm:$0xff] %v351_v27 }
  0x22   : > { %354 = vst [vmem:[%s1347_s29 + $0xe0] sm:$0xff] %v353_v28  ;;  %356 = vst [vmem:[%s1347_s29 + $0xe8] sm:$0xff] %v355_v29  ;;  %v357_v30 = vld [vmem:[%s1339_s28 + $0x1e0] sm:$0xff]  ;;  %v359_v31 = vld [vmem:[%s1339_s28 + $0x1f0] sm:$0xff] }
  0x23   : > { %v361_v32 = vld [vmem:[%s1339_s28 + $0x200] sm:$0xff]  ;;  %358 = vst [vmem:[%s1347_s29 + $0xf0] sm:$0xff] %v357_v30  ;;  %360 = vst [vmem:[%s1347_s29 + $0xf8] sm:$0xff] %v359_v31  ;;  %v363_v33 = vld [vmem:[%s1339_s28 + $0x210] sm:$0xff] }
  0x24   : > { %362 = vst [vmem:[%s1347_s29 + $0x100] sm:$0xff] %v361_v32  ;;  %v365_v34 = vld [vmem:[%s1339_s28 + $0x220] sm:$0xff]  ;;  %v367_v35 = vld [vmem:[%s1339_s28 + $0x230] sm:$0xff]  ;;  %364 = vst [vmem:[%s1347_s29 + $0x108] sm:$0xff] %v363_v33 }
  0x25   : > { %366 = vst [vmem:[%s1347_s29 + $0x110] sm:$0xff] %v365_v34  ;;  %368 = vst [vmem:[%s1347_s29 + $0x118] sm:$0xff] %v367_v35  ;;  %v369_v36 = vld [vmem:[%s1339_s28 + $0x240] sm:$0xff]  ;;  %v371_v37 = vld [vmem:[%s1339_s28 + $0x250] sm:$0xff] }
  0x26   : > { %v373_v38 = vld [vmem:[%s1339_s28 + $0x260] sm:$0xff]  ;;  %370 = vst [vmem:[%s1347_s29 + $0x120] sm:$0xff] %v369_v36  ;;  %372 = vst [vmem:[%s1347_s29 + $0x128] sm:$0xff] %v371_v37  ;;  %v375_v39 = vld [vmem:[%s1339_s28 + $0x270] sm:$0xff] }
  0x27   : > { %374 = vst [vmem:[%s1347_s29 + $0x130] sm:$0xff] %v373_v38  ;;  %v377_v40 = vld [vmem:[%s1339_s28 + $0x280] sm:$0xff]  ;;  %v379_v41 = vld [vmem:[%s1339_s28 + $0x290] sm:$0xff]  ;;  %376 = vst [vmem:[%s1347_s29 + $0x138] sm:$0xff] %v375_v39 }
  0x28   : > { %378 = vst [vmem:[%s1347_s29 + $0x140] sm:$0xff] %v377_v40  ;;  %380 = vst [vmem:[%s1347_s29 + $0x148] sm:$0xff] %v379_v41  ;;  %v381_v42 = vld [vmem:[%s1339_s28 + $0x2a0] sm:$0xff]  ;;  %v383_v43 = vld [vmem:[%s1339_s28 + $0x2b0] sm:$0xff] }
  0x29   : > { %v385_v44 = vld [vmem:[%s1339_s28 + $0x2c0] sm:$0xff]  ;;  %382 = vst [vmem:[%s1347_s29 + $0x150] sm:$0xff] %v381_v42  ;;  %384 = vst [vmem:[%s1347_s29 + $0x158] sm:$0xff] %v383_v43  ;;  %v387_v45 = vld [vmem:[%s1339_s28 + $0x2d0] sm:$0xff] }
  0x2a   : > { %386 = vst [vmem:[%s1347_s29 + $0x160] sm:$0xff] %v385_v44  ;;  %v389_v46 = vld [vmem:[%s1339_s28 + $0x2e0] sm:$0xff]  ;;  %v391_v47 = vld [vmem:[%s1339_s28 + $0x2f0] sm:$0xff]  ;;  %388 = vst [vmem:[%s1347_s29 + $0x168] sm:$0xff] %v387_v45 }
  0x2b   : > { %390 = vst [vmem:[%s1347_s29 + $0x170] sm:$0xff] %v389_v46  ;;  %392 = vst [vmem:[%s1347_s29 + $0x178] sm:$0xff] %v391_v47 }
  0x2c PF: > { %p1030_p8 = scmp.ge.s32.totalorder %s1268_s16, 1  ;;  %p397_p9 = scmp.lt.s32.totalorder %s1268_s16, 3 }
  0x2e   : > { %p398_p10 = pnand %p1030_p8, %p397_p9 }
  0x2f   : > { %s404_s30 = sand.u32 (!%p398_p10), 1, %s1252_s12  }
  0x30   : > { %401 = sbr.rel (%p398_p10) target bundleno = 364 (0x16c), region = 66  ;;  %s1031_s24 = sshll.u32 (!%p398_p10), %s404_s30, 5 }
  0x31   : > { %s1095_s4 = smul.u32 (!%p398_p10), 384, %s404_s30  ;;  %s436_s25 = scalar_lea.vmem (!%p398_p10), [#allocation3], %s1031_s24 }
  0x33   : > { %s1453_s11 = scalar_lea.vmem (!%p398_p10), [#allocation2], %s1095_s4 }
  0x35   : > { %v1270_v48 = vmov 0   ;;  %v1213_v49 = vld [vmem:[%s1532_s0 + $0x4] ss:$12 sps:$4 sm:$0xff]   ;;  %v507_v51 = vld [vmem:[%s1534_s2 + $0x8] sm:$0xff]  ;;  %v1138_v52 = vld [vmem:[%s1453_s11 + $0x74] ss:$8 sps:$4 sm:$0xff]  }
  0x36   : > { %849 = vmatprep.mubr.bf16.mxu1 %v1270_v48  ;;  %1137 = vset.pattern.permute.xlu0 %v1270_v48  ;;  %v506_v50 = vld [vmem:[%s1534_s2] sm:$0xff]  ;;  %v1140_v53 = vld [vmem:[%s1453_s11 + $0x70] ss:$8 sps:$4 sm:$0xff]   ;;  %v1144_v56 = vld [vmem:[%s1453_s11 + $0x54] ss:$8 sps:$4 sm:$0xff]   ;;  %s1093_s26 = sshll.u32 (%p1326_p6), %s1260_s14, 4 }
  0x37   : > { %510 = vperm.xlu0 %1137, %v506_v50   ;;  %806 = vmatprep.mubr.bf16.mxu0 %v1213_v49  ;;  %v1141_v54 = vld [vmem:[%s1453_s11 + $0x64] ss:$8 sps:$4 sm:$0xff]   ;;  %v1143_v55 = vld [vmem:[%s1453_s11 + $0x60] ss:$8 sps:$4 sm:$0xff]   ;;  %v1146_v57 = vld [vmem:[%s1453_s11 + $0x50] ss:$8 sps:$4 sm:$0xff]   ;;  %s900_s28 = scalar_lea.vmem (%p1326_p6), %s1535_s3, %s1093_s26 }
  0x38   : > { %774 = vmatprep.subr.bf16.mxu0 %v1138_v52  ;;  %v1147_v58 = vld [vmem:[%s1453_s11 + $0x44] ss:$8 sps:$4 sm:$0xff]   ;;  %v1149_v59 = vld [vmem:[%s1453_s11 + $0x40] ss:$8 sps:$4 sm:$0xff]   ;;  %v1161_v60 = vld [vmem:[%s1453_s11 + $0x174] ss:$8 sps:$4 sm:$0xff]  }
  0x39   : > { %775 = vmatpush1.bf16.msra.mxu0 %v1140_v53  ;;  %v1164_v61 = vld [vmem:[%s1453_s11 + $0x170] ss:$8 sps:$4 sm:$0xff]   ;;  %v1150_v62 = vld [vmem:[%s1453_s11 + $0x34] ss:$8 sps:$4 sm:$0xff]   ;;  %817 = vmatprep.subr.bf16.mxu1 %v1161_v60  ;;  %v1167_v63 = vld [vmem:[%s1453_s11 + $0x164] ss:$8 sps:$4 sm:$0xff]  }
  0x3a   : > { %776 = vmatprep.subr.bf16.mxu0 %v1141_v54  ;;  %818 = vmatpush1.bf16.msra.mxu1 %v1164_v61  ;;  %v1170_v0 = vld [vmem:[%s1453_s11 + $0x160] ss:$8 sps:$4 sm:$0xff]   ;;  %v1152_v1 = vld [vmem:[%s1453_s11 + $0x30] ss:$8 sps:$4 sm:$0xff]   ;;  %v1153_v2 = vld [vmem:[%s1453_s11 + $0x24] ss:$8 sps:$4 sm:$0xff]  }
  0x3b   : > { %515 = vperm.xlu0 %1137, %v507_v51   ;;  %819 = vmatprep.subr.bf16.mxu1 %v1167_v63  ;;  %v1173_v3 = vld [vmem:[%s1453_s11 + $0x154] ss:$8 sps:$4 sm:$0xff]   ;;  %v1176_v4 = vld [vmem:[%s1453_s11 + $0x150] ss:$8 sps:$4 sm:$0xff]   ;;  %v1155_v5 = vld [vmem:[%s1453_s11 + $0x20] ss:$8 sps:$4 sm:$0xff]  }
  0x3c   : > { %v1179_v6 = vld [vmem:[%s1453_s11 + $0x144] ss:$8 sps:$4 sm:$0xff]   ;;  %v1156_v7 = vld [vmem:[%s1453_s11 + $0x14] ss:$8 sps:$4 sm:$0xff]   ;;  %v1158_v8 = vld [vmem:[%s1453_s11 + $0x10] ss:$8 sps:$4 sm:$0xff]  }
  0x3d   : > { %777 = vmatpush1.bf16.msra.mxu0 %v1143_v55  ;;  %v1182_v9 = vld [vmem:[%s1453_s11 + $0x140] ss:$8 sps:$4 sm:$0xff]   ;;  %v1185_v10 = vld [vmem:[%s1453_s11 + $0x134] ss:$8 sps:$4 sm:$0xff]   ;;  %v1159_v11 = vld [vmem:[%s1453_s11 + $0x4] ss:$8 sps:$4 sm:$0xff]  }
  0x3e   : > { %778 = vmatprep.subr.bf16.mxu0 %v1144_v56  ;;  %820 = vmatpush1.bf16.msra.mxu1 %v1170_v0  ;;  %v1188_v12 = vld [vmem:[%s1453_s11 + $0x130] ss:$8 sps:$4 sm:$0xff]   ;;  %v1163_v13 = vld [vmem:[%s1453_s11] ss:$8 sps:$4 sm:$0xff]   ;;  %v1191_v14 = vld [vmem:[%s1453_s11 + $0x124] ss:$8 sps:$4 sm:$0xff]  }
  0x3f   : > { %821 = vmatprep.subr.bf16.mxu1 %v1173_v3  ;;  %v1165_v15 = vld [vmem:[%s1453_s11 + $0xf4] ss:$8 sps:$4 sm:$0xff]   ;;  %v1194_v16 = vld [vmem:[%s1453_s11 + $0x120] ss:$8 sps:$4 sm:$0xff]   ;;  %v1169_v17 = vld [vmem:[%s1453_s11 + $0xf0] ss:$8 sps:$4 sm:$0xff]  }
  0x40   : > { %v1197_v18 = vld [vmem:[%s1453_s11 + $0x114] ss:$8 sps:$4 sm:$0xff]   ;;  %v1171_v19 = vld [vmem:[%s1453_s11 + $0xe4] ss:$8 sps:$4 sm:$0xff]   ;;  %v1200_v20 = vld [vmem:[%s1453_s11 + $0x110] ss:$8 sps:$4 sm:$0xff]  }
  0x41   : > { %779 = vmatpush1.bf16.msra.mxu0 %v1146_v57  ;;  %v1175_v21 = vld [vmem:[%s1453_s11 + $0xe0] ss:$8 sps:$4 sm:$0xff]   ;;  %v1203_v22 = vld [vmem:[%s1453_s11 + $0x104] ss:$8 sps:$4 sm:$0xff]   ;;  %v1177_v23 = vld [vmem:[%s1453_s11 + $0xd4] ss:$8 sps:$4 sm:$0xff]  }
  0x42   : > { %780 = vmatprep.subr.bf16.mxu0 %v1147_v58  ;;  %822 = vmatpush1.bf16.msra.mxu1 %v1176_v4  ;;  %v1206_v24 = vld [vmem:[%s1453_s11 + $0x100] ss:$8 sps:$4 sm:$0xff]   ;;  %v1181_v25 = vld [vmem:[%s1453_s11 + $0xd0] ss:$8 sps:$4 sm:$0xff]   ;;  %v1183_v26 = vld [vmem:[%s1453_s11 + $0xc4] ss:$8 sps:$4 sm:$0xff]  }
  0x43   : > { %823 = vmatprep.subr.bf16.mxu1 %v1179_v6  ;;  %v1209_v27 = vld [vmem:[%s1532_s0 + $0x8] ss:$12 sps:$4 sm:$0xff]   ;;  %v1193_v30 = vld [vmem:[%s1453_s11 + $0xb0] ss:$8 sps:$4 sm:$0xff]   ;;  %v1195_v31 = vld [vmem:[%s1453_s11 + $0xa4] ss:$8 sps:$4 sm:$0xff]  }
  0x44   : > { %v1187_v28 = vld [vmem:[%s1453_s11 + $0xc0] ss:$8 sps:$4 sm:$0xff]   ;;  %v1189_v29 = vld [vmem:[%s1453_s11 + $0xb4] ss:$8 sps:$4 sm:$0xff]   ;;  %v1205_v34 = vld [vmem:[%s1453_s11 + $0x90] ss:$8 sps:$4 sm:$0xff]  }
  0x45   : > { %781 = vmatpush1.bf16.msra.mxu0 %v1149_v59  ;;  %v1199_v32 = vld [vmem:[%s1453_s11 + $0xa0] ss:$8 sps:$4 sm:$0xff]   ;;  %v1201_v33 = vld [vmem:[%s1453_s11 + $0x94] ss:$8 sps:$4 sm:$0xff]   ;;  %v1207_v35 = vld [vmem:[%s1453_s11 + $0x84] ss:$8 sps:$4 sm:$0xff]  }
  0x46   : > { %782 = vmatprep.subr.bf16.mxu0 %v1150_v62  ;;  %824 = vmatpush1.bf16.msra.mxu1 %v1182_v9  ;;  %v1210_v36 = vld [vmem:[%s1453_s11 + $0x80] ss:$8 sps:$4 sm:$0xff]  }
  0x47   : > { %825 = vmatprep.subr.bf16.mxu1 %v1185_v10  ;;  %v1211_v37 = vld [vmem:[%s1532_s0] ss:$12 sps:$4 sm:$0xff]  }
  0x49   : > { %783 = vmatpush1.bf16.msra.mxu0 %v1152_v1 }
  0x4a   : > { %784 = vmatprep.subr.bf16.mxu0 %v1153_v2  ;;  %826 = vmatpush1.bf16.msra.mxu1 %v1188_v12 }
  0x4b   : > { %827 = vmatprep.subr.bf16.mxu1 %v1191_v14 }
  0x4d   : > { %785 = vmatpush1.bf16.msra.mxu0 %v1155_v5 }
  0x4e   : > { %786 = vmatprep.subr.bf16.mxu0 %v1156_v7  ;;  %828 = vmatpush1.bf16.msra.mxu1 %v1194_v16 }
  0x4f   : > { %829 = vmatprep.subr.bf16.mxu1 %v1197_v18 }
  0x51   : > { %787 = vmatpush1.bf16.msra.mxu0 %v1158_v8 }
  0x52   : > { %788 = vmatprep.subr.bf16.mxu0 %v1159_v11  ;;  %830 = vmatpush1.bf16.msra.mxu1 %v1200_v20 }
  0x53   : > { %831 = vmatprep.subr.bf16.mxu1 %v1203_v22 }
  0x55   : > { %789 = vmatpush1.bf16.msra.mxu0 %v1163_v13 }
  0x56   : > { %790 = vmatprep.subr.bf16.mxu0 %v1165_v15  ;;  %832 = vmatpush1.bf16.msra.mxu1 %v1206_v24 }
  0x59   : > { %791 = vmatpush2.bf16.msra.mxu0 %v1169_v17  ;;  %850 = vmatmul.mubr.bf16.vlgmr.msra.gmra.mxu1 %v1209_v27 }
  0x5a   : > { %792 = vmatprep.subr.bf16.mxu0 %v1171_v19 }
  0x5d   : > { %793 = vmatpush2.bf16.msra.mxu0 %v1175_v21 }
  0x5e   : > { %794 = vmatprep.subr.bf16.mxu0 %v1177_v23 }
  0x61   : > { %795 = vmatpush2.bf16.msra.mxu0 %v1181_v25 }
  0x62   : > { %796 = vmatprep.subr.bf16.mxu0 %v1183_v26 }
  0x65   : > { %797 = vmatpush2.bf16.msra.mxu0 %v1187_v28 }
  0x66   : > { %798 = vmatprep.subr.bf16.mxu0 %v1189_v29 }
  0x69   : > { %799 = vmatpush2.bf16.msra.mxu0 %v1193_v30 }
  0x6a   : > { %800 = vmatprep.subr.bf16.mxu0 %v1195_v31 }
  0x6d   : > { %801 = vmatpush2.bf16.msra.mxu0 %v1199_v32 }
  0x6e   : > { %802 = vmatprep.subr.bf16.mxu0 %v1201_v33 }
  0x71   : > { %803 = vmatpush2.bf16.msra.mxu0 %v1205_v34 }
  0x72   : > { %804 = vmatprep.subr.bf16.mxu0 %v1207_v35 }
  0x75   : > { %805 = vmatpush2.bf16.msra.mxu0 %v1210_v36 }
  0x78   : > { %807 = vmatmul.mubr.bf16.vlgmr.msra.gmra.mxu0 %v1211_v37 }
  0xb2   : > { %v511_v39 = vpop.permute.xlu0 %510 }
  0xb6   : > { %v516_v45 = vpop.permute.xlu0 %515 }
 0x119   : > { %v851_v38 = vpop.f32.mrf.mxu1 }
 0x11b   : > { %v853_v40 = vpop.f32.mrf.mxu1 }
 0x11d   : > { %v855_v47 = vpop.f32.mrf.mxu1 }
 0x11f   : > { %v857_v56 = vpop.f32.mrf.mxu1 }
 0x138   : > { %v808_v41 = vpop.f32.mrf.mxu0 }
 0x139   : > { %v809_v42 = vadd.f32 %v808_v41, %v511_v39 }
 0x13a   : > { %v810_v43 = vpop.f32.mrf.mxu0 }
 0x13b   : > { %v852_v44 = vadd.f32 %v851_v38, %v809_v42  ;;  %v811_v46 = vadd.f32 %v810_v43, %v511_v39 }
 0x13c   : > { %v812_v48 = vpop.f32.mrf.mxu0 }
 0x13d   : > { %v1083_v49 = vmul.f32 -1.442695, %v852_v44  ;;  %v854_v50 = vadd.f32 %v853_v40, %v811_v46  ;;  %v813_v51 = vadd.f32 %v812_v48, %v516_v45 }
 0x13e   : > { %v814_v52 = vpop.f32.mrf.mxu0 }
 0x13f   : > { %1214 = vpow2.f32 %v1083_v49  ;;  %v1084_v53 = vmul.f32 -1.442695, %v854_v50  ;;  %v856_v54 = vadd.f32 %v855_v47, %v813_v51  ;;  %v815_v55 = vadd.f32 %v814_v52, %v516_v45 }
 0x141   : > { %1216 = vpow2.f32 %v1084_v53  ;;  %v1085_v57 = vmul.f32 -1.442695, %v856_v54  ;;  %v858_v58 = vadd.f32 %v857_v56, %v815_v55 }
 0x143   : > { %1218 = vpow2.f32 %v1085_v57  ;;  %v1086_v59 = vmul.f32 -1.442695, %v858_v58 }
 0x145   : > { %1220 = vpow2.f32 %v1086_v59 }
 0x14c   : > { %v1215_v60 = vpop.eup %1214 }
 0x14d   : > { %v872_v61 = vadd.f32 1.0, %v1215_v60 }
 0x14e   : > { %v1217_v62 = vpop.eup %1216 }
 0x14f   : > { %1222 = vrcp.f32 %v872_v61  ;;  %v873_v63 = vadd.f32 1.0, %v1217_v62 }
 0x150   : > { %v1219_v0 = vpop.eup %1218 }
 0x151   : > { %1224 = vrcp.f32 %v873_v63  ;;  %v874_v1 = vadd.f32 1.0, %v1219_v0 }
 0x152   : > { %v1221_v2 = vpop.eup %1220 }
 0x153   : > { %1226 = vrcp.f32 %v874_v1  ;;  %v875_v3 = vadd.f32 1.0, %v1221_v2 }
 0x155   : > { %1228 = vrcp.f32 %v875_v3 }
 0x15c   : > { %v1223_v4 = vpop.eup %1222 }
 0x15d   : > { %884 = vst [vmem:[%s436_s25] sm:$0xff] %v1223_v4 }
 0x15e   : > { %v1225_v5 = vpop.eup %1224 }
 0x15f   : > { %885 = vst [vmem:[%s436_s25 + $0x8] sm:$0xff] %v1225_v5  ;;  %894 = sbr.rel (!%p1326_p6) target bundleno = 364 (0x16c), region = 74 }
 0x160   : > { %v1227_v6 = vpop.eup %1226 }
 0x161   : > { %886 = vst [vmem:[%s436_s25 + $0x10] sm:$0xff] %v1227_v6 }
 0x162   : > { %v1229_v7 = vpop.eup %1228 }
 0x163   : > { %887 = vst [vmem:[%s436_s25 + $0x18] sm:$0xff] %v1229_v7 }
 0x164   : > { %v913_v8 = vld [vmem:[%s436_s25] sm:$0xff] }
 0x165   : > { %914 = vst [vmem:[%s900_s28] sm:$0xff] %v913_v8 }
 0x166   : > { %v915_v9 = vld [vmem:[%s436_s25 + $0x8] sm:$0xff] }
 0x167   : > { %916 = vst [vmem:[%s900_s28 + $0x8] sm:$0xff] %v915_v9 }
 0x168   : > { %v917_v10 = vld [vmem:[%s436_s25 + $0x10] sm:$0xff] }
 0x169   : > { %918 = vst [vmem:[%s900_s28 + $0x20] sm:$0xff] %v917_v10 }
 0x16a   : > { %v919_v11 = vld [vmem:[%s436_s25 + $0x18] sm:$0xff] }
 0x16b   : > { %920 = vst [vmem:[%s900_s28 + $0x28] sm:$0xff] %v919_v11 }
 0x16c PF: > { %s13_s16 = sadd.s32 1, %s1268_s16   ;;  %s1537_s12 = smov %s1256_s13 }
 0x16d   : > { %p10_p11 = scmp.ge.s32.totalorder %s13_s16, 4   ;;  %s1538_s13 = smov %s1331_s22 }
 0x16e   : > { %s1539_s14 = smov %s1264_s15  ;;  %s1540_s15 = smov %s1542_s17 }
 0x16f   :  { %12 = sbr.rel (!%p10_p11) target bundleno = 3 (0x3), region = 134 }

</bundles_post_ra>
